<compile_context>
chip_gen: v7x
topology: tpu7x:2x2x1
jax: 0.10.0
libtpu: 0.0.40
codegen_flags: <defaults>
</compile_context>

<pallas_src>
import functools

import jax
import jax.numpy as jnp
from jax.experimental import pallas as pl
from jax.experimental.pallas import tpu as pltpu

LRELU_SLOPE = 0.1
HALO = 128   # halo block width; must satisfy (K - 1) * dilation <= HALO


def get_padding(kernel_size, dilation=1):
    return int((kernel_size * dilation - dilation) / 2)


# --------------------------- Pallas kernel ---------------------------
def _res_dilated_conv_kernel(xm_ref, xh_ref, w_ref, b_ref, o_ref, *,
                             kernel_size, dilation, pad, slope, compute_dtype):
    # xm_ref: (1, C, T_TILE)  main tile of the left-padded input
    # xh_ref: (1, C, HALO)    next HALO samples (overlap / halo)
    # w_ref:  (K, C, C)       conv weights, w_ref[k][c_out, c_in]  (bf16 or f32)
    # b_ref:  (C, 1)          bias (f32)
    # o_ref:  (1, C, T_TILE)  output tile: x + conv(leaky_relu(x))
    t_tile = xm_ref.shape[-1]
    c = xm_ref.shape[1]

    window = jnp.concatenate([xm_ref[0], xh_ref[0]], axis=-1)          # (C, T_TILE+HALO)
    win_f32 = window.astype(jnp.float32)
    if slope != 1.0:
        act = jnp.where(win_f32 >= 0.0, win_f32, slope * win_f32)      # leaky_relu
    else:
        act = win_f32

    acc = jnp.zeros((c, t_tile), jnp.float32)
    for k in range(kernel_size):                                       # static unroll, K=3
        off = k * dilation
        tap = act[:, off:off + t_tile].astype(compute_dtype)           # (C, T_TILE)
        acc = acc + jnp.dot(w_ref[k].astype(compute_dtype), tap,
                            preferred_element_type=jnp.float32)

    residual = win_f32[:, pad:pad + t_tile]                            # pre-activation x
    y = acc + b_ref[...].astype(jnp.float32) + residual
    o_ref[0] = y.astype(o_ref.dtype)


# --------------------------- wrapper ---------------------------
def res_dilated_conv(x, w, b, *, dilation, slope=LRELU_SLOPE, t_tile=1024,
                     use_bf16=True):
    """Returns x + Conv1d(leaky_relu(x, slope), w, b, stride=1, dilation=dilation,
    padding=get_padding(K, dilation)).   x: (B, C, T), w: (C, C, K), b: (C,)."""
    B, C, T = x.shape
    c_out, c_in, K = w.shape
    assert c_out == C and c_in == C, "ResBlock2 convs map channels -> channels"
    pad = get_padding(K, dilation)
    assert (K - 1) * dilation <= HALO, "halo too small for this kernel/dilation"

    # time tiling: multiple of 128, capped at what the sequence actually needs
    t_tile = max(HALO, (min(t_tile, pl.cdiv(T, HALO) * HALO) // HALO) * HALO)
    n_tiles = pl.cdiv(T, t_tile)
    t_out_padded = n_tiles * t_tile
    tiles_per_halo = t_tile // HALO

    # left-pad by the conv's zero padding; right-pad so each main tile + halo is in bounds
    xp = jnp.pad(x, ((0, 0), (0, 0), (pad, t_out_padded + HALO - T - pad)))

    compute_dtype = jnp.bfloat16 if use_bf16 else jnp.float32
    w_kcc = jnp.transpose(w, (2, 0, 1)).astype(compute_dtype)          # (K, C, C)
    b_c1 = b.reshape(C, 1).astype(jnp.float32)                         # lane-free bias

    kernel = functools.partial(
        _res_dilated_conv_kernel, kernel_size=K, dilation=dilation, pad=pad,
        slope=slope, compute_dtype=compute_dtype)

    itemsize = xp.dtype.itemsize
    bytes_accessed = (xp.size * itemsize                               # main stream
                      + B * n_tiles * C * HALO * itemsize              # halo re-reads
                      + w_kcc.size * w_kcc.dtype.itemsize
                      + b_c1.size * 4
                      + B * C * t_out_padded * x.dtype.itemsize)       # output
    cost = pl.CostEstimate(flops=2 * B * C * C * K * t_out_padded,
                           transcendentals=0,
                           bytes_accessed=bytes_accessed)

    out = pl.pallas_call(
        kernel,
        out_shape=jax.ShapeDtypeStruct((B, C, t_out_padded), x.dtype),
        grid=(B, n_tiles),
        in_specs=[
            # main input tile, streamed along time
            pl.BlockSpec((1, C, t_tile), lambda bb, tt: (bb, 0, tt)),
            # 128-wide halo: the first HALO samples of the *next* tile (same array)
            pl.BlockSpec((1, C, HALO),
                         lambda bb, tt: (bb, 0, (tt + 1) * tiles_per_halo)),
            # weights / bias: constant index_map -> stay resident in VMEM
            pl.BlockSpec((K, C, C), lambda bb, tt: (0, 0, 0)),
            pl.BlockSpec((C, 1), lambda bb, tt: (0, 0)),
        ],
        out_specs=pl.BlockSpec((1, C, t_tile), lambda bb, tt: (bb, 0, tt)),
        compiler_params=pltpu.CompilerParams(
            dimension_semantics=("parallel", "parallel"),
            vmem_limit_bytes=48 * 1024 * 1024),
        cost_estimate=cost,
    )(xp, xp, w_kcc, b_c1)
    return out[:, :, :T]


# --------------------------- ResBlock2 ---------------------------
def init_resblock2(key, channels, kernel_size=3, dilation=(1, 3)):
    # TODO(synk): weight_norm is a reparametrization only (forward == plain Conv1d),
    # so plain weights are used directly; init_weights => normal(0, 0.01).
    convs = []
    keys = jax.random.split(key, 2 * len(dilation))
    for i, _ in enumerate(dilation):
        w = 0.01 * jax.random.normal(
            keys[2 * i], (channels, channels, kernel_size), jnp.float32)
        bound = 1.0 / (channels * kernel_size) ** 0.5      # PyTorch Conv1d bias init
        bb = jax.random.uniform(keys[2 * i + 1], (channels,), jnp.float32, -bound, bound)
        convs.append((w, bb))
    return {"convs": convs, "dilation": tuple(dilation)}


def resblock2_forward(params, x, *, t_tile=1024, use_bf16=True):
    for (w, b), d in zip(params["convs"], params["dilation"]):
        x = res_dilated_conv(x, w, b, dilation=d, slope=LRELU_SLOPE,
                             t_tile=t_tile, use_bf16=use_bf16)
    return x


def ref_resblock2_forward(params, x):
    """Pure-JAX reference (matches the PyTorch forward)."""
    for (w, b), d in zip(params["convs"], params["dilation"]):
        xt = jnp.where(x >= 0.0, x, LRELU_SLOPE * x)
        pad = get_padding(w.shape[-1], d)
        y = jax.lax.conv_general_dilated(
            xt, w, window_strides=(1,), padding=[(pad, pad)],
            rhs_dilation=(d,), dimension_numbers=("NCH", "OIH", "NCH"))
        x = y + b[None, :, None] + x
    return x


if __name__ == "__main__":
    key = jax.random.PRNGKey(0)
    k_params, k_x = jax.random.split(key)

    # small but TPU-shaped: C multiple of 8/128, T not a multiple of the tile
    B, C, T = 2, 128, 400
    params = init_resblock2(k_params, channels=C, kernel_size=3, dilation=(1, 3))
    x = jax.random.normal(k_x, (B, C, T), jnp.float32)

    # t_tile=256 so this small example still exercises multi-tile + halo crossing
    fwd = jax.jit(lambda xx: resblock2_forward(params, xx, t_tile=256, use_bf16=True))
    out = jax.block_until_ready(fwd(x))

    want = ref_resblock2_forward(params, x)
    rel_err = jnp.max(jnp.abs(out - want)) / (jnp.max(jnp.abs(want)) + 1e-6)
    assert out.shape == x.shape
    assert bool(rel_err < 2e-2), f"Pallas ResBlock2 mismatch, rel err {rel_err}"
    print("KERNEL_OK")
</pallas_src>

<mosaic_0001>
module attributes {stable_mosaic.version = 11 : i64} {
  func.func @_res_dilated_conv_kernel(%arg0: i32, %arg1: i32, %arg2: memref<1x128x256xf32, #tpu.memory_space<vmem>>, %arg3: memref<1x128x128xf32, #tpu.memory_space<vmem>>, %arg4: memref<3x128x128xbf16, #tpu.memory_space<vmem>>, %arg5: memref<128x1xf32, #tpu.memory_space<vmem>>, %arg6: memref<1x128x256xf32, #tpu.memory_space<vmem>>) attributes {dimension_semantics = [#tpu.dimension_semantics<parallel>, #tpu.dimension_semantics<parallel>], iteration_bounds = array<i64: 2, 2>, scalar_prefetch = 0 : i64, scratch_operands = 0 : i64, tpu.core_type = #tpu.core_type<tc>, window_params = [{transform_indices = @transform_0, window_bounds = array<i64: 1, 128, 256>}, {transform_indices = @transform_1, window_bounds = array<i64: 1, 128, 128>}, {pipeline_mode = #tpu.pipeline_mode<synchronous>, transform_indices = @transform_2, window_bounds = array<i64: 3, 128, 128>}, {pipeline_mode = #tpu.pipeline_mode<synchronous>, transform_indices = @transform_3, window_bounds = array<i64: 128, 1>}, {transform_indices = @transform_4, window_bounds = array<i64: 1, 128, 256>}]} {
    %c0 = arith.constant 0 : index
    %c0_0 = arith.constant 0 : index
    %c0_1 = arith.constant 0 : index
    %0 = vector.load %arg2[%c0, %c0_0, %c0_1] : memref<1x128x256xf32, #tpu.memory_space<vmem>>, vector<1x128x256xf32>
    %1 = vector.shape_cast %0 : vector<1x128x256xf32> to vector<128x256xf32>
    %c0_2 = arith.constant 0 : index
    %c0_3 = arith.constant 0 : index
    %c0_4 = arith.constant 0 : index
    %2 = vector.load %arg3[%c0_2, %c0_3, %c0_4] : memref<1x128x128xf32, #tpu.memory_space<vmem>>, vector<1x128x128xf32>
    %3 = vector.shape_cast %2 : vector<1x128x128xf32> to vector<128x128xf32>
    %4 = tpu.concatenate %1, %3 in 1 : vector<128x256xf32>, vector<128x128xf32> -> vector<128x384xf32>
    %cst = arith.constant 0.000000e+00 : f32
    %5 = vector.broadcast %cst : f32 to vector<128x384xf32>
    %6 = arith.cmpf oge, %4, %5 : vector<128x384xf32>
    %cst_5 = arith.constant 1.000000e-01 : f32
    %7 = vector.broadcast %cst_5 : f32 to vector<128x384xf32>
    %8 = arith.mulf %7, %4 : vector<128x384xf32>
    %9 = arith.select %6, %4, %8 : vector<128x384xi1>, vector<128x384xf32>
    %cst_6 = arith.constant 0.000000e+00 : f32
    %10 = vector.broadcast %cst_6 : f32 to vector<128x256xf32>
    %11 = vector.extract_strided_slice %9 {offsets = [0, 0], sizes = [128, 256], strides = [1, 1]} : vector<128x384xf32> to vector<128x256xf32>
    %12 = arith.truncf %11 : vector<128x256xf32> to vector<128x256xbf16>
    %c0_7 = arith.constant 0 : index
    %c0_8 = arith.constant 0 : index
    %c0_9 = arith.constant 0 : index
    %13 = vector.load %arg4[%c0_7, %c0_8, %c0_9] : memref<3x128x128xbf16, #tpu.memory_space<vmem>>, vector<1x128x128xbf16>
    %14 = vector.shape_cast %13 : vector<1x128x128xbf16> to vector<128x128xbf16>
    %cst_10 = arith.constant dense<0.000000e+00> : vector<128x256xf32>
    %15 = tpu.matmul %14, %12, %cst_10 {dimension_numbers = #tpu.dot_dimension_numbers<[1], [0], [0], [1], [0, 0, 1, 1], [], []>} : vector<128x128xbf16>, vector<128x256xbf16>, vector<128x256xf32> -> vector<128x256xf32>
    %16 = arith.addf %10, %15 : vector<128x256xf32>
    %17 = vector.extract_strided_slice %9 {offsets = [0, 1], sizes = [128, 256], strides = [1, 1]} : vector<128x384xf32> to vector<128x256xf32>
    %18 = arith.truncf %17 : vector<128x256xf32> to vector<128x256xbf16>
    %c1 = arith.constant 1 : index
    %c0_11 = arith.constant 0 : index
    %c0_12 = arith.constant 0 : index
    %19 = vector.load %arg4[%c1, %c0_11, %c0_12] : memref<3x128x128xbf16, #tpu.memory_space<vmem>>, vector<1x128x128xbf16>
    %20 = vector.shape_cast %19 : vector<1x128x128xbf16> to vector<128x128xbf16>
    %cst_13 = arith.constant dense<0.000000e+00> : vector<128x256xf32>
    %21 = tpu.matmul %20, %18, %cst_13 {dimension_numbers = #tpu.dot_dimension_numbers<[1], [0], [0], [1], [0, 0, 1, 1], [], []>} : vector<128x128xbf16>, vector<128x256xbf16>, vector<128x256xf32> -> vector<128x256xf32>
    %22 = arith.addf %16, %21 : vector<128x256xf32>
    %23 = vector.extract_strided_slice %9 {offsets = [0, 2], sizes = [128, 256], strides = [1, 1]} : vector<128x384xf32> to vector<128x256xf32>
    %24 = arith.truncf %23 : vector<128x256xf32> to vector<128x256xbf16>
    %c2 = arith.constant 2 : index
    %c0_14 = arith.constant 0 : index
    %c0_15 = arith.constant 0 : index
    %25 = vector.load %arg4[%c2, %c0_14, %c0_15] : memref<3x128x128xbf16, #tpu.memory_space<vmem>>, vector<1x128x128xbf16>
    %26 = vector.shape_cast %25 : vector<1x128x128xbf16> to vector<128x128xbf16>
    %cst_16 = arith.constant dense<0.000000e+00> : vector<128x256xf32>
    %27 = tpu.matmul %26, %24, %cst_16 {dimension_numbers = #tpu.dot_dimension_numbers<[1], [0], [0], [1], [0, 0, 1, 1], [], []>} : vector<128x128xbf16>, vector<128x256xbf16>, vector<128x256xf32> -> vector<128x256xf32>
    %28 = arith.addf %22, %27 : vector<128x256xf32>
    %29 = vector.extract_strided_slice %4 {offsets = [0, 1], sizes = [128, 256], strides = [1, 1]} : vector<128x384xf32> to vector<128x256xf32>
    %c0_17 = arith.constant 0 : index
    %c0_18 = arith.constant 0 : index
    %30 = vector.load %arg5[%c0_17, %c0_18] : memref<128x1xf32, #tpu.memory_space<vmem>>, vector<128x1xf32>
    %31 = vector.broadcast %30 : vector<128x1xf32> to vector<128x256xf32>
    %32 = arith.addf %28, %31 : vector<128x256xf32>
    %33 = arith.addf %32, %29 : vector<128x256xf32>
    %c0_19 = arith.constant 0 : index
    %c0_20 = arith.constant 0 : index
    %c0_21 = arith.constant 0 : index
    %34 = vector.load %arg6[%c0_19, %c0_20, %c0_21] : memref<1x128x256xf32, #tpu.memory_space<vmem>>, vector<1x128x256xf32>
    %35 = vector.shape_cast %34 : vector<1x128x256xf32> to vector<128x256xf32>
    %36 = vector.shape_cast %33 : vector<128x256xf32> to vector<1x128x256xf32>
    tpu.vector_store %arg6[%c0_19, %c0_20, %c0_21], %36 {strides = array<i32>} : memref<1x128x256xf32, #tpu.memory_space<vmem>>, vector<1x128x256xf32>,
    return
  }
  func.func @transform_0(%arg0: i32, %arg1: i32) -> (i32, i32, i32) {
    %c0_i32 = arith.constant 0 : i32
    %c0_i32_0 = arith.constant 0 : i32
    return %arg0, %c0_i32, %arg1 : i32, i32, i32
  }
  func.func @transform_1(%arg0: i32, %arg1: i32) -> (i32, i32, i32) {
    %c1_i32 = arith.constant 1 : i32
    %0 = arith.addi %arg1, %c1_i32 : i32
    %c2_i32 = arith.constant 2 : i32
    %1 = arith.muli %0, %c2_i32 : i32
    %c0_i32 = arith.constant 0 : i32
    %c0_i32_0 = arith.constant 0 : i32
    return %arg0, %c0_i32, %1 : i32, i32, i32
  }
  func.func @transform_2(%arg0: i32, %arg1: i32) -> (i32, i32, i32) {
    %c0_i32 = arith.constant 0 : i32
    %c0_i32_0 = arith.constant 0 : i32
    %c0_i32_1 = arith.constant 0 : i32
    %c0_i32_2 = arith.constant 0 : i32
    return %c0_i32, %c0_i32_0, %c0_i32_1 : i32, i32, i32
  }
  func.func @transform_3(%arg0: i32, %arg1: i32) -> (i32, i32) {
    %c0_i32 = arith.constant 0 : i32
    %c0_i32_0 = arith.constant 0 : i32
    %c0_i32_1 = arith.constant 0 : i32
    return %c0_i32, %c0_i32_0 : i32, i32
  }
  func.func @transform_4(%arg0: i32, %arg1: i32) -> (i32, i32, i32) {
    %c0_i32 = arith.constant 0 : i32
    %c0_i32_0 = arith.constant 0 : i32
    return %arg0, %c0_i32, %arg1 : i32, i32, i32
  }
}

module attributes {stable_mosaic.version = 11 : i64} {
  func.func @_res_dilated_conv_kernel(%arg0: i32, %arg1: i32, %arg2: memref<1x128x256xf32, #tpu.memory_space<vmem>>, %arg3: memref<1x128x128xf32, #tpu.memory_space<vmem>>, %arg4: memref<3x128x128xbf16, #tpu.memory_space<vmem>>, %arg5: memref<128x1xf32, #tpu.memory_space<vmem>>, %arg6: memref<1x128x256xf32, #tpu.memory_space<vmem>>) attributes {dimension_semantics = [#tpu.dimension_semantics<parallel>, #tpu.dimension_semantics<parallel>], iteration_bounds = array<i64: 2, 2>, scalar_prefetch = 0 : i64, scratch_operands = 0 : i64, tpu.core_type = #tpu.core_type<tc>, window_params = [{transform_indices = @transform_0, window_bounds = array<i64: 1, 128, 256>}, {transform_indices = @transform_1, window_bounds = array<i64: 1, 128, 128>}, {pipeline_mode = #tpu.pipeline_mode<synchronous>, transform_indices = @transform_2, window_bounds = array<i64: 3, 128, 128>}, {pipeline_mode = #tpu.pipeline_mode<synchronous>, transform_indices = @transform_3, window_bounds = array<i64: 128, 1>}, {transform_indices = @transform_4, window_bounds = array<i64: 1, 128, 256>}]} {
    %c0 = arith.constant 0 : index
    %c0_0 = arith.constant 0 : index
    %c0_1 = arith.constant 0 : index
    %0 = vector.load %arg2[%c0, %c0_0, %c0_1] : memref<1x128x256xf32, #tpu.memory_space<vmem>>, vector<1x128x256xf32>
    %1 = vector.shape_cast %0 : vector<1x128x256xf32> to vector<128x256xf32>
    %c0_2 = arith.constant 0 : index
    %c0_3 = arith.constant 0 : index
    %c0_4 = arith.constant 0 : index
    %2 = vector.load %arg3[%c0_2, %c0_3, %c0_4] : memref<1x128x128xf32, #tpu.memory_space<vmem>>, vector<1x128x128xf32>
    %3 = vector.shape_cast %2 : vector<1x128x128xf32> to vector<128x128xf32>
    %4 = tpu.concatenate %1, %3 in 1 : vector<128x256xf32>, vector<128x128xf32> -> vector<128x384xf32>
    %cst = arith.constant 0.000000e+00 : f32
    %5 = vector.broadcast %cst : f32 to vector<128x384xf32>
    %6 = arith.cmpf oge, %4, %5 : vector<128x384xf32>
    %cst_5 = arith.constant 1.000000e-01 : f32
    %7 = vector.broadcast %cst_5 : f32 to vector<128x384xf32>
    %8 = arith.mulf %7, %4 : vector<128x384xf32>
    %9 = arith.select %6, %4, %8 : vector<128x384xi1>, vector<128x384xf32>
    %cst_6 = arith.constant 0.000000e+00 : f32
    %10 = vector.broadcast %cst_6 : f32 to vector<128x256xf32>
    %11 = vector.extract_strided_slice %9 {offsets = [0, 0], sizes = [128, 256], strides = [1, 1]} : vector<128x384xf32> to vector<128x256xf32>
    %12 = arith.truncf %11 : vector<128x256xf32> to vector<128x256xbf16>
    %c0_7 = arith.constant 0 : index
    %c0_8 = arith.constant 0 : index
    %c0_9 = arith.constant 0 : index
    %13 = vector.load %arg4[%c0_7, %c0_8, %c0_9] : memref<3x128x128xbf16, #tpu.memory_space<vmem>>, vector<1x128x128xbf16>
    %14 = vector.shape_cast %13 : vector<1x128x128xbf16> to vector<128x128xbf16>
    %cst_10 = arith.constant dense<0.000000e+00> : vector<128x256xf32>
    %15 = tpu.matmul %14, %12, %cst_10 {dimension_numbers = #tpu.dot_dimension_numbers<[1], [0], [0], [1], [0, 0, 1, 1], [], []>} : vector<128x128xbf16>, vector<128x256xbf16>, vector<128x256xf32> -> vector<128x256xf32>
    %16 = arith.addf %10, %15 : vector<128x256xf32>
    %17 = vector.extract_strided_slice %9 {offsets = [0, 3], sizes = [128, 256], strides = [1, 1]} : vector<128x384xf32> to vector<128x256xf32>
    %18 = arith.truncf %17 : vector<128x256xf32> to vector<128x256xbf16>
    %c1 = arith.constant 1 : index
    %c0_11 = arith.constant 0 : index
    %c0_12 = arith.constant 0 : index
    %19 = vector.load %arg4[%c1, %c0_11, %c0_12] : memref<3x128x128xbf16, #tpu.memory_space<vmem>>, vector<1x128x128xbf16>
    %20 = vector.shape_cast %19 : vector<1x128x128xbf16> to vector<128x128xbf16>
    %cst_13 = arith.constant dense<0.000000e+00> : vector<128x256xf32>
    %21 = tpu.matmul %20, %18, %cst_13 {dimension_numbers = #tpu.dot_dimension_numbers<[1], [0], [0], [1], [0, 0, 1, 1], [], []>} : vector<128x128xbf16>, vector<128x256xbf16>, vector<128x256xf32> -> vector<128x256xf32>
    %22 = arith.addf %16, %21 : vector<128x256xf32>
    %23 = vector.extract_strided_slice %9 {offsets = [0, 6], sizes = [128, 256], strides = [1, 1]} : vector<128x384xf32> to vector<128x256xf32>
    %24 = arith.truncf %23 : vector<128x256xf32> to vector<128x256xbf16>
    %c2 = arith.constant 2 : index
    %c0_14 = arith.constant 0 : index
    %c0_15 = arith.constant 0 : index
    %25 = vector.load %arg4[%c2, %c0_14, %c0_15] : memref<3x128x128xbf16, #tpu.memory_space<vmem>>, vector<1x128x128xbf16>
    %26 = vector.shape_cast %25 : vector<1x128x128xbf16> to vector<128x128xbf16>
    %cst_16 = arith.constant dense<0.000000e+00> : vector<128x256xf32>
    %27 = tpu.matmul %26, %24, %cst_16 {dimension_numbers = #tpu.dot_dimension_numbers<[1], [0], [0], [1], [0, 0, 1, 1], [], []>} : vector<128x128xbf16>, vector<128x256xbf16>, vector<128x256xf32> -> vector<128x256xf32>
    %28 = arith.addf %22, %27 : vector<128x256xf32>
    %29 = vector.extract_strided_slice %4 {offsets = [0, 3], sizes = [128, 256], strides = [1, 1]} : vector<128x384xf32> to vector<128x256xf32>
    %c0_17 = arith.constant 0 : index
    %c0_18 = arith.constant 0 : index
    %30 = vector.load %arg5[%c0_17, %c0_18] : memref<128x1xf32, #tpu.memory_space<vmem>>, vector<128x1xf32>
    %31 = vector.broadcast %30 : vector<128x1xf32> to vector<128x256xf32>
    %32 = arith.addf %28, %31 : vector<128x256xf32>
    %33 = arith.addf %32, %29 : vector<128x256xf32>
    %c0_19 = arith.constant 0 : index
    %c0_20 = arith.constant 0 : index
    %c0_21 = arith.constant 0 : index
    %34 = vector.load %arg6[%c0_19, %c0_20, %c0_21] : memref<1x128x256xf32, #tpu.memory_space<vmem>>, vector<1x128x256xf32>
    %35 = vector.shape_cast %34 : vector<1x128x256xf32> to vector<128x256xf32>
    %36 = vector.shape_cast %33 : vector<128x256xf32> to vector<1x128x256xf32>
    tpu.vector_store %arg6[%c0_19, %c0_20, %c0_21], %36 {strides = array<i32>} : memref<1x128x256xf32, #tpu.memory_space<vmem>>, vector<1x128x256xf32>,
    return
  }
  func.func @transform_0(%arg0: i32, %arg1: i32) -> (i32, i32, i32) {
    %c0_i32 = arith.constant 0 : i32
    %c0_i32_0 = arith.constant 0 : i32
    return %arg0, %c0_i32, %arg1 : i32, i32, i32
  }
  func.func @transform_1(%arg0: i32, %arg1: i32) -> (i32, i32, i32) {
    %c1_i32 = arith.constant 1 : i32
    %0 = arith.addi %arg1, %c1_i32 : i32
    %c2_i32 = arith.constant 2 : i32
    %1 = arith.muli %0, %c2_i32 : i32
    %c0_i32 = arith.constant 0 : i32
    %c0_i32_0 = arith.constant 0 : i32
    return %arg0, %c0_i32, %1 : i32, i32, i32
  }
  func.func @transform_2(%arg0: i32, %arg1: i32) -> (i32, i32, i32) {
    %c0_i32 = arith.constant 0 : i32
    %c0_i32_0 = arith.constant 0 : i32
    %c0_i32_1 = arith.constant 0 : i32
    %c0_i32_2 = arith.constant 0 : i32
    return %c0_i32, %c0_i32_0, %c0_i32_1 : i32, i32, i32
  }
  func.func @transform_3(%arg0: i32, %arg1: i32) -> (i32, i32) {
    %c0_i32 = arith.constant 0 : i32
    %c0_i32_0 = arith.constant 0 : i32
    %c0_i32_1 = arith.constant 0 : i32
    return %c0_i32, %c0_i32_0 : i32, i32
  }
  func.func @transform_4(%arg0: i32, %arg1: i32) -> (i32, i32, i32) {
    %c0_i32 = arith.constant 0 : i32
    %c0_i32_0 = arith.constant 0 : i32
    return %arg0, %c0_i32, %arg1 : i32, i32, i32
  }
}

</mosaic_0001>

<bundles_post_ra>
// kernel: _lambda_.2
= control target key start
LH: loop header
LB: loop body
LE: loop exit
PB: predicated region body
PF: predicated region fallthrough
CT: control target
= control target key end

     0   :  { %s4540_s0 = inlined_call_operand.vmem [shape: f32[2,128,640], index: 0, kind: input, shape index: {}, may-alias: {0,1}]   ;;  %s4541_s1 = inlined_call_operand.vmem [shape: f32[2,128,640], index: 1, kind: input, shape index: {}, may-alias: {0,1}]   ;;  %s4542_s2 = inlined_call_operand.vmem [shape: bf16[3,128,128], index: 2, kind: input, shape index: {}]   ;;  %s4543_s3 = inlined_call_operand.vmem [shape: f32[128,1], index: 3, kind: input, shape index: {}]   ;;  %s4544_s4 = inlined_call_operand.vmem [shape: f32[2,128,512], index: 4, kind: output, shape index: {}]  }
   0x1   :  { %4573 = sst [smem:[#allocation26_spill]] %s4540_s0 }
   0x2   :  { %s3143_s15 = smov 0   ;;  %s3145_s16 = smov 0  }
   0x3   :  { %s3147_s17 = smov 0   ;;  %s3149_s18 = smov 0  }
   0x4   :  { %s3151_s19 = smov 0   ;;  %s3153_s20 = smov 0  }
   0x5   :  { %s3155_s21 = smov 0   ;;  %s3157_s22 = smov 0  }
   0x6   :  { %s3159_s23 = smov 0  }
   0x7 LB: > { %4574 = sst [smem:[#allocation5_spill]] %s3077_s18  ;;  %s2509_s24 = sadd.s32 4294967295, %s3097_s23   ;;  %s3097_s23 = sphi %s3159_s23, %s14_s23   ;;  %s3093_s22 = sphi %s3157_s22, %s4652_s22   ;;  %s3089_s21 = sphi %s3155_s21, %s4647_s21   ;;  %s3085_s20 = sphi %s3153_s20, %s4651_s20   ;;  %s3081_s19 = sphi %s3151_s19, %s4646_s19   ;;  %s3077_s18 = sphi %s3149_s18, %s4645_s18   ;;  %s3073_s17 = sphi %s3147_s17, %s4644_s17   ;;  %s3069_s16 = sphi %s3145_s16, %s4650_s16   ;;  %s3065_s15 = sphi %s3143_s15, %s4649_s15  }
   0x8   : > { %4575 = sst [smem:[#allocation6_spill]] %s3089_s21  ;;  %s23_s25 = sadd.s32 1, %s3089_s21 }
   0x9   : > { %p24_p0 = scmp.ge.s32.totalorder %s23_s25, 2  ;;  %s26_s26 = sadd.s32 1, %s3093_s22 }
   0xa   : > { %s35_s27 = sadd.s32 1, %s3077_s18  ;;  %p42_p1 = scmp.ne.s32.totalorder %s3077_s18, %s3073_s17 }
   0xb   : > { %s4654_s25 = smov (%p24_p0, %s23_s25), 0  ;;  %s4656_s26 = smov (!%p24_p0, %s26_s26), %s3093_s22 }
   0xc   : > { %4576 = sst [smem:[#allocation7_spill]] %s4654_s25  ;;  %s31_s28 = ssub.s32 %s3089_s21, %s4654_s25 }
   0xd   : > { %p43_p2 = scmp.eq.s32.totalorder %s3097_s23, 0  ;;  %p28_p3 = scmp.ge.s32.totalorder %s4656_s26, 2 }
   0xe   : > { %s3201_s29 = sshll.u32 %s3089_s21, 1  ;;  %s2629_s6 = sshll.u32 %s4654_s25, 1 }
   0xf   : > { %p3208_p4 = por %p43_p2, %p42_p1  ;;  %s2628_s5 = sadd.s32 2, %s3201_s29 }
  0x10   : > { %s4658_s26 = smov (%p28_p3, %s4656_s26), 0  ;;  %s67_s7 = sadd.s32 1, %s3069_s16 }
  0x11   : > { %4578 = sst [smem:[#allocation8_spill]] %s4658_s26  ;;  %s30_s8 = ssub.s32 %s3093_s22, %s4658_s26 }
  0x12   : > { %s2630_s9 = sadd.s32 2, %s2629_s6  ;;  %s32_s10 = sor.u32 %s31_s28, %s30_s8 }
  0x13   : > { %s63_s11 = ssub.s32 %s2628_s5, %s2630_s9  ;;  %p33_p5 = scmp.eq.s32.totalorder %s32_s10, 0 }
  0x14   : > { %s64_s12 = sor.u32 %s63_s11, %s30_s8  ;;  %p74_p7 = scmp.ne.s32.totalorder %s3069_s16, %s3065_s15 }
  0x15   : > { %p65_p6 = scmp.eq.s32.totalorder %s64_s12, 0  ;;  %p148_p9 = scmp.eq.s32.totalorder %s2509_s24, 3 }
  0x16   : > { %s3222_s13 = scalar_select %p33_p5, %s3077_s18, %s35_s27  }
  0x17   : > { %s3225_s14 = scalar_select %p65_p6, %s3069_s16, %s67_s7  }
  0x18   : > { %4579 = sst [smem:[#allocation9_spill]] %s3222_s13  ;;  %p3229_p8 = por %p74_p7, %p43_p2 }
  0x19   : > { %p3236_p10 = por %p148_p9, %p42_p1  ;;  %p2514_p11 = scmp.ge.s32.totalorder %s3097_s23, 4 }
  0x1b   : > { %176 = sbr.rel (%p2514_p11) target bundleno = 69 (0x45), region = 24 }
  0x22   : > { %179 = sbr.rel (!%p3208_p4) target bundleno = 54 (0x36), region = 28  ;;  %s181_s27 = sand.u32 (%p3208_p4), 1, %s3077_s18  }
  0x23   : > { %s3244_s28 = sshll.u32 (%p3208_p4), %s181_s27, 8  ;;  %s2715_s5 = smul.u32 (%p3208_p4), 80, %s3093_s22 }
  0x24   : > { %s4582_s0 = sld [smem:[#allocation26_spill]] (%p3208_p4)  ;;  %s183_s10 = scalar_lea.vmem (%p3208_p4), [#allocation2], %s3244_s28  }
  0x25   : > { %s191_s24 = sadd.s32 (%p3208_p4), %s2715_s5, %s3201_s29  ;;  %s4583_s30 = smov (%p3208_p4), %s183_s10 }
  0x26   : > { %s2519_s6 = sshll.u32 (%p3208_p4), %s191_s24, 3  ;;  %s3261_s12 = smov (%p3208_p4), 0  }
  0x27   : > { %s3263_s27 = smov (%p3208_p4), 0  }
  0x2a   : > { %s3251_s9 = scalar_lea.vmem %s4582_s0, %s2519_s6  }
  0x2b   : > { %s4584_s11 = smov %s3251_s9 }
  0x2c LB: >> { %v419_v0 = vld [vmem:[%s3105_s11] sm:$0xff]  ;;  %v421_v1 = vld [vmem:[%s3105_s11 + $0x28] sm:$0xff]  ;;  %v423_v2 = vld [vmem:[%s3105_s11 + $0x50] sm:$0xff]  ;;  %s451_s5 = sadd.s32 1, %s3109_s12  ;;  %s413_s27 = sadd.s32 1, %s3113_s27   ;;  %s3113_s27 = sphi %s3263_s27, %s413_s27   ;;  %s3109_s12 = sphi %s3261_s12, %s4585_s12   ;;  %s3105_s11 = sphi %s4584_s11, %s456_s11   ;;  %s3101_s30 = sphi %s4583_s30, %s457_s30  }
  0x2d   : >> { %420 = vst [vmem:[%s3101_s30] sm:$0xff] %v419_v0  ;;  %422 = vst [vmem:[%s3101_s30 + $0x10] sm:$0xff] %v421_v1  ;;  %v425_v3 = vld [vmem:[%s3105_s11 + $0x78] sm:$0xff]  ;;  %v427_v4 = vld [vmem:[%s3105_s11 + $0xa0] sm:$0xff]  ;;  %p452_p12 = scmp.ge.s32.totalorder %s451_s5, 2  ;;  %p412_p13 = scmp.ge.s32.totalorder %s413_s27, 2 }
  0x2e   : >> { %424 = vst [vmem:[%s3101_s30 + $0x20] sm:$0xff] %v423_v2  ;;  %v429_v5 = vld [vmem:[%s3105_s11 + $0xc8] sm:$0xff]  ;;  %426 = vst [vmem:[%s3101_s30 + $0x30] sm:$0xff] %v425_v3  ;;  %v431_v6 = vld [vmem:[%s3105_s11 + $0xf0] sm:$0xff] }
  0x2f   : >> { %428 = vst [vmem:[%s3101_s30 + $0x40] sm:$0xff] %v427_v4  ;;  %430 = vst [vmem:[%s3101_s30 + $0x50] sm:$0xff] %v429_v5  ;;  %v433_v7 = vld [vmem:[%s3105_s11 + $0x118] sm:$0xff]  ;;  %v435_v8 = vld [vmem:[%s3105_s11 + $0x140] sm:$0xff]  ;;  %s4660_s5 = smov (%p452_p12, %s451_s5), 0  ;;  %415 = sbr.rel (!%p412_p13) target bundleno = 44 (0x2c), region = 237 }
  0x30   : >> { %432 = vst [vmem:[%s3101_s30 + $0x60] sm:$0xff] %v431_v6  ;;  %434 = vst [vmem:[%s3101_s30 + $0x70] sm:$0xff] %v433_v7  ;;  %v437_v9 = vld [vmem:[%s3105_s11 + $0x168] sm:$0xff]  ;;  %v439_v10 = vld [vmem:[%s3105_s11 + $0x190] sm:$0xff]  ;;  %s2530_s24 = sshll.u32 %s4660_s5, 3  ;;  %s4585_s12 = smov %s4660_s5 }
  0x31   : >> { %436 = vst [vmem:[%s3101_s30 + $0x80] sm:$0xff] %v435_v8  ;;  %v441_v11 = vld [vmem:[%s3105_s11 + $0x1b8] sm:$0xff]  ;;  %438 = vst [vmem:[%s3101_s30 + $0x90] sm:$0xff] %v437_v9  ;;  %v443_v12 = vld [vmem:[%s3105_s11 + $0x1e0] sm:$0xff] }
  0x32   : >> { %440 = vst [vmem:[%s3101_s30 + $0xa0] sm:$0xff] %v439_v10  ;;  %442 = vst [vmem:[%s3101_s30 + $0xb0] sm:$0xff] %v441_v11  ;;  %v445_v13 = vld [vmem:[%s3105_s11 + $0x208] sm:$0xff]  ;;  %v447_v14 = vld [vmem:[%s3105_s11 + $0x230] sm:$0xff] }
  0x33   : >> { %444 = vst [vmem:[%s3101_s30 + $0xc0] sm:$0xff] %v443_v12  ;;  %446 = vst [vmem:[%s3101_s30 + $0xd0] sm:$0xff] %v445_v13  ;;  %v449_v15 = vld [vmem:[%s3105_s11 + $0x258] sm:$0xff]  ;;  %s456_s11 = scalar_lea.vmem %s3251_s9, %s2530_s24  }
  0x34   : >> { %448 = vst [vmem:[%s3101_s30 + $0xe0] sm:$0xff] %v447_v14  ;;  %450 = vst [vmem:[%s3101_s30 + $0xf0] sm:$0xff] %v449_v15  ;;  %s457_s30 = scalar_lea.vmem %s183_s10, %s2530_s24 [#allocation2]  }
  0x36 PF: > { %717 = sbr.rel (!%p3229_p8) target bundleno = 69 (0x45), region = 94  ;;  %s719_s6 = sand.u32 (%p3229_p8), 1, %s3069_s16  }
  0x37   : > { %s2375_s7 = smul.u32 (%p3229_p8), 80, %s3093_s22  ;;  %s2542_s8 = sshll.u32 (%p3229_p8), %s719_s6, 7 }
  0x38   : > { %s721_s21 = scalar_lea.vmem (%p3229_p8), [#allocation3], %s2542_s8 }
  0x39   : > { %s2376_s24 = sadd.s32 (%p3229_p8), %s3201_s29, %s2375_s7 }
  0x3a   : > { %s2544_s0 = sshll.u32 (%p3229_p8), %s2376_s24, 3 }
  0x3b   : > { %s3327_s18 = scalar_lea.vmem (%p3229_p8), %s4541_s1, %s2544_s0 }
  0x3c   : > { %v2545_v16 = vld [vmem:[%s3327_s18 + $0x10] sm:$0xff] (%p3229_p8)  ;;  %v2546_v17 = vld [vmem:[%s3327_s18 + $0x38] sm:$0xff] (%p3229_p8)  ;;  %v2547_v18 = vld [vmem:[%s3327_s18 + $0x60] sm:$0xff] (%p3229_p8) }
  0x3d   : > { %786 = vst [vmem:[%s721_s21] sm:$0xff] %v2545_v16  ;;  %788 = vst [vmem:[%s721_s21 + $0x8] sm:$0xff] %v2546_v17  ;;  %v2548_v19 = vld [vmem:[%s3327_s18 + $0x88] sm:$0xff]  ;;  %v2549_v20 = vld [vmem:[%s3327_s18 + $0xb0] sm:$0xff] }
  0x3e   : > { %790 = vst [vmem:[%s721_s21 + $0x10] sm:$0xff] %v2547_v18  ;;  %v2550_v21 = vld [vmem:[%s3327_s18 + $0xd8] sm:$0xff]  ;;  %792 = vst [vmem:[%s721_s21 + $0x18] sm:$0xff] %v2548_v19  ;;  %v2551_v22 = vld [vmem:[%s3327_s18 + $0x100] sm:$0xff] }
  0x3f   : > { %794 = vst [vmem:[%s721_s21 + $0x20] sm:$0xff] %v2549_v20  ;;  %796 = vst [vmem:[%s721_s21 + $0x28] sm:$0xff] %v2550_v21  ;;  %v2552_v23 = vld [vmem:[%s3327_s18 + $0x128] sm:$0xff]  ;;  %v2553_v24 = vld [vmem:[%s3327_s18 + $0x150] sm:$0xff] }
  0x40   : > { %798 = vst [vmem:[%s721_s21 + $0x30] sm:$0xff] %v2551_v22  ;;  %800 = vst [vmem:[%s721_s21 + $0x38] sm:$0xff] %v2552_v23  ;;  %v2554_v25 = vld [vmem:[%s3327_s18 + $0x178] sm:$0xff]  ;;  %v2555_v26 = vld [vmem:[%s3327_s18 + $0x1a0] sm:$0xff] }
  0x41   : > { %802 = vst [vmem:[%s721_s21 + $0x40] sm:$0xff] %v2553_v24  ;;  %v2556_v27 = vld [vmem:[%s3327_s18 + $0x1c8] sm:$0xff]  ;;  %804 = vst [vmem:[%s721_s21 + $0x48] sm:$0xff] %v2554_v25  ;;  %v2557_v28 = vld [vmem:[%s3327_s18 + $0x1f0] sm:$0xff] }
  0x42   : > { %806 = vst [vmem:[%s721_s21 + $0x50] sm:$0xff] %v2555_v26  ;;  %808 = vst [vmem:[%s721_s21 + $0x58] sm:$0xff] %v2556_v27  ;;  %v2558_v29 = vld [vmem:[%s3327_s18 + $0x218] sm:$0xff]  ;;  %v2559_v30 = vld [vmem:[%s3327_s18 + $0x240] sm:$0xff] }
  0x43   : > { %810 = vst [vmem:[%s721_s21 + $0x60] sm:$0xff] %v2557_v28  ;;  %812 = vst [vmem:[%s721_s21 + $0x68] sm:$0xff] %v2558_v29  ;;  %v2560_v31 = vld [vmem:[%s3327_s18 + $0x268] sm:$0xff] }
  0x44   : > { %814 = vst [vmem:[%s721_s21 + $0x70] sm:$0xff] %v2559_v30  ;;  %816 = vst [vmem:[%s721_s21 + $0x78] sm:$0xff] %v2560_v31 }
  0x45 PF: > { %p2561_p0 = scmp.ge.s32.totalorder %s3097_s23, 1  ;;  %p821_p1 = scmp.lt.s32.totalorder %s3097_s23, 5 }
  0x47   : > { %p822_p2 = pnand %p2561_p0, %p821_p1 }
  0x49   : > { %825 = sbr.rel (%p822_p2) target bundleno = 588 (0x24c), region = 132 }
  0x50   : > { %s828_s0 = sand.u32 1, %s3073_s17   ;;  %s835_s29 = sand.u32 1, %s3065_s15  }
  0x51   : > { %s3348_s25 = sshll.u32 %s828_s0, 8  ;;  %s2563_s13 = sshll.u32 %s835_s29, 7 }
  0x52   : > { %s3352_s28 = scalar_lea.vmem [#allocation2], %s3348_s25  ;;  %s3372_s15 = scalar_lea.vmem [#allocation3], %s2563_s13 }
  0x53   : > { %v3355_v32 = vld [vmem:[%s3352_s28 + $0x8] sm:$0xff]  ;;  %v3358_v33 = vld [vmem:[%s3352_s28 + $0x18] sm:$0xff]  ;;  %v3361_v34 = vld [vmem:[%s3352_s28] sm:$0xff]  ;;  %s3115_s17 = smov 127   ;;  %s3117_s10 = smov 126  }
  0x54   : > { %vm921_vm0 = vcmp.ge.f32.partialorder %v3355_v32, 0.0  ;;  %vm924_vm1 = vcmp.ge.f32.partialorder %v3358_v33, 0.0  ;;  %v969_v35 = vmul.f32 0.1, %v3355_v32  ;;  %v972_v36 = vmul.f32 0.1, %v3358_v33 }
  0x55   : > { %v3368_v37 = vld [vmem:[%s3352_s28 + $0x10] sm:$0xff]  ;;  %vm920_vm2 = vcmp.ge.f32.partialorder %v3361_v34, 0.0  ;;  %v968_v38 = vmul.f32 0.1, %v3361_v34  ;;  %v3375_v39 = vld [vmem:[%s3372_s15] sm:$0xff]  ;;  %v3378_v40 = vld [vmem:[%s3372_s15 + $0x8] sm:$0xff] }
  0x56   : > { %v1017_v41 = vsel %vm921_vm0, %v3355_v32, %v969_v35  ;;  %v1020_v42 = vsel %vm924_vm1, %v3358_v33, %v972_v36  ;;  %vm923_vm3 = vcmp.ge.f32.partialorder %v3368_v37, 0.0  ;;  %v971_v43 = vmul.f32 0.1, %v3368_v37  ;;  %v3385_v44 = vld [vmem:[%s3352_s28 + $0x28] sm:$0xff]  ;;  %v3388_v45 = vld [vmem:[%s3352_s28 + $0x38] sm:$0xff]  ;;  %v3396_v48 = vld [vmem:[%s3372_s15 + $0x10] sm:$0xff] }
  0x57   : > { %v3390_v46 = vpack.c.bf16 %v1020_v42, %v1017_v41  ;;  %v1016_v47 = vsel %vm920_vm2, %v3361_v34, %v968_v38  ;;  %vm922_vm4 = vcmp.ge.f32.partialorder %v3375_v39, 0.0  ;;  %vm925_vm5 = vcmp.ge.f32.partialorder %v3378_v40, 0.0  ;;  %v3399_v49 = vld [vmem:[%s3372_s15 + $0x18] sm:$0xff]  ;;  %v3406_v53 = vld [vmem:[%s3352_s28 + $0x20] sm:$0xff]  ;;  %v3416_v57 = vld [vmem:[%s3352_s28 + $0x30] sm:$0xff]  ;;  %s4257_s6 = scalar_lea.vmem [#allocation4], %s3348_s25 }
  0x58   : > { %v1019_v50 = vsel %vm923_vm3, %v3368_v37, %v971_v43  ;;  %v970_v51 = vmul.f32 0.1, %v3375_v39  ;;  %v973_v52 = vmul.f32 0.1, %v3378_v40  ;;  %vm927_vm6 = vcmp.ge.f32.partialorder %v3385_v44, 0.0  ;;  %v3428_v60 = vld [vmem:[%s3352_s28 + $0x48] sm:$0xff] }
  0x59   : > { %1195 = vrot.lane.b32.xlu0 %v3390_v46, %s3115_s17  ;;  %v3410_v54 = vpack.c.bf16 %v1019_v50, %v1016_v47  ;;  %vm930_vm7 = vcmp.ge.f32.partialorder %v3388_v45, 0.0  ;;  %v975_v55 = vmul.f32 0.1, %v3385_v44  ;;  %v978_v56 = vmul.f32 0.1, %v3388_v45  ;;  %1435 = vmatprep.subr.bf16.mxu0 %v3390_v46  ;;  %v3440_v1 = vld [vmem:[%s3352_s28 + $0x58] sm:$0xff] }
  0x5a   : > { %v1018_v58 = vsel %vm922_vm4, %v3375_v39, %v970_v51  ;;  %v1021_v59 = vsel %vm925_vm5, %v3378_v40, %v973_v52  ;;  %vm928_vm8 = vcmp.ge.f32.partialorder %v3396_v48, 0.0  ;;  %vm931_vm9 = vcmp.ge.f32.partialorder %v3399_v49, 0.0  ;;  %v3449_v4 = vld [vmem:[%s3372_s15 + $0x20] sm:$0xff]  ;;  %v3460_v8 = vld [vmem:[%s3372_s15 + $0x28] sm:$0xff]  ;;  %v3484_v16 = vld [vmem:[%s3352_s28 + $0x50] sm:$0xff]  ;;  %s2622_s25 = sshll.u32 (%p3236_p10), %s3081_s19, 1 }
  0x5b   : > { %1193 = vrot.lane.b32.xlu1 %v3410_v54, %s3115_s17  ;;  %v3432_v61 = vpack.c.bf16 %v1021_v59, %v1018_v58  ;;  %v1023_v62 = vsel %vm927_vm6, %v3385_v44, %v975_v55  ;;  %v1026_v63 = vsel %vm930_vm7, %v3388_v45, %v978_v56  ;;  %v976_v0 = vmul.f32 0.1, %v3396_v48  ;;  %1436 = vmatpush1.bf16.msra.mxu0 %v3410_v54  ;;  %v3469_v12 = vld [vmem:[%s3352_s28 + $0x40] sm:$0xff]  ;;  %v3487_v17 = vld [vmem:[%s3352_s28 + $0x68] sm:$0xff]  ;;  %v3497_v21 = vld [vmem:[%s3352_s28 + $0x78] sm:$0xff]  ;;  %s2623_s7 = sshll.u32 (%p3236_p10), %s3085_s20, 6 }
  0x5c   : > { %v3443_v2 = vpack.c.bf16 %v1026_v63, %v1023_v62  ;;  %v979_v3 = vmul.f32 0.1, %v3399_v49  ;;  %vm926_vm10 = vcmp.ge.f32.partialorder %v3406_v53, 0.0  ;;  %vm929_vm11 = vcmp.ge.f32.partialorder %v3416_v57, 0.0  ;;  %v3500_v22 = vld [vmem:[%s3372_s15 + $0x30] sm:$0xff]  ;;  %v3510_v26 = vld [vmem:[%s3372_s15 + $0x38] sm:$0xff]  ;;  %s2249_s26 = sadd.s32 (%p3236_p10), %s2623_s7, %s2622_s25 }
  0x5d   : > { %1197 = vrot.lane.b32.xlu0 %v3432_v61, %s3115_s17  ;;  %v1024_v5 = vsel %vm928_vm8, %v3396_v48, %v976_v0  ;;  %v974_v6 = vmul.f32 0.1, %v3406_v53  ;;  %v977_v7 = vmul.f32 0.1, %v3416_v57  ;;  %vm933_vm12 = vcmp.ge.f32.partialorder %v3428_v60, 0.0  ;;  %v3528_v35 = vld [vmem:[%s3352_s28 + $0x60] sm:$0xff] }
  0x5e   : > { %v1027_v9 = vsel %vm931_vm9, %v3399_v49, %v979_v3  ;;  %vm936_vm13 = vcmp.ge.f32.partialorder %v3440_v1, 0.0  ;;  %v981_v10 = vmul.f32 0.1, %v3428_v60  ;;  %v984_v11 = vmul.f32 0.1, %v3440_v1  ;;  %1437 = vmatprep.subr.bf16.mxu0 %v3443_v2  ;;  %v3537_v43 = vld [vmem:[%s3352_s28 + $0x70] sm:$0xff] }
  0x5f   : > { %1201 = vrot.lane.b32.xlu1 %v3443_v2, %s3115_s17  ;;  %v3474_v13 = vpack.c.bf16 %v1027_v9, %v1024_v5  ;;  %v1022_v14 = vsel %vm926_vm10, %v3406_v53, %v974_v6  ;;  %v1025_v15 = vsel %vm929_vm11, %v3416_v57, %v977_v7  ;;  %vm934_vm14 = vcmp.ge.f32.partialorder %v3449_v4, 0.0  ;;  %v3549_v51 = vld [vmem:[%s3352_s28 + $0x88] sm:$0xff]  ;;  %v3552_v52 = vld [vmem:[%s3352_s28 + $0x98] sm:$0xff]  ;;  %v3561_v59 = vld [vmem:[%s3372_s15 + $0x40] sm:$0xff]  ;;  %s2624_s8 = sshll.u32 (%p3236_p10), %s2249_s26, 3 }
  0x60   : > { %v3489_v18 = vpack.c.bf16 %v1025_v15, %v1022_v14  ;;  %v1029_v19 = vsel %vm933_vm12, %v3428_v60, %v981_v10  ;;  %v1032_v20 = vsel %vm936_vm13, %v3440_v1, %v984_v11  ;;  %vm937_vm15 = vcmp.ge.f32.partialorder %v3460_v8, 0.0  ;;  %4586 = vst [vmem:[#allocation10_spill] sm:$0xff] %v3552_v52  ;;  %4587 = vst [vmem:[#allocation11_spill] sm:$0xff] %v3561_v59  ;;  %v3571_v3 = vld [vmem:[%s3372_s15 + $0x48] sm:$0xff]  ;;  %v3583_v7 = vld [vmem:[%s3352_s28 + $0x80] sm:$0xff]  ;;  %s4456_s0 = scalar_lea.vmem (%p3236_p10), %s4544_s4, %s2624_s8 }
  0x61   : > { %1203 = vrot.lane.b32.xlu0 %v3474_v13, %s3115_s17  ;;  %v3504_v23 = vpack.c.bf16 %v1032_v20, %v1029_v19  ;;  %v982_v24 = vmul.f32 0.1, %v3449_v4  ;;  %v985_v25 = vmul.f32 0.1, %v3460_v8  ;;  %vm932_vm0 = vcmp.ge.f32.partialorder %v3469_v12, 0.0  ;;  %4588 = vst [vmem:[#allocation12_spill] sm:$0xff] %v3571_v3 }
  0x62   : > { %vm935_vm1 = vcmp.ge.f32.partialorder %v3484_v16, 0.0  ;;  %v980_v27 = vmul.f32 0.1, %v3469_v12  ;;  %v983_v28 = vmul.f32 0.1, %v3484_v16  ;;  %vm939_vm2 = vcmp.ge.f32.partialorder %v3487_v17, 0.0  ;;  %1438 = vmatpush1.bf16.msra.mxu0 %v3489_v18 }
  0x63   : > { %1199 = vrot.lane.b32.xlu1 %v3489_v18, %s3115_s17  ;;  %v1030_v29 = vsel %vm934_vm14, %v3449_v4, %v982_v24  ;;  %v1033_v30 = vsel %vm937_vm15, %v3460_v8, %v985_v25  ;;  %vm942_vm3 = vcmp.ge.f32.partialorder %v3497_v21, 0.0  ;;  %v987_v31 = vmul.f32 0.1, %v3487_v17  ;;  %1439 = vmatprep.subr.bf16.mxu0 %v3504_v23  ;;  %v3595_v15 = vld [vmem:[%s3352_s28 + $0x90] sm:$0xff]  ;;  %v3598_v19 = vld [vmem:[%s3352_s28 + $0xa8] sm:$0xff]  ;;  %v3601_v20 = vld [vmem:[%s3352_s28 + $0xb8] sm:$0xff] }
  0x64   : > { %v3531_v36 = vpack.c.bf16 %v1033_v30, %v1030_v29  ;;  %v1028_v38 = vsel %vm932_vm0, %v3469_v12, %v980_v27  ;;  %v1031_v41 = vsel %vm935_vm1, %v3484_v16, %v983_v28  ;;  %v990_v42 = vmul.f32 0.1, %v3497_v21  ;;  %4589 = vst [vmem:[#allocation13_spill] sm:$0xff] %v3598_v19  ;;  %4590 = vst [vmem:[#allocation14_spill] sm:$0xff] %v3601_v20  ;;  %v3610_v27 = vld [vmem:[%s3372_s15 + $0x50] sm:$0xff] }
  0x65   : > { %1207 = vrot.lane.b32.xlu0 %v3504_v23, %s3115_s17  ;;  %v3541_v47 = vpack.c.bf16 %v1031_v41, %v1028_v38  ;;  %v1035_v50 = vsel %vm939_vm2, %v3487_v17, %v987_v31  ;;  %vm940_vm4 = vcmp.ge.f32.partialorder %v3500_v22, 0.0  ;;  %vm943_vm5 = vcmp.ge.f32.partialorder %v3510_v26, 0.0  ;;  %4591 = vst [vmem:[#allocation15_spill] sm:$0xff] %v3610_v27  ;;  %v3621_v31 = vld [vmem:[%s3372_s15 + $0x58] sm:$0xff] }
  0x66   : > { %v1038_v55 = vsel %vm942_vm3, %v3497_v21, %v990_v42  ;;  %v988_v56 = vmul.f32 0.1, %v3500_v22  ;;  %v991_v58 = vmul.f32 0.1, %v3510_v26  ;;  %vm938_vm6 = vcmp.ge.f32.partialorder %v3528_v35, 0.0  ;;  %4592 = vst [vmem:[#allocation16_spill] sm:$0xff] %v3621_v31 }
  0x67   : > { %1209 = vrot.lane.b32.xlu1 %v3531_v36, %s3115_s17  ;;  %v3565_v62 = vpack.c.bf16 %v1038_v55, %v1035_v50  ;;  %vm941_vm7 = vcmp.ge.f32.partialorder %v3537_v43, 0.0  ;;  %v986_v63 = vmul.f32 0.1, %v3528_v35  ;;  %v989_v0 = vmul.f32 0.1, %v3537_v43  ;;  %1440 = vmatpush1.bf16.msra.mxu0 %v3541_v47  ;;  %v3630_v50 = vld [vmem:[%s3352_s28 + $0xa0] sm:$0xff] }
  0x68   : > { %v1036_v5 = vsel %vm940_vm4, %v3500_v22, %v988_v56  ;;  %v1039_v6 = vsel %vm943_vm5, %v3510_v26, %v991_v58  ;;  %vm945_vm8 = vcmp.ge.f32.partialorder %v3549_v51, 0.0  ;;  %vm948_vm9 = vcmp.ge.f32.partialorder %v3552_v52, 0.0  ;;  %4593 = vst [vmem:[#allocation17_spill] sm:$0xff] %v3630_v50 }
  0x69   : > { %1205 = vrot.lane.b32.xlu0 %v3541_v47, %s3115_s17  ;;  %v3587_v9 = vpack.c.bf16 %v1039_v6, %v1036_v5  ;;  %v1034_v10 = vsel %vm938_vm6, %v3528_v35, %v986_v63  ;;  %v1037_v11 = vsel %vm941_vm7, %v3537_v43, %v989_v0  ;;  %v993_v14 = vmul.f32 0.1, %v3549_v51  ;;  %1441 = vmatprep.subr.bf16.mxu0 %v3565_v62  ;;  %v3645_v63 = vld [vmem:[%s3352_s28 + $0xb0] sm:$0xff] }
  0x6a   : > { %v3604_v24 = vpack.c.bf16 %v1037_v11, %v1034_v10  ;;  %v996_v25 = vmul.f32 0.1, %v3552_v52  ;;  %vm946_vm10 = vcmp.ge.f32.partialorder %v3561_v59, 0.0  ;;  %vm949_vm11 = vcmp.ge.f32.partialorder %v3571_v3, 0.0  ;;  %4594 = vst [vmem:[#allocation18_spill] sm:$0xff] %v3645_v63  ;;  %v3653_v10 = vld [vmem:[%s3352_s28 + $0xc8] sm:$0xff] }
  0x6b   : > { %1213 = vrot.lane.b32.xlu1 %v3565_v62, %s3115_s17  ;;  %v1041_v28 = vsel %vm945_vm8, %v3549_v51, %v993_v14  ;;  %v994_v29 = vmul.f32 0.1, %v3561_v59  ;;  %v997_v30 = vmul.f32 0.1, %v3571_v3  ;;  %vm944_vm12 = vcmp.ge.f32.partialorder %v3583_v7, 0.0  ;;  %4595 = vst [vmem:[#allocation19_spill] sm:$0xff] %v3653_v10 }
  0x6c   : > { %v1044_v38 = vsel %vm948_vm9, %v3552_v52, %v996_v25  ;;  %vm947_vm13 = vcmp.ge.f32.partialorder %v3595_v15, 0.0  ;;  %v992_v41 = vmul.f32 0.1, %v3583_v7  ;;  %v995_v42 = vmul.f32 0.1, %v3595_v15  ;;  %1442 = vmatpush1.bf16.msra.mxu0 %v3604_v24  ;;  %v3656_v11 = vld [vmem:[%s3352_s28 + $0xd8] sm:$0xff] }
  0x6d   : > { %1215 = vrot.lane.b32.xlu0 %v3587_v9, %s3115_s17  ;;  %v3635_v55 = vpack.c.bf16 %v1044_v38, %v1041_v28  ;;  %v1042_v56 = vsel %vm946_vm10, %v3561_v59, %v994_v29  ;;  %v1045_v58 = vsel %vm949_vm11, %v3571_v3, %v997_v30  ;;  %vm951_vm14 = vcmp.ge.f32.partialorder %v3598_v19, 0.0  ;;  %4596 = vst [vmem:[#allocation20_spill] sm:$0xff] %v3656_v11  ;;  %v3666_v29 = vld [vmem:[%s3372_s15 + $0x60] sm:$0xff] }
  0x6e   : > { %v3647_v0 = vpack.c.bf16 %v1045_v58, %v1042_v56  ;;  %v1040_v5 = vsel %vm944_vm12, %v3583_v7, %v992_v41  ;;  %v1043_v6 = vsel %vm947_vm13, %v3595_v15, %v995_v42  ;;  %vm954_vm15 = vcmp.ge.f32.partialorder %v3601_v20, 0.0  ;;  %4597 = vst [vmem:[#allocation21_spill] sm:$0xff] %v3666_v29  ;;  %v3674_v41 = vld [vmem:[%s3372_s15 + $0x68] sm:$0xff] }
  0x6f   : > { %1211 = vrot.lane.b32.xlu1 %v3604_v24, %s3115_s17  ;;  %v3660_v14 = vpack.c.bf16 %v1043_v6, %v1040_v5  ;;  %v999_v25 = vmul.f32 0.1, %v3598_v19  ;;  %v1002_v28 = vmul.f32 0.1, %v3601_v20  ;;  %vm952_vm0 = vcmp.ge.f32.partialorder %v3610_v27, 0.0  ;;  %1443 = vmatprep.subr.bf16.mxu0 %v3635_v55  ;;  %4598 = vst [vmem:[#allocation22_spill] sm:$0xff] %v3674_v41 }
  0x70   : > { %vm955_vm1 = vcmp.ge.f32.partialorder %v3621_v31, 0.0  ;;  %v1000_v30 = vmul.f32 0.1, %v3610_v27  ;;  %v1003_v38 = vmul.f32 0.1, %v3621_v31  ;;  %vm950_vm2 = vcmp.ge.f32.partialorder %v3630_v50, 0.0 }
  0x71   : > { %1219 = vrot.lane.b32.xlu0 %v3635_v55, %s3115_s17  ;;  %v1047_v42 = vsel %vm951_vm14, %v3598_v19, %v999_v25  ;;  %v1050_v56 = vsel %vm954_vm15, %v3601_v20, %v1002_v28  ;;  %vm953_vm3 = vcmp.ge.f32.partialorder %v3645_v63, 0.0  ;;  %v998_v58 = vmul.f32 0.1, %v3630_v50  ;;  %v3687_v5 = vld [vmem:[%s3352_s28 + $0xc0] sm:$0xff]  ;;  %v3690_v6 = vld [vmem:[%s3352_s28 + $0xd0] sm:$0xff]  ;;  %1444 = vmatpush1.bf16.msra.mxu0 %v3660_v14 }
  0x72   : > { %4599 = vst [vmem:[#allocation23_spill] sm:$0xff] %v3687_v5  ;;  %v3693_v52 = vpack.c.bf16 %v1050_v56, %v1047_v42  ;;  %v1048_v25 = vsel %vm952_vm0, %v3610_v27, %v1000_v30  ;;  %v1051_v19 = vsel %vm955_vm1, %v3621_v31, %v1003_v38  ;;  %v1001_v28 = vmul.f32 0.1, %v3645_v63  ;;  %v3710_v30 = vld [vmem:[%s3352_s28 + $0xe8] sm:$0xff]  ;;  %v3728_v31 = vld [vmem:[%s3372_s15 + $0x70] sm:$0xff]  ;;  %v3731_v27 = vld [vmem:[%s3372_s15 + $0x78] sm:$0xff] }
  0x73   : > { %1221 = vrot.lane.b32.xlu1 %v3647_v0, %s3115_s17  ;;  %v3702_v20 = vpack.c.bf16 %v1051_v19, %v1048_v25  ;;  %v1046_v3 = vsel %vm950_vm2, %v3630_v50, %v998_v58  ;;  %vm957_vm4 = vcmp.ge.f32.partialorder %v3653_v10, 0.0  ;;  %vm960_vm5 = vcmp.ge.f32.partialorder %v3656_v11, 0.0  ;;  %4600 = vst [vmem:[#allocation24_spill] sm:$0xff] %v3710_v30  ;;  %v3717_v19 = vld [vmem:[%s3352_s28 + $0xf8] sm:$0xff] }
  0x74   : > { %v1049_v38 = vsel %vm953_vm3, %v3645_v63, %v1001_v28  ;;  %v1005_v42 = vmul.f32 0.1, %v3653_v10  ;;  %v1008_v56 = vmul.f32 0.1, %v3656_v11  ;;  %vm958_vm6 = vcmp.ge.f32.partialorder %v3666_v29, 0.0  ;;  %4601 = vst [vmem:[#allocation25_spill] sm:$0xff] %v3717_v19  ;;  %1445 = vmatprep.subr.bf16.mxu0 %v3693_v52 }
  0x75   : > { %1217 = vrot.lane.b32.xlu0 %v3660_v14, %s3115_s17  ;;  %v3722_v58 = vpack.c.bf16 %v1049_v38, %v1046_v3  ;;  %vm961_vm7 = vcmp.ge.f32.partialorder %v3674_v41, 0.0  ;;  %v1006_v25 = vmul.f32 0.1, %v3666_v29  ;;  %v1009_v28 = vmul.f32 0.1, %v3674_v41 }
  0x76   : > { %v1053_v63 = vsel %vm957_vm4, %v3653_v10, %v1005_v42  ;;  %v1056_v50 = vsel %vm960_vm5, %v3656_v11, %v1008_v56  ;;  %vm956_vm8 = vcmp.ge.f32.partialorder %v3687_v5, 0.0  ;;  %vm959_vm9 = vcmp.ge.f32.partialorder %v3690_v6, 0.0  ;;  %v3762_v11 = vld [vmem:[%s3352_s28 + $0xe0] sm:$0xff] }
  0x77   : > { %1225 = vrot.lane.b32.xlu1 %v3693_v52, %s3115_s17  ;;  %v3743_v3 = vpack.c.bf16 %v1056_v50, %v1053_v63  ;;  %v1054_v38 = vsel %vm958_vm6, %v3666_v29, %v1006_v25  ;;  %v1057_v42 = vsel %vm961_vm7, %v3674_v41, %v1009_v28  ;;  %v1004_v10 = vmul.f32 0.1, %v3687_v5  ;;  %1446 = vmatpush1.bf16.msra.mxu0 %v3722_v58  ;;  %v3765_v41 = vld [vmem:[%s3352_s28 + $0xf0] sm:$0xff] }
  0x78   : > { %v1007_v56 = vmul.f32 0.1, %v3690_v6  ;;  %vm963_vm10 = vcmp.ge.f32.partialorder %v3710_v30, 0.0  ;;  %vm966_vm11 = vcmp.ge.f32.partialorder %v3717_v19, 0.0  ;;  %v3756_v50 = vpack.c.bf16 %v1057_v42, %v1054_v38 }
  0x79   : > { %1227 = vrot.lane.b32.xlu0 %v3702_v20, %s3115_s17  ;;  %v1052_v63 = vsel %vm956_vm8, %v3687_v5, %v1004_v10  ;;  %v1011_v25 = vmul.f32 0.1, %v3710_v30  ;;  %v1014_v28 = vmul.f32 0.1, %v3717_v19  ;;  %1447 = vmatprep.subr.bf16.mxu0 %v3743_v3  ;;  %vm964_vm12 = vcmp.ge.f32.partialorder %v3728_v31, 0.0 }
  0x7a   : > { %v1055_v29 = vsel %vm959_vm9, %v3690_v6, %v1007_v56  ;;  %v1012_v38 = vmul.f32 0.1, %v3728_v31  ;;  %v1015_v10 = vmul.f32 0.1, %v3731_v27  ;;  %vm967_vm13 = vcmp.ge.f32.partialorder %v3731_v27, 0.0 }
  0x7b   : > { %1223 = vrot.lane.b32.xlu1 %v3722_v58, %s3115_s17  ;;  %v3776_v42 = vpack.c.bf16 %v1055_v29, %v1052_v63  ;;  %v1059_v5 = vsel %vm963_vm10, %v3710_v30, %v1011_v25  ;;  %v1062_v59 = vsel %vm966_vm11, %v3717_v19, %v1014_v28  ;;  %vm962_vm14 = vcmp.ge.f32.partialorder %v3762_v11, 0.0 }
  0x7c   : > { %v3785_v56 = vpack.c.bf16 %v1062_v59, %v1059_v5  ;;  %vm965_vm15 = vcmp.ge.f32.partialorder %v3765_v41, 0.0  ;;  %v1010_v29 = vmul.f32 0.1, %v3762_v11  ;;  %v1013_v63 = vmul.f32 0.1, %v3765_v41 }
  0x7d   : > { %1231 = vrot.lane.b32.xlu0 %v3743_v3, %s3115_s17  ;;  %1448 = vmatpush1.bf16.msra.mxu0 %v3776_v42  ;;  %v1060_v25 = vsel %vm964_vm12, %v3728_v31, %v1012_v38  ;;  %v1063_v28 = vsel %vm967_vm13, %v3731_v27, %v1015_v10  ;;  %v3116_v59 = vmov 0   ;;  %v2924_v10 = vld [vmem:[%s4542_s2] sm:$0xff]   ;;  %vm1241_vm0 = vcmask 1039360  }
  0x7e   : > { %1449 = vmatprep.subr.bf16.mxu0 %v3785_v56  ;;  %1306 = vmatprep.mubr.bf16.mxu1 %v3116_v59  ;;  %v1058_v5 = vsel %vm962_vm14, %v3762_v11, %v1010_v29  ;;  %v1061_v19 = vsel %vm965_vm15, %v3765_v41, %v1013_v63  ;;  %v1103_v38 = vpack.c.bf16 %v1063_v28, %v1060_v25  ;;  %v1843_v29 = vld [vmem:[%s4543_s3 + $0x20] sm:$0xff]  ;;  %v1846_v63 = vld [vmem:[%s4543_s3 + $0x38] sm:$0xff]  ;;  %v1845_v25 = vld [vmem:[%s4543_s3 + $0x30] sm:$0xff]  ;;  %vm1661_vm1 = vcmask 1031168  }
  0x7f   : > { %1233 = vrot.lane.b32.xlu1 %v3756_v50, %s3115_s17  ;;  %1467 = vmatprep.mubr.bf16.mxu0 %v3116_v59  ;;  %v3803_v30 = vpack.c.bf16 %v1061_v19, %v1058_v5  ;;  %v2928_v19 = vld [vmem:[%s4542_s2 + $0x8] sm:$0xff]   ;;  %v1847_v5 = vld [vmem:[%s4543_s3 + $0x40] sm:$0xff] }
  0x80   : > { %2922 = vset.pattern.permute.xlu1 %v3116_v59  ;;  %2921 = vset.pattern.permute.xlu0 %v3116_v59  ;;  %v1848_v28 = vld [vmem:[%s4543_s3 + $0x48] sm:$0xff] }
  0x81   : > { %1229 = vrot.lane.b32.xlu0 %v3776_v42, %s3115_s17  ;;  %1450 = vmatpush1.bf16.msra.mxu0 %v3803_v30 }
  0x83   : > { %1237 = vrot.lane.b32.xlu1 %v3785_v56, %s3115_s17 }
  0x84   : > { %1468 = vmatmul.mubr.bf16.vlgmr.msra.gmra.mrb[0].mxu0 %v2924_v10 }
  0x85   : > { %1239 = vrot.lane.b32.xlu0 %v1103_v38, %s3115_s17  ;;  %1477 = vmatprep.mubr.bf16.mxu0 %v3116_v59 }
  0x87   : > { %1235 = vrot.lane.b32.xlu1 %v3803_v30, %s3115_s17 }
  0x89   : > { %1615 = vrot.lane.b32.xlu0 %v3390_v46, %s3117_s10 }
  0x8b   : > { %1617 = vrot.lane.b32.xlu1 %v3432_v61, %s3117_s10  ;;  %v2930_v61 = vld [vmem:[%s4542_s2 + $0x10] sm:$0xff]  }
  0x8c   : > { %1478 = vmatmul.mubr.bf16.gmra.mrb[4].mxu0 %v2928_v19  ;;  %v1849_v19 = vld [vmem:[%s4543_s3 + $0x50] sm:$0xff] }
  0x8d   : > { %1613 = vrot.lane.b32.xlu0 %v3410_v54, %s3117_s10  ;;  %1487 = vmatprep.mubr.bf16.mxu0 %v3116_v59 }
  0x8f   : > { %1621 = vrot.lane.b32.xlu1 %v3443_v2, %s3117_s10 }
  0x91   : > { %1623 = vrot.lane.b32.xlu0 %v3474_v13, %s3117_s10  ;;  %v2932_v13 = vld [vmem:[%s4542_s2 + $0x18] sm:$0xff]  }
  0x93   : > { %1619 = vrot.lane.b32.xlu1 %v3489_v18, %s3117_s10 }
  0x94   : > { %1488 = vmatmul.mubr.bf16.gmra.mrb[8].mxu0 %v2930_v61 }
  0x95   : > { %1627 = vrot.lane.b32.xlu0 %v3504_v23, %s3117_s10  ;;  %1497 = vmatprep.mubr.bf16.mxu0 %v3116_v59 }
  0x97   : > { %1629 = vrot.lane.b32.xlu1 %v3531_v36, %s3117_s10  ;;  %v1839_v36 = vld [vmem:[%s4543_s3] sm:$0xff] }
  0x99   : > { %1625 = vrot.lane.b32.xlu0 %v3541_v47, %s3117_s10 }
  0x9b   : > { %1633 = vrot.lane.b32.xlu1 %v3565_v62, %s3117_s10 }
  0x9c   : > { %1498 = vmatmul.mubr.bf16.gmra.mrb[12].mxu0 %v2932_v13  ;;  %v1852_v13 = vld [vmem:[%s4543_s3 + $0x68] sm:$0xff] }
  0x9d   : > { %1635 = vrot.lane.b32.xlu0 %v3587_v9, %s3117_s10  ;;  %1726 = vmatprep.mubr.bf16.mxu0 %v3116_v59  ;;  %v1840_v9 = vld [vmem:[%s4543_s3 + $0x8] sm:$0xff] }
  0x9f   : > { %1631 = vrot.lane.b32.xlu1 %v3604_v24, %s3117_s10 }
  0xa1   : > { %1639 = vrot.lane.b32.xlu0 %v3635_v55, %s3117_s10 }
  0xa3   : > { %1641 = vrot.lane.b32.xlu1 %v3647_v0, %s3117_s10  ;;  %v1841_v0 = vld [vmem:[%s4543_s3 + $0x10] sm:$0xff] }
  0xa5   : > { %1637 = vrot.lane.b32.xlu0 %v3660_v14, %s3117_s10 }
  0xa7   : > { %1645 = vrot.lane.b32.xlu1 %v3693_v52, %s3117_s10 }
  0xa9   : > { %1647 = vrot.lane.b32.xlu0 %v3702_v20, %s3117_s10  ;;  %v1842_v20 = vld [vmem:[%s4543_s3 + $0x18] sm:$0xff] }
  0xab   : > { %1643 = vrot.lane.b32.xlu1 %v3722_v58, %s3117_s10 }
  0xad   : > { %1651 = vrot.lane.b32.xlu0 %v3743_v3, %s3117_s10 }
  0xaf   : > { %1653 = vrot.lane.b32.xlu1 %v3756_v50, %s3117_s10  ;;  %v1844_v50 = vld [vmem:[%s4543_s3 + $0x28] sm:$0xff] }
  0xb1   : > { %1649 = vrot.lane.b32.xlu0 %v3776_v42, %s3117_s10 }
  0xb3   : > { %1657 = vrot.lane.b32.xlu1 %v3785_v56, %s3117_s10 }
  0xb5   : > { %1659 = vrot.lane.b32.xlu0 %v1103_v38, %s3117_s10  ;;  %v1850_v38 = vld [vmem:[%s4543_s3 + $0x58] sm:$0xff] }
  0xb7   : > { %1655 = vrot.lane.b32.xlu1 %v3803_v30, %s3117_s10 }
  0xb9   : > { %1857 = vperm.xlu0 %2921, %v1839_v36  }
  0xbb   : > { %1862 = vperm.xlu1 %2922, %v1840_v9  }
  0xbd   : > { %1872 = vperm.xlu0 %2921, %v1842_v20   ;;  %v1851_v20 = vld [vmem:[%s4543_s3 + $0x60] sm:$0xff] }
  0xbf   : > { %1867 = vperm.xlu1 %2922, %v1841_v0  }
  0xc1   : > { %1882 = vperm.xlu0 %2921, %v1844_v50  }
  0xc3   : > { %1877 = vperm.xlu1 %2922, %v1843_v29   ;;  %v1854_v29 = vld [vmem:[%s4543_s3 + $0x78] sm:$0xff] }
  0xc5   : > { %1892 = vperm.xlu0 %2921, %v1846_v63  }
  0xc7   : > { %1887 = vperm.xlu1 %2922, %v1845_v25  }
  0xc9   : > { %1902 = vperm.xlu0 %2921, %v1848_v28   ;;  %v1853_v28 = vld [vmem:[%s4543_s3 + $0x70] sm:$0xff] }
  0xcb   : > { %v1196_v10 = vpop.permute.xlu0 %1195  ;;  %1897 = vperm.xlu1 %2922, %v1847_v5  }
  0xcd   : > { %v1194_v61 = vpop.permute.xlu1 %1193  ;;  %1912 = vperm.xlu0 %2921, %v1850_v38  }
  0xce   : > { %v1242_v50 = vsel %vm1241_vm0, %v1194_v61, %v1196_v10 }
  0xcf   : > { %v1198_v36 = vpop.permute.xlu0 %1197  ;;  %1907 = vperm.xlu1 %2922, %v1849_v19  }
  0xd0   : > { %v1243_v9 = vsel %vm1241_vm0, %v1196_v10, %v1198_v36 }
  0xd1   : > { %v1202_v0 = vpop.permute.xlu1 %1201  ;;  %1274 = vmatprep.subr.bf16.mxu1 %v1243_v9  ;;  %1922 = vperm.xlu0 %2921, %v1852_v13  }
  0xd2   : > { %1275 = vmatpush1.bf16.msra.mxu1 %v1242_v50 }
  0xd3   : > { %v1204_v63 = vpop.permute.xlu0 %1203  ;;  %1917 = vperm.xlu1 %2922, %v1851_v20  }
  0xd4   : > { %v1245_v25 = vsel %vm1241_vm0, %v1202_v0, %v1204_v63 }
  0xd5   : > { %v1200_v5 = vpop.permute.xlu1 %1199  ;;  %1276 = vmatprep.subr.bf16.mxu1 %v1245_v25  ;;  %1932 = vperm.xlu0 %2921, %v1854_v29  }
  0xd6   : > { %v1244_v38 = vsel %vm1241_vm0, %v1200_v5, %v1202_v0 }
  0xd7   : > { %1277 = vmatpush1.bf16.msra.mxu1 %v1244_v38  ;;  %v1208_v10 = vpop.permute.xlu0 %1207  ;;  %1927 = vperm.xlu1 %2922, %v1853_v28  }
  0xd9   : > { %v1210_v19 = vpop.permute.xlu1 %1209  ;;  %2017 = vrot.lane.b32.xlu0 %v3355_v32, %s3115_s17 }
  0xda   : > { %v1247_v61 = vsel %vm1241_vm0, %v1208_v10, %v1210_v19  ;;  %v2923_v19 = vld [vmem:[%s4542_s2 + $0x40] sm:$0xff]  }
  0xdb   : > { %1278 = vmatprep.subr.bf16.mxu1 %v1247_v61  ;;  %v1206_v13 = vpop.permute.xlu0 %1205  ;;  %2015 = vrot.lane.b32.xlu1 %v3361_v34, %s3115_s17 }
  0xdc   : > { %v1246_v36 = vsel %vm1241_vm0, %v1206_v13, %v1208_v10 }
  0xdd   : > { %v1214_v9 = vpop.permute.xlu1 %1213  ;;  %1279 = vmatpush1.bf16.msra.mxu1 %v1246_v36  ;;  %2021 = vrot.lane.b32.xlu0 %v3368_v37, %s3115_s17 }
  0xdf   : > { %v1216_v20 = vpop.permute.xlu0 %1215  ;;  %2019 = vrot.lane.b32.xlu1 %v3375_v39, %s3115_s17 }
  0xe0   : > { %v1249_v32 = vsel %vm1241_vm0, %v1214_v9, %v1216_v20 }
  0xe1   : > { %v1212_v0 = vpop.permute.xlu1 %1211  ;;  %1280 = vmatprep.subr.bf16.mxu1 %v1249_v32  ;;  %2025 = vrot.lane.b32.xlu0 %v3378_v40, %s3115_s17  ;;  %v4605_v32 = vld [vmem:[#allocation13_spill] sm:$0xff] }
  0xe2   : > { %v1248_v34 = vsel %vm1241_vm0, %v1212_v0, %v1214_v9 }
  0xe3   : > { %1281 = vmatpush1.bf16.msra.mxu1 %v1248_v34  ;;  %v1220_v50 = vpop.permute.xlu0 %1219  ;;  %2023 = vrot.lane.b32.xlu1 %v3358_v33, %s3115_s17 }
  0xe5   : > { %v1222_v29 = vpop.permute.xlu1 %1221  ;;  %2029 = vrot.lane.b32.xlu0 %v3385_v44, %s3115_s17 }
  0xe6   : > { %v1251_v37 = vsel %vm1241_vm0, %v1220_v50, %v1222_v29  ;;  %v4607_v29 = vld [vmem:[#allocation18_spill] sm:$0xff] }
  0xe7   : > { %1282 = vmatprep.subr.bf16.mxu1 %v1251_v37  ;;  %v1218_v39 = vpop.permute.xlu0 %1217  ;;  %2027 = vrot.lane.b32.xlu1 %v3406_v53, %s3115_s17 }
  0xe8   : > { %v1250_v40 = vsel %vm1241_vm0, %v1218_v39, %v1220_v50 }
  0xe9   : > { %v1226_v63 = vpop.permute.xlu1 %1225  ;;  %1283 = vmatpush1.bf16.msra.mxu1 %v1250_v40  ;;  %2033 = vrot.lane.b32.xlu0 %v3416_v57, %s3115_s17 }
  0xeb   : > { %v1228_v25 = vpop.permute.xlu0 %1227  ;;  %2031 = vrot.lane.b32.xlu1 %v3396_v48, %s3115_s17 }
  0xec   : > { %v1253_v33 = vsel %vm1241_vm0, %v1226_v63, %v1228_v25 }
  0xed   : > { %v1224_v44 = vpop.permute.xlu1 %1223  ;;  %1284 = vmatprep.subr.bf16.mxu1 %v1253_v33  ;;  %2037 = vrot.lane.b32.xlu0 %v3399_v49, %s3115_s17  ;;  %v4610_v33 = vld [vmem:[#allocation14_spill] sm:$0xff] }
  0xee   : > { %v1252_v53 = vsel %vm1241_vm0, %v1224_v44, %v1226_v63 }
  0xef   : > { %1285 = vmatpush1.bf16.msra.mxu1 %v1252_v53  ;;  %v1232_v28 = vpop.permute.xlu0 %1231  ;;  %2035 = vrot.lane.b32.xlu1 %v3388_v45, %s3115_s17  ;;  %v2931_v53 = vld [vmem:[%s4542_s2 + $0x68] sm:$0xff]  }
  0xf1   : > { %v1234_v5 = vpop.permute.xlu1 %1233  ;;  %2041 = vrot.lane.b32.xlu0 %v3428_v60, %s3115_s17 }
  0xf2   : > { %v1255_v48 = vsel %vm1241_vm0, %v1232_v28, %v1234_v5 }
  0xf3   : > { %1286 = vmatprep.subr.bf16.mxu1 %v1255_v48  ;;  %v1230_v57 = vpop.permute.xlu0 %1229  ;;  %2039 = vrot.lane.b32.xlu1 %v3469_v12, %s3115_s17 }
  0xf4   : > { %v1254_v49 = vsel %vm1241_vm0, %v1230_v57, %v1232_v28  ;;  %v4611_v28 = vld [vmem:[#allocation19_spill] sm:$0xff] }
  0xf5   : > { %v1238_v38 = vpop.permute.xlu1 %1237  ;;  %1287 = vmatpush1.bf16.msra.mxu1 %v1254_v49  ;;  %2045 = vrot.lane.b32.xlu0 %v3484_v16, %s3115_s17  ;;  %v4612_v57 = vld [vmem:[#allocation23_spill] sm:$0xff] }
  0xf7   : > { %v1240_v10 = vpop.permute.xlu0 %1239  ;;  %2043 = vrot.lane.b32.xlu1 %v3449_v4, %s3115_s17 }
  0xf8   : > { %v1257_v45 = vsel %vm1241_vm0, %v1238_v38, %v1240_v10 }
  0xf9   : > { %v1236_v60 = vpop.permute.xlu1 %1235  ;;  %1288 = vmatprep.subr.bf16.mxu1 %v1257_v45  ;;  %2049 = vrot.lane.b32.xlu0 %v3460_v8, %s3115_s17  ;;  %v4613_v45 = vld [vmem:[#allocation21_spill] sm:$0xff] }
  0xfa   : > { %v1256_v12 = vsel %vm1241_vm0, %v1236_v60, %v1238_v38 }
  0xfb   : > { %1289 = vmatpush1.bf16.msra.mxu1 %v1256_v12  ;;  %v1616_v61 = vpop.permute.xlu0 %1615  ;;  %2047 = vrot.lane.b32.xlu1 %v3440_v1, %s3115_s17 }
  0xfc   : > { %2635 = vmatprep.subr.bf16.mxu1 %v3390_v46  ;;  %v2925_v46 = vld [vmem:[%s4542_s2 + $0x48] sm:$0xff]  }
  0xfd   : > { %v1618_v4 = vpop.permute.xlu1 %1617  ;;  %2053 = vrot.lane.b32.xlu0 %v3487_v17, %s3115_s17 }
  0xfe   : > { %1307 = vmatmul.mubr.bf16.vlgmr.msra.gmra.mrb[0].mxu1 %v2923_v19  ;;  %v1663_v8 = vsel %vm1661_vm1, %v1616_v61, %v1618_v4  ;;  %v2933_v19 = vld [vmem:[%s4542_s2 + $0x70] sm:$0xff]  }
  0xff   : > { %1694 = vmatprep.subr.bf16.mxu0 %v1663_v8  ;;  %v1614_v16 = vpop.permute.xlu0 %1613  ;;  %1316 = vmatprep.mubr.bf16.mxu1 %v3116_v59  ;;  %v4615_v4 = vld [vmem:[#allocation20_spill] sm:$0xff] }
 0x100   : > { %v1662_v13 = vsel %vm1661_vm1, %v1614_v16, %v1616_v61  ;;  %2643 = vmatpush1.bf16.msra.mxu1 %v3410_v54  ;;  %2051 = vrot.lane.b32.xlu1 %v3528_v35, %s3115_s17  ;;  %v4614_v61 = vld [vmem:[#allocation22_spill] sm:$0xff]  ;;  %v4616_v8 = vld [vmem:[#allocation24_spill] sm:$0xff]  ;;  %v2935_v16 = vld [vmem:[%s4542_s2 + $0x78] sm:$0xff]  }
 0x101   : > { %v1622_v1 = vpop.permute.xlu1 %1621  ;;  %1695 = vmatpush1.bf16.msra.mxu0 %v1662_v13  ;;  %2636 = vmatprep.subr.bf16.mxu1 %v3443_v2  ;;  %v2936_v13 = vld [vmem:[%s4542_s2 + $0x88] sm:$0xff]  }
 0x102   : > { %2057 = vrot.lane.b32.xlu0 %v3537_v43, %s3115_s17 }
 0x103   : > { %v1624_v17 = vpop.permute.xlu0 %1623 }
 0x104   : > { %v1665_v36 = vsel %vm1661_vm1, %v1622_v1, %v1624_v17  ;;  %2644 = vmatpush1.bf16.msra.mxu1 %v3489_v18  ;;  %2055 = vrot.lane.b32.xlu1 %v3500_v22, %s3115_s17  ;;  %v2942_v17 = vld [vmem:[%s4542_s2 + $0xa0] sm:$0xff]  }
 0x105   : > { %v1620_v54 = vpop.permute.xlu1 %1619  ;;  %1696 = vmatprep.subr.bf16.mxu0 %v1665_v36  ;;  %2637 = vmatprep.subr.bf16.mxu1 %v3504_v23  ;;  %v2926_v23 = vld [vmem:[%s4542_s2 + $0x50] sm:$0xff]   ;;  %v2943_v36 = vld [vmem:[%s4542_s2 + $0x38] sm:$0xff]  }
 0x106   : > { %v1664_v2 = vsel %vm1661_vm1, %v1620_v54, %v1622_v1  ;;  %1317 = vmatmul.mubr.bf16.gmra.mrb[4].mxu1 %v2925_v46  ;;  %2061 = vrot.lane.b32.xlu0 %v3510_v26, %s3115_s17  ;;  %v2937_v1 = vld [vmem:[%s4542_s2 + $0x20] sm:$0xff]   ;;  %v2941_v46 = vld [vmem:[%s4542_s2 + $0x30] sm:$0xff]   ;;  %v2944_v54 = vld [vmem:[%s4542_s2 + $0xa8] sm:$0xff]  }
 0x107   : > { %1697 = vmatpush1.bf16.msra.mxu0 %v1664_v2  ;;  %v1628_v35 = vpop.permute.xlu0 %1627  ;;  %1326 = vmatprep.mubr.bf16.mxu1 %v3116_v59  ;;  %v2945_v2 = vld [vmem:[%s4542_s2 + $0xb0] sm:$0xff]  }
 0x108   : > { %2645 = vmatpush1.bf16.msra.mxu1 %v3541_v47  ;;  %2059 = vrot.lane.b32.xlu1 %v3497_v21, %s3115_s17 }
 0x109   : > { %v1630_v18 = vpop.permute.xlu1 %1629  ;;  %2638 = vmatprep.subr.bf16.mxu1 %v3565_v62  ;;  %v4602_v62 = vld [vmem:[#allocation11_spill] sm:$0xff] }
 0x10a   : > { %v1667_v22 = vsel %vm1661_vm1, %v1628_v35, %v1630_v18  ;;  %2065 = vrot.lane.b32.xlu0 %v3549_v51, %s3115_s17 }
 0x10b   : > { %1698 = vmatprep.subr.bf16.mxu0 %v1667_v22  ;;  %v1626_v26 = vpop.permute.xlu0 %1625 }
 0x10c   : > { %v1666_v43 = vsel %vm1661_vm1, %v1626_v26, %v1628_v35  ;;  %2646 = vmatpush1.bf16.msra.mxu1 %v3604_v24  ;;  %2063 = vrot.lane.b32.xlu1 %v3583_v7, %s3115_s17  ;;  %v2946_v35 = vld [vmem:[%s4542_s2 + $0xb8] sm:$0xff]  }
 0x10d   : > { %v1634_v21 = vpop.permute.xlu1 %1633  ;;  %1699 = vmatpush1.bf16.msra.mxu0 %v1666_v43  ;;  %2639 = vmatprep.subr.bf16.mxu1 %v3635_v55  ;;  %v4603_v55 = vld [vmem:[#allocation12_spill] sm:$0xff] }
 0x10e   : > { %1327 = vmatmul.mubr.bf16.gmra.mrb[8].mxu1 %v2926_v23  ;;  %2069 = vrot.lane.b32.xlu0 %v3595_v15, %s3115_s17  ;;  %v2927_v15 = vld [vmem:[%s4542_s2 + $0x58] sm:$0xff]  }
 0x10f   : > { %v1636_v47 = vpop.permute.xlu0 %1635  ;;  %1336 = vmatprep.mubr.bf16.mxu1 %v3116_v59 }
 0x110   : > { %v1669_v51 = vsel %vm1661_vm1, %v1634_v21, %v1636_v47  ;;  %2647 = vmatpush1.bf16.msra.mxu1 %v3660_v14  ;;  %2067 = vrot.lane.b32.xlu1 %v4602_v62, %s3115_s17  ;;  %v4604_v14 = vld [vmem:[#allocation10_spill] sm:$0xff] }
 0x111   : > { %v1632_v24 = vpop.permute.xlu1 %1631  ;;  %1700 = vmatprep.subr.bf16.mxu0 %v1669_v51  ;;  %2640 = vmatprep.subr.bf16.mxu1 %v3693_v52 }
 0x112   : > { %v1668_v7 = vsel %vm1661_vm1, %v1632_v24, %v1634_v21  ;;  %2073 = vrot.lane.b32.xlu0 %v4603_v55, %s3115_s17 }
 0x113   : > { %1701 = vmatpush1.bf16.msra.mxu0 %v1668_v7  ;;  %v1640_v9 = vpop.permute.xlu0 %1639 }
 0x114   : > { %2648 = vmatpush1.bf16.msra.mxu1 %v3722_v58  ;;  %2071 = vrot.lane.b32.xlu1 %v4604_v14, %s3115_s17  ;;  %v4606_v58 = vld [vmem:[#allocation17_spill] sm:$0xff] }
 0x115   : > { %v1642_v20 = vpop.permute.xlu1 %1641  ;;  %2641 = vmatprep.subr.bf16.mxu1 %v3743_v3  ;;  %v2929_v3 = vld [vmem:[%s4542_s2 + $0x60] sm:$0xff]  }
 0x116   : > { %1337 = vmatmul.mubr.bf16.gmra.mrb[12].mxu1 %v2927_v15  ;;  %v1671_v52 = vsel %vm1661_vm1, %v1640_v9, %v1642_v20  ;;  %2077 = vrot.lane.b32.xlu0 %v4605_v32, %s3115_s17 }
 0x117   : > { %1702 = vmatprep.subr.bf16.mxu0 %v1671_v52  ;;  %v1638_v0 = vpop.permute.xlu0 %1637  ;;  %1346 = vmatprep.mubr.bf16.mxu1 %v3116_v59 }
 0x118   : > { %v1670_v34 = vsel %vm1661_vm1, %v1638_v0, %v1640_v9  ;;  %2649 = vmatpush1.bf16.msra.mxu1 %v3776_v42  ;;  %2075 = vrot.lane.b32.xlu1 %v4606_v58, %s3115_s17  ;;  %v4608_v42 = vld [vmem:[#allocation15_spill] sm:$0xff] }
 0x119   : > { %v1646_v50 = vpop.permute.xlu1 %1645  ;;  %1703 = vmatpush1.bf16.msra.mxu0 %v1670_v34  ;;  %2642 = vmatprep.subr.bf16.mxu1 %v3785_v56  ;;  %v4609_v56 = vld [vmem:[#allocation16_spill] sm:$0xff] }
 0x11a   : > { %2081 = vrot.lane.b32.xlu0 %v4607_v29, %s3115_s17 }
 0x11b   : > { %v1648_v37 = vpop.permute.xlu0 %1647 }
 0x11c   : > { %v1673_v39 = vsel %vm1661_vm1, %v1646_v50, %v1648_v37  ;;  %2650 = vmatpush1.bf16.msra.mxu1 %v3803_v30  ;;  %2079 = vrot.lane.b32.xlu1 %v4608_v42, %s3115_s17 }
 0x11d   : > { %v1644_v40 = vpop.permute.xlu1 %1643  ;;  %1704 = vmatprep.subr.bf16.mxu0 %v1673_v39 }
 0x11e   : > { %v1672_v63 = vsel %vm1661_vm1, %v1644_v40, %v1646_v50  ;;  %1347 = vmatmul.mubr.bf16.gmra.mrb[16].mxu1 %v2929_v3  ;;  %2085 = vrot.lane.b32.xlu0 %v4609_v56, %s3115_s17 }
 0x11f   : > { %1705 = vmatpush1.bf16.msra.mxu0 %v1672_v63  ;;  %v1652_v25 = vpop.permute.xlu0 %1651  ;;  %1356 = vmatprep.mubr.bf16.mxu1 %v3116_v59 }
 0x120   : > { %2083 = vrot.lane.b32.xlu1 %v4610_v33, %s3115_s17 }
 0x121   : > { %v1654_v44 = vpop.permute.xlu1 %1653 }
 0x122   : > { %v1675_v30 = vsel %vm1661_vm1, %v1652_v25, %v1654_v44  ;;  %2089 = vrot.lane.b32.xlu0 %v4611_v28, %s3115_s17 }
 0x123   : > { %1706 = vmatprep.subr.bf16.mxu0 %v1675_v30  ;;  %v1650_v5 = vpop.permute.xlu0 %1649 }
 0x124   : > { %v1674_v48 = vsel %vm1661_vm1, %v1650_v5, %v1652_v25  ;;  %2087 = vrot.lane.b32.xlu1 %v4612_v57, %s3115_s17 }
 0x125   : > { %v1658_v49 = vpop.permute.xlu1 %1657  ;;  %1707 = vmatpush1.bf16.msra.mxu0 %v1674_v48 }
 0x126   : > { %1357 = vmatmul.mubr.bf16.gmra.mrb[20].mxu1 %v2931_v53  ;;  %2093 = vrot.lane.b32.xlu0 %v3690_v6, %s3115_s17  ;;  %v2934_v6 = vld [vmem:[%s4542_s2 + $0x80] sm:$0xff]  }
 0x127   : > { %v1660_v38 = vpop.permute.xlu0 %1659  ;;  %1366 = vmatprep.mubr.bf16.mxu1 %v3116_v59 }
 0x128   : > { %v1677_v10 = vsel %vm1661_vm1, %v1658_v49, %v1660_v38  ;;  %2091 = vrot.lane.b32.xlu1 %v4613_v45, %s3115_s17 }
 0x129   : > { %v1656_v60 = vpop.permute.xlu1 %1655  ;;  %1708 = vmatprep.subr.bf16.mxu0 %v1677_v10 }
 0x12a   : > { %v1676_v12 = vsel %vm1661_vm1, %v1656_v60, %v1658_v49  ;;  %2097 = vrot.lane.b32.xlu0 %v4614_v61, %s3115_s17 }
 0x12b   : > { %1709 = vmatpush1.bf16.msra.mxu0 %v1676_v12 }
 0x12c   : > { %2095 = vrot.lane.b32.xlu1 %v4615_v4, %s3115_s17 }
 0x12e   : > { %1367 = vmatmul.mubr.bf16.gmra.mrb[24].mxu1 %v2933_v19  ;;  %1727 = vmatmul.mubr.bf16.vlgmr.msra.gmra.mrb[0].mxu0 %v2934_v6 }
 0x12f   : > { %1376 = vmatprep.mubr.bf16.mxu1 %v3116_v59  ;;  %1736 = vmatprep.mubr.bf16.mxu0 %v3116_v59 }
 0x130   : > { %2099 = vrot.lane.b32.xlu1 %v3762_v11, %s3115_s17  ;;  %2101 = vrot.lane.b32.xlu0 %v4616_v8, %s3115_s17  ;;  %v4617_v11 = vld [vmem:[#allocation25_spill] sm:$0xff] }
 0x134   : > { %2103 = vrot.lane.b32.xlu1 %v3728_v31, %s3115_s17  ;;  %2105 = vrot.lane.b32.xlu0 %v3765_v41, %s3115_s17  ;;  %v2938_v31 = vld [vmem:[%s4542_s2 + $0x90] sm:$0xff]   ;;  %v2939_v41 = vld [vmem:[%s4542_s2 + $0x28] sm:$0xff]  }
 0x136   : > { %1377 = vmatmul.mubr.bf16.gmra.mrb[28].mxu1 %v2935_v16  ;;  %1737 = vmatmul.mubr.bf16.gmra.mrb[4].mxu0 %v2936_v13 }
 0x137   : > { %1507 = vmatprep.mubr.bf16.mxu1 %v3116_v59  ;;  %1746 = vmatprep.mubr.bf16.mxu0 %v3116_v59 }
 0x138   : > { %2107 = vrot.lane.b32.xlu1 %v4617_v11, %s3115_s17  ;;  %2109 = vrot.lane.b32.xlu0 %v3731_v27, %s3115_s17  ;;  %v2940_v27 = vld [vmem:[%s4542_s2 + $0x98] sm:$0xff]   ;;  %v4150_v22 = vpop.permute.xlu0 %1857 }
 0x13a   : > { %v4148_v18 = vpop.permute.xlu1 %1862 }
 0x13c   : > { %v4154_v26 = vpop.permute.xlu0 %1872 }
 0x13e   : > { %1508 = vmatmul.mubr.bf16.vlgmr.msra.gmra.mrb[16].mxu1 %v2937_v1  ;;  %1747 = vmatmul.mubr.bf16.gmra.mrb[8].mxu0 %v2938_v31  ;;  %v4152_v23 = vpop.permute.xlu1 %1867 }
 0x13f   : > { %1517 = vmatprep.mubr.bf16.mxu1 %v3116_v59  ;;  %1756 = vmatprep.mubr.bf16.mxu0 %v3116_v59 }
 0x140   : > { %v4158_v21 = vpop.permute.xlu0 %1882 }
 0x142   : > { %v4156_v43 = vpop.permute.xlu1 %1877 }
 0x146   : > { %1518 = vmatmul.mubr.bf16.gmra.mrb[20].mxu1 %v2939_v41  ;;  %1757 = vmatmul.mubr.bf16.gmra.mrb[12].mxu0 %v2940_v27  ;;  %v4160_v47 = vpop.permute.xlu1 %1887 }
 0x147   : > { %1527 = vmatprep.mubr.bf16.mxu1 %v3116_v59  ;;  %1766 = vmatprep.mubr.bf16.mxu0 %v3116_v59 }
 0x14a   : > { %v4164_v51 = vpop.permute.xlu1 %1897 }
 0x14e   : > { %1528 = vmatmul.mubr.bf16.gmra.mrb[24].mxu1 %v2941_v46  ;;  %1767 = vmatmul.mubr.bf16.gmra.mrb[16].mxu0 %v2942_v17  ;;  %v4168_v24 = vpop.permute.xlu1 %1907 }
 0x14f   : > { %1537 = vmatprep.mubr.bf16.mxu1 %v3116_v59  ;;  %1776 = vmatprep.mubr.bf16.mxu0 %v3116_v59  ;;  %4619 = vst [vmem:[#allocation12_spill] sm:$0xff] %v4168_v24 }
 0x152   : > { %v4172_v15 = vpop.permute.xlu1 %1917 }
 0x153   : > { %4621 = vst [vmem:[#allocation13_spill] sm:$0xff] %v4172_v15 }
 0x156   : > { %1538 = vmatmul.mubr.bf16.gmra.mrb[28].mxu1 %v2943_v36  ;;  %1777 = vmatmul.mubr.bf16.gmra.mrb[20].mxu0 %v2944_v54  ;;  %v4176_v9 = vpop.permute.xlu1 %1927 }
 0x157   : > { %1786 = vmatprep.mubr.bf16.mxu0 %v3116_v59  ;;  %4623 = vst [vmem:[#allocation18_spill] sm:$0xff] %v4176_v9 }
 0x15a   : > { %v2016_v20 = vpop.permute.xlu1 %2015 }
 0x15e   : > { %1787 = vmatmul.mubr.bf16.gmra.mrb[24].mxu0 %v2945_v2  ;;  %v2020_v32 = vpop.permute.xlu1 %2019 }
 0x15f   : > { %1796 = vmatprep.mubr.bf16.mxu0 %v3116_v59  ;;  %v4162_v59 = vpop.permute.xlu0 %1892 }
 0x162   : > { %v2024_v34 = vpop.permute.xlu1 %2023 }
 0x163   : > { %v4166_v62 = vpop.permute.xlu0 %1902 }
 0x164   : > { %4618 = vst [vmem:[#allocation11_spill] sm:$0xff] %v4166_v62 }
 0x166   : > { %1797 = vmatmul.mubr.bf16.gmra.mrb[28].mxu0 %v2946_v35  ;;  %v4180_v50 = vpop.permute.xlu1 %2027 }
 0x167   : > { %v4170_v7 = vpop.permute.xlu0 %1912 }
 0x168   : > { %4620 = vst [vmem:[#allocation10_spill] sm:$0xff] %v4170_v7 }
 0x16a   : > { %v4184_v29 = vpop.permute.xlu1 %2031 }
 0x16b   : > { %v4174_v55 = vpop.permute.xlu0 %1922 }
 0x16c   : > { %4622 = vst [vmem:[#allocation17_spill] sm:$0xff] %v4174_v55 }
 0x16e   : > { %v4188_v39 = vpop.permute.xlu1 %2035 }
 0x16f   : > { %v4178_v14 = vpop.permute.xlu0 %1932 }
 0x170   : > { %4624 = vst [vmem:[#allocation15_spill] sm:$0xff] %v4178_v14 }
 0x172   : > { %v4192_v40 = vpop.permute.xlu1 %2039 }
 0x173   : > { %v2018_v52 = vpop.permute.xlu0 %2017 }
 0x176   : > { %v4196_v44 = vpop.permute.xlu1 %2043 }
 0x177   : > { %v2022_v0 = vpop.permute.xlu0 %2021 }
 0x17a   : > { %v4200_v5 = vpop.permute.xlu1 %2047 }
 0x17b   : > { %v2026_v58 = vpop.permute.xlu0 %2025 }
 0x17e   : > { %v4204_v10 = vpop.permute.xlu1 %2051 }
 0x17f   : > { %v4182_v3 = vpop.permute.xlu0 %2029 }
 0x182   : > { %v4216_v61 = vpop.permute.xlu1 %2055 }
 0x183   : > { %v4186_v37 = vpop.permute.xlu0 %2033 }
 0x186   : > { %v4226_v11 = vpop.permute.xlu1 %2059 }
 0x187   : > { %v4190_v42 = vpop.permute.xlu0 %2037 }
 0x18a   : > { %v4232_v41 = vpop.permute.xlu1 %2063 }
 0x18b   : > { %v4194_v63 = vpop.permute.xlu0 %2041  ;;  %4625 = vst [vmem:[#allocation16_spill] sm:$0xff] %v4232_v41 }
 0x18e   : > { %v4236_v46 = vpop.permute.xlu1 %2067 }
 0x18f   : > { %v4198_v53 = vpop.permute.xlu0 %2045  ;;  %4626 = vst [vmem:[#allocation14_spill] sm:$0xff] %v4236_v46 }
 0x192   : > { %v4240_v36 = vpop.permute.xlu1 %2071 }
 0x193   : > { %v4202_v57 = vpop.permute.xlu0 %2049  ;;  %4628 = vst [vmem:[#allocation23_spill] sm:$0xff] %v4240_v36 }
 0x196   : > { %v4244_v15 = vpop.permute.xlu1 %2075 }
 0x197   : > { %v4206_v45 = vpop.permute.xlu0 %2053  ;;  %4630 = vst [vmem:[#allocation22_spill] sm:$0xff] %v4244_v15 }
 0x19b   : > { %v4218_v4 = vpop.permute.xlu0 %2057 }
 0x19f   : > { %v4230_v31 = vpop.permute.xlu0 %2061 }
 0x1a3   : > { %v4234_v27 = vpop.permute.xlu0 %2065 }
 0x1a7   : > { %v4238_v17 = vpop.permute.xlu0 %2069 }
 0x1a8   : > { %4627 = vst [vmem:[#allocation19_spill] sm:$0xff] %v4238_v17  ;;  %v2112_v17 = vsel %vm1241_vm0, %v2016_v20, %v2018_v52 }
 0x1ab   : > { %v4242_v54 = vpop.permute.xlu0 %2073 }
 0x1ac   : > { %4629 = vst [vmem:[#allocation21_spill] sm:$0xff] %v4242_v54  ;;  %v2113_v54 = vsel %vm1241_vm0, %v2018_v52, %v2020_v32 }
 0x1af   : > { %v4247_v41 = vpop.permute.xlu0 %2077 }
 0x1b3   : > { %v4264_v52 = vpop.permute.xlu0 %2081 }
 0x1d1   : > { %v1308_v56 = vpop.f32.mrb[0].mxu1 }
 0x1d2   : > { %v1310_v25 = vpop.f32.mrb[1].mxu1 }
 0x1d3   : > { %v1312_v33 = vpop.f32.mrb[2].mxu1 }
 0x1d4   : > { %v1314_v30 = vpop.f32.mrb[3].mxu1 }
 0x1d9   : > { %v1318_v28 = vpop.f32.mrb[4].mxu1 }
 0x1da   : > { %v1320_v48 = vpop.f32.mrb[5].mxu1 }
 0x1db   : > { %v1322_v49 = vpop.f32.mrb[6].mxu1 }
 0x1dc   : > { %v1324_v38 = vpop.f32.mrb[7].mxu1 }
 0x1e1   : > { %v4208_v60 = vpop.f32.mrb[8].mxu1 }
 0x1e2   : > { %v4210_v12 = vpop.f32.mrb[9].mxu1 }
 0x1e3   : > { %v4212_v19 = vpop.f32.mrb[10].mxu1 }
 0x1e4   : > { %v4214_v6 = vpop.f32.mrb[11].mxu1 }
 0x1e9   : > { %v4220_v8 = vpop.f32.mrb[12].mxu1 }
 0x1ea   : > { %v4222_v16 = vpop.f32.mrb[13].mxu1 }
 0x1eb   : > { %v4224_v13 = vpop.f32.mrb[14].mxu1 }
 0x1ec   : > { %v4228_v1 = vpop.f32.mrb[15].mxu1 }
 0x201   : > { %v1728_v2 = vpop.f32.mrb[0].mxu0 }
 0x202   : > { %v2651_v35 = vadd.f32 %v1728_v2, %v1308_v56  ;;  %v1730_v14 = vpop.f32.mrb[1].mxu0 }
 0x203   : > { %v2652_v9 = vadd.f32 %v1730_v14, %v1310_v25  ;;  %v1732_v55 = vpop.f32.mrb[2].mxu0  ;;  %v2114_v25 = vsel %vm1241_vm0, %v2022_v0, %v2024_v34 }
 0x204   : > { %v1935_v7 = vadd.f32 %v2651_v35, %v4150_v22  ;;  %v2653_v24 = vadd.f32 %v1732_v55, %v1312_v33  ;;  %v1734_v62 = vpop.f32.mrb[3].mxu0  ;;  %v2115_v55 = vsel %vm1241_vm0, %v2024_v34, %v2026_v58 }
 0x205   : > { %v1936_v36 = vadd.f32 %v2652_v9, %v4150_v22  ;;  %v2654_v46 = vadd.f32 %v1734_v62, %v1314_v30  ;;  %v4261_v9 = vpop.permute.xlu1 %2079 }
 0x206   : > { %v2176_v56 = vadd.f32 %v2112_v17, %v1935_v7  ;;  %v1937_v14 = vadd.f32 %v2653_v24, %v4148_v18 }
 0x207   : > { %v2177_v2 = vadd.f32 %v2113_v54, %v1936_v36  ;;  %v1938_v15 = vadd.f32 %v2654_v46, %v4148_v18 }
 0x208   : > { %2208 = vst [vmem:[%s4257_s6] sm:$0xff] %v2176_v56  ;;  %v2178_v22 = vadd.f32 %v2114_v25, %v1937_v14 }
 0x209   : > { %2209 = vst [vmem:[%s4257_s6 + $0x8] sm:$0xff] %v2177_v2  ;;  %v2179_v62 = vadd.f32 %v2115_v55, %v1938_v15  ;;  %v1738_v7 = vpop.f32.mrb[4].mxu0  ;;  %v2116_v15 = vsel %vm1241_vm0, %v4180_v50, %v4182_v3 }
 0x20a   : > { %2210 = vst [vmem:[%s4257_s6 + $0x10] sm:$0xff] %v2178_v22  ;;  %v2655_v24 = vadd.f32 %v1738_v7, %v1318_v28  ;;  %v1740_v20 = vpop.f32.mrb[5].mxu0  ;;  %v2117_v28 = vsel %vm1241_vm0, %v4182_v3, %v4184_v29  ;;  %v4286_v3 = vpop.permute.xlu0 %2085  ;;  %v2121_v7 = vsel %vm1241_vm0, %v4194_v63, %v4196_v44 }
 0x20b   : > { %2211 = vst [vmem:[%s4257_s6 + $0x18] sm:$0xff] %v2179_v62  ;;  %v2656_v18 = vadd.f32 %v1740_v20, %v1320_v48  ;;  %v1742_v32 = vpop.f32.mrb[6].mxu0  ;;  %v2122_v20 = vsel %vm1241_vm0, %v4198_v53, %v4200_v5 }
 0x20c   : > { %v1939_v0 = vadd.f32 %v2655_v24, %v4152_v23  ;;  %v2657_v34 = vadd.f32 %v1742_v32, %v1322_v49  ;;  %v1744_v58 = vpop.f32.mrb[7].mxu0  ;;  %v2118_v49 = vsel %vm1241_vm0, %v4186_v37, %v4188_v39 }
 0x20d   : > { %v1940_v33 = vadd.f32 %v2656_v18, %v4152_v23  ;;  %v2658_v30 = vadd.f32 %v1744_v58, %v1324_v38  ;;  %v2119_v23 = vsel %vm1241_vm0, %v4188_v39, %v4190_v42  ;;  %v4284_v38 = vpop.permute.xlu1 %2083 }
 0x20e   : > { %v2180_v46 = vadd.f32 %v2116_v15, %v1939_v0  ;;  %v1941_v48 = vadd.f32 %v2657_v34, %v4154_v26 }
 0x20f   : > { %v2181_v17 = vadd.f32 %v2117_v28, %v1940_v33  ;;  %v1942_v36 = vadd.f32 %v2658_v30, %v4154_v26 }
 0x210   : > { %2212 = vst [vmem:[%s4257_s6 + $0x20] sm:$0xff] %v2180_v46  ;;  %v2182_v50 = vadd.f32 %v2118_v49, %v1941_v48  ;;  %v2125_v49 = vsel %vm1241_vm0, %v4206_v45, %v4216_v61 }
 0x211   : > { %2213 = vst [vmem:[%s4257_s6 + $0x28] sm:$0xff] %v2181_v17  ;;  %v2183_v29 = vadd.f32 %v2119_v23, %v1942_v36  ;;  %v4289_v54 = vpop.f32.mrb[16].mxu1  ;;  %v1748_v35 = vpop.f32.mrb[8].mxu0  ;;  %v2126_v36 = vsel %vm1241_vm0, %v4218_v4, %v4226_v11 }
 0x212   : > { %2214 = vst [vmem:[%s4257_s6 + $0x30] sm:$0xff] %v2182_v50  ;;  %v2659_v37 = vadd.f32 %v1748_v35, %v4208_v60  ;;  %v4293_v56 = vpop.f32.mrb[17].mxu1  ;;  %v1750_v26 = vpop.f32.mrb[9].mxu0  ;;  %v2120_v60 = vsel %vm1241_vm0, %v4192_v40, %v4194_v63 }
 0x213   : > { %2215 = vst [vmem:[%s4257_s6 + $0x38] sm:$0xff] %v2183_v29  ;;  %v2660_v39 = vadd.f32 %v1750_v26, %v4210_v12  ;;  %v4297_v42 = vpop.f32.mrb[18].mxu1  ;;  %v1752_v14 = vpop.f32.mrb[10].mxu0 }
 0x214   : > { %v1943_v25 = vadd.f32 %v2659_v37, %v4156_v43  ;;  %v2661_v2 = vadd.f32 %v1752_v14, %v4212_v19  ;;  %v4301_v55 = vpop.f32.mrb[19].mxu1  ;;  %v1754_v22 = vpop.f32.mrb[11].mxu0 }
 0x215   : > { %v1944_v62 = vadd.f32 %v2660_v39, %v4156_v43  ;;  %v2662_v12 = vadd.f32 %v1754_v22, %v4214_v6  ;;  %v2123_v43 = vsel %vm1241_vm0, %v4200_v5, %v4202_v57  ;;  %v4320_v32 = vpop.permute.xlu1 %2087  ;;  %v4322_v63 = vpop.permute.xlu0 %2089  ;;  %v4631_v22 = vld [vmem:[#allocation16_spill] sm:$0xff] }
 0x216   : > { %v2184_v24 = vadd.f32 %v2120_v60, %v1943_v25  ;;  %v1945_v19 = vadd.f32 %v2661_v2, %v4158_v21  ;;  %v2128_v60 = vsel %vm1241_vm0, %v4631_v22, %v4234_v27  ;;  %v4640_v22 = vld [vmem:[#allocation13_spill] sm:$0xff] }
 0x217   : > { %v2185_v18 = vadd.f32 %v2121_v7, %v1944_v62  ;;  %v1946_v40 = vadd.f32 %v2662_v12, %v4158_v21  ;;  %v4632_v12 = vld [vmem:[#allocation14_spill] sm:$0xff] }
 0x218   : > { %2216 = vst [vmem:[%s4257_s6 + $0x40] sm:$0xff] %v2184_v24  ;;  %v2186_v6 = vadd.f32 %v2122_v20, %v1945_v19  ;;  %v4633_v24 = vld [vmem:[#allocation11_spill] sm:$0xff] }
 0x219   : > { %2217 = vst [vmem:[%s4257_s6 + $0x48] sm:$0xff] %v2185_v18  ;;  %v2187_v44 = vadd.f32 %v2123_v43, %v1946_v40  ;;  %v4325_v0 = vpop.f32.mrb[20].mxu1  ;;  %v1758_v34 = vpop.f32.mrb[12].mxu0  ;;  %v4635_v20 = vld [vmem:[#allocation19_spill] sm:$0xff] }
 0x21a   : > { %2218 = vst [vmem:[%s4257_s6 + $0x50] sm:$0xff] %v2186_v6  ;;  %v2663_v53 = vadd.f32 %v1758_v34, %v4220_v8  ;;  %v4329_v58 = vpop.f32.mrb[21].mxu1  ;;  %v1760_v21 = vpop.f32.mrb[13].mxu0  ;;  %v2124_v8 = vsel %vm1241_vm0, %v4204_v10, %v4206_v45  ;;  %v4636_v6 = vld [vmem:[#allocation21_spill] sm:$0xff] }
 0x21b   : > { %2219 = vst [vmem:[%s4257_s6 + $0x58] sm:$0xff] %v2187_v44  ;;  %v2664_v5 = vadd.f32 %v1760_v21, %v4222_v16  ;;  %v4333_v57 = vpop.f32.mrb[22].mxu1  ;;  %v1762_v15 = vpop.f32.mrb[14].mxu0 }
 0x21c   : > { %v1947_v33 = vadd.f32 %v2663_v53, %v4160_v47  ;;  %v2665_v30 = vadd.f32 %v1762_v15, %v4224_v13  ;;  %v4337_v28 = vpop.f32.mrb[23].mxu1  ;;  %v1764_v46 = vpop.f32.mrb[15].mxu0 }
 0x21d   : > { %v1948_v48 = vadd.f32 %v2664_v5, %v4160_v47  ;;  %v2666_v16 = vadd.f32 %v1764_v46, %v4228_v1  ;;  %v2127_v47 = vsel %vm1241_vm0, %v4226_v11, %v4230_v31  ;;  %v4356_v50 = vpop.permute.xlu1 %2091  ;;  %v4358_v45 = vpop.permute.xlu0 %2093 }
 0x21e   : > { %v2188_v17 = vadd.f32 %v2124_v8, %v1947_v33  ;;  %v1949_v13 = vadd.f32 %v2665_v30, %v4162_v59 }
 0x21f   : > { %v2189_v23 = vadd.f32 %v2125_v49, %v1948_v48  ;;  %v1950_v10 = vadd.f32 %v2666_v16, %v4162_v59  ;;  %v4637_v48 = vld [vmem:[#allocation12_spill] sm:$0xff] }
 0x220   : > { %2220 = vst [vmem:[%s4257_s6 + $0x60] sm:$0xff] %v2188_v17  ;;  %v2190_v1 = vadd.f32 %v2126_v36, %v1949_v13  ;;  %v4638_v36 = vld [vmem:[#allocation22_spill] sm:$0xff] }
 0x221   : > { %2221 = vst [vmem:[%s4257_s6 + $0x68] sm:$0xff] %v2189_v23  ;;  %v2191_v61 = vadd.f32 %v2127_v47, %v1950_v10  ;;  %v1529_v29 = vpop.f32.mrb[24].mxu1  ;;  %v1768_v35 = vpop.f32.mrb[16].mxu0  ;;  %v2132_v23 = vsel %vm1241_vm0, %v4638_v36, %v4247_v41 }
 0x222   : > { %2222 = vst [vmem:[%s4257_s6 + $0x70] sm:$0xff] %v2190_v1  ;;  %v2667_v4 = vadd.f32 %v1768_v35, %v4289_v54  ;;  %v1531_v37 = vpop.f32.mrb[25].mxu1  ;;  %v1770_v26 = vpop.f32.mrb[17].mxu0  ;;  %v4639_v1 = vld [vmem:[#allocation10_spill] sm:$0xff] }
 0x223   : > { %2223 = vst [vmem:[%s4257_s6 + $0x78] sm:$0xff] %v2191_v61  ;;  %v2668_v59 = vadd.f32 %v1770_v26, %v4293_v56  ;;  %v1533_v39 = vpop.f32.mrb[26].mxu1  ;;  %v1772_v11 = vpop.f32.mrb[18].mxu0  ;;  %v2129_v56 = vsel %vm1241_vm0, %v4234_v27, %v4632_v12  ;;  %v2134_v61 = vsel %vm1241_vm0, %v4264_v52, %v4284_v38 }
 0x224   : > { %v1951_v31 = vadd.f32 %v2667_v4, %v4164_v51  ;;  %v2669_v14 = vadd.f32 %v1772_v11, %v4297_v42  ;;  %v1535_v25 = vpop.f32.mrb[27].mxu1  ;;  %v1774_v2 = vpop.f32.mrb[19].mxu0  ;;  %v4634_v42 = vld [vmem:[#allocation23_spill] sm:$0xff] }
 0x225   : > { %v1952_v54 = vadd.f32 %v2668_v59, %v4164_v51  ;;  %v2670_v62 = vadd.f32 %v1774_v2, %v4301_v55  ;;  %v2130_v18 = vsel %vm1241_vm0, %v4635_v20, %v4634_v42  ;;  %v2131_v51 = vsel %vm1241_vm0, %v4634_v42, %v4636_v6  ;;  %v2096_v44 = vpop.permute.xlu1 %2095  ;;  %v2098_v34 = vpop.permute.xlu0 %2097 }
 0x226   : > { %v2192_v7 = vadd.f32 %v2128_v60, %v1951_v31  ;;  %v1953_v19 = vadd.f32 %v2669_v14, %v4633_v24  ;;  %v2139_v20 = vsel %vm1241_vm0, %v2096_v44, %v2098_v34 }
 0x227   : > { %v2193_v40 = vadd.f32 %v2129_v56, %v1952_v54  ;;  %v1954_v43 = vadd.f32 %v2670_v62, %v4633_v24 }
 0x228   : > { %2224 = vst [vmem:[%s4257_s6 + $0x80] sm:$0xff] %v2192_v7  ;;  %v2194_v55 = vadd.f32 %v2130_v18, %v1953_v19  ;;  %v4641_v7 = vld [vmem:[#allocation17_spill] sm:$0xff]  ;;  %v2138_v19 = vsel %vm1241_vm0, %v4358_v45, %v2096_v44 }
 0x229   : > { %2225 = vst [vmem:[%s4257_s6 + $0x88] sm:$0xff] %v2193_v40  ;;  %v2195_v27 = vadd.f32 %v2131_v51, %v1954_v43  ;;  %v1539_v53 = vpop.f32.mrb[28].mxu1  ;;  %v1778_v21 = vpop.f32.mrb[20].mxu0 }
 0x22a   : > { %2226 = vst [vmem:[%s4257_s6 + $0x90] sm:$0xff] %v2194_v55  ;;  %v2671_v5 = vadd.f32 %v1778_v21, %v4325_v0  ;;  %v1541_v15 = vpop.f32.mrb[29].mxu1  ;;  %v1780_v33 = vpop.f32.mrb[21].mxu0  ;;  %v4642_v55 = vld [vmem:[#allocation18_spill] sm:$0xff] }
 0x22b   : > { %2227 = vst [vmem:[%s4257_s6 + $0x98] sm:$0xff] %v2195_v27  ;;  %v2672_v30 = vadd.f32 %v1780_v33, %v4329_v58  ;;  %v1543_v46 = vpop.f32.mrb[30].mxu1  ;;  %v1782_v8 = vpop.f32.mrb[22].mxu0  ;;  %v2133_v58 = vsel %vm1241_vm0, %v4247_v41, %v4261_v9 }
 0x22c   : > { %v1955_v16 = vadd.f32 %v2671_v5, %v4637_v48  ;;  %v2673_v49 = vadd.f32 %v1782_v8, %v4333_v57  ;;  %v1545_v17 = vpop.f32.mrb[31].mxu1  ;;  %v1784_v13 = vpop.f32.mrb[23].mxu0 }
 0x22d   : > { %v1956_v0 = vadd.f32 %v2672_v30, %v4637_v48  ;;  %v2674_v10 = vadd.f32 %v1784_v13, %v4337_v28  ;;  %v2102_v26 = vpop.permute.xlu0 %2101  ;;  %v2135_v28 = vsel %vm1241_vm0, %v4284_v38, %v4286_v3  ;;  %v2100_v11 = vpop.permute.xlu1 %2099  ;;  %v2136_v38 = vsel %vm1241_vm0, %v4320_v32, %v4322_v63 }
 0x22e   : > { %v2196_v47 = vadd.f32 %v2132_v23, %v1955_v16  ;;  %v1957_v57 = vadd.f32 %v2673_v49, %v4639_v1  ;;  %v2140_v44 = vsel %vm1241_vm0, %v2100_v11, %v2102_v26  ;;  %v2266_v23 = vld [vmem:[%s4257_s6 + $0x8] sm:$0xff] (%p3236_p10)  ;;  %v2292_v11 = vld [vmem:[%s4257_s6 + $0x70] sm:$0xff] (%p3236_p10) }
 0x22f   : > { %v2197_v35 = vadd.f32 %v2133_v58, %v1956_v0  ;;  %v1958_v4 = vadd.f32 %v2674_v10, %v4639_v1  ;;  %v2268_v0 = vld [vmem:[%s4257_s6 + $0x10] sm:$0xff] (%p3236_p10)  ;;  %v2270_v10 = vld [vmem:[%s4257_s6 + $0x18] sm:$0xff] (%p3236_p10)  ;;  %v2272_v58 = vld [vmem:[%s4257_s6 + $0x20] sm:$0xff] (%p3236_p10)  ;;  %2267 = vst [vmem:[%s4456_s0 + $0x8] sm:$0xff] (%p3236_p10), %v2266_v23 }
 0x230   : > { %2228 = vst [vmem:[%s4257_s6 + $0xa0] sm:$0xff] %v2196_v47  ;;  %v2198_v59 = vadd.f32 %v2134_v61, %v1957_v57  ;;  %v2274_v47 = vld [vmem:[%s4257_s6 + $0x28] sm:$0xff] (%p3236_p10)  ;;  %v2276_v1 = vld [vmem:[%s4257_s6 + $0x30] sm:$0xff] (%p3236_p10)  ;;  %v2278_v57 = vld [vmem:[%s4257_s6 + $0x38] sm:$0xff] (%p3236_p10) }
 0x231   : > { %2229 = vst [vmem:[%s4257_s6 + $0xa8] sm:$0xff] %v2197_v35  ;;  %v2199_v41 = vadd.f32 %v2135_v28, %v1958_v4  ;;  %v1788_v9 = vpop.f32.mrb[24].mxu0  ;;  %v2106_v56 = vpop.permute.xlu0 %2105  ;;  %v2280_v61 = vld [vmem:[%s4257_s6 + $0x40] sm:$0xff] (%p3236_p10)  ;;  %v2282_v35 = vld [vmem:[%s4257_s6 + $0x48] sm:$0xff] (%p3236_p10)  ;;  %v2284_v4 = vld [vmem:[%s4257_s6 + $0x50] sm:$0xff] (%p3236_p10) }
 0x232   : > { %2230 = vst [vmem:[%s4257_s6 + $0xb0] sm:$0xff] %v2198_v59  ;;  %v2675_v31 = vadd.f32 %v1788_v9, %v1529_v29  ;;  %v1790_v14 = vpop.f32.mrb[25].mxu0  ;;  %v2137_v29 = vsel %vm1241_vm0, %v4322_v63, %v4356_v50  ;;  %2269 = vst [vmem:[%s4456_s0 + $0x20] sm:$0xff] (%p3236_p10), %v2268_v0  ;;  %v2288_v28 = vld [vmem:[%s4257_s6 + $0x60] sm:$0xff] (%p3236_p10)  ;;  %v2290_v59 = vld [vmem:[%s4257_s6 + $0x68] sm:$0xff] (%p3236_p10) }
 0x233   : > { %2231 = vst [vmem:[%s4257_s6 + $0xb8] sm:$0xff] %v2199_v41  ;;  %v2676_v2 = vadd.f32 %v1790_v14, %v1531_v37  ;;  %v1792_v52 = vpop.f32.mrb[26].mxu0  ;;  %2271 = vst [vmem:[%s4456_s0 + $0x28] sm:$0xff] (%p3236_p10), %v2270_v10  ;;  %v2294_v41 = vld [vmem:[%s4257_s6 + $0x78] sm:$0xff] (%p3236_p10)  ;;  %v2296_v9 = vld [vmem:[%s4257_s6 + $0x80] sm:$0xff] (%p3236_p10) }
 0x234   : > { %v1959_v60 = vadd.f32 %v2675_v31, %v4640_v22  ;;  %v2677_v54 = vadd.f32 %v1792_v52, %v1533_v39  ;;  %v1794_v62 = vpop.f32.mrb[27].mxu0  ;;  %v2104_v39 = vpop.permute.xlu1 %2103  ;;  %2273 = vst [vmem:[%s4456_s0 + $0x40] sm:$0xff] (%p3236_p10), %v2272_v58  ;;  %2275 = vst [vmem:[%s4456_s0 + $0x48] sm:$0xff] (%p3236_p10), %v2274_v47  ;;  %v2298_v31 = vld [vmem:[%s4257_s6 + $0x88] sm:$0xff] (%p3236_p10)  ;;  %v2300_v14 = vld [vmem:[%s4257_s6 + $0x90] sm:$0xff] (%p3236_p10) }
 0x235   : > { %v1960_v3 = vadd.f32 %v2676_v2, %v4640_v22  ;;  %v2678_v12 = vadd.f32 %v1794_v62, %v1535_v25  ;;  %v2110_v51 = vpop.permute.xlu0 %2109  ;;  %2277 = vst [vmem:[%s4456_s0 + $0x60] sm:$0xff] (%p3236_p10), %v2276_v1  ;;  %2279 = vst [vmem:[%s4456_s0 + $0x68] sm:$0xff] (%p3236_p10), %v2278_v57  ;;  %v2302_v2 = vld [vmem:[%s4257_s6 + $0x98] sm:$0xff] (%p3236_p10) }
 0x236   : > { %v2200_v37 = vadd.f32 %v2136_v38, %v1959_v60  ;;  %v1961_v24 = vadd.f32 %v2677_v54, %v4641_v7  ;;  %2281 = vst [vmem:[%s4456_s0 + $0x80] sm:$0xff] (%p3236_p10), %v2280_v61  ;;  %2283 = vst [vmem:[%s4456_s0 + $0x88] sm:$0xff] (%p3236_p10), %v2282_v35 }
 0x237   : > { %v2201_v42 = vadd.f32 %v2137_v29, %v1960_v3  ;;  %v1962_v32 = vadd.f32 %v2678_v12, %v4641_v7  ;;  %2285 = vst [vmem:[%s4456_s0 + $0xa0] sm:$0xff] (%p3236_p10), %v2284_v4  ;;  %2289 = vst [vmem:[%s4456_s0 + $0xc0] sm:$0xff] (%p3236_p10), %v2288_v28  ;;  %v2304_v52 = vld [vmem:[%s4257_s6 + $0xa0] sm:$0xff] (%p3236_p10) }
 0x238   : > { %2232 = vst [vmem:[%s4257_s6 + $0xc0] sm:$0xff] %v2200_v37  ;;  %v2202_v25 = vadd.f32 %v2138_v19, %v1961_v24  ;;  %v2108_v21 = vpop.permute.xlu1 %2107  ;;  %2291 = vst [vmem:[%s4456_s0 + $0xc8] sm:$0xff] (%p3236_p10), %v2290_v59  ;;  %v2306_v22 = vld [vmem:[%s4257_s6 + $0xa8] sm:$0xff] (%p3236_p10) }
 0x239   : > { %2233 = vst [vmem:[%s4257_s6 + $0xc8] sm:$0xff] %v2201_v42  ;;  %v2203_v18 = vadd.f32 %v2139_v20, %v1962_v32  ;;  %v1798_v40 = vpop.f32.mrb[28].mxu0  ;;  %v2143_v48 = vsel %vm1241_vm0, %v2108_v21, %v2110_v51  ;;  %v2142_v49 = vsel %vm1241_vm0, %v2106_v56, %v2108_v21  ;;  %2293 = vst [vmem:[%s4456_s0 + $0xe0] sm:$0xff] (%p3236_p10), %v2292_v11  ;;  %v2308_v60 = vld [vmem:[%s4257_s6 + $0xb0] sm:$0xff] (%p3236_p10) }
 0x23a   : > { %2234 = vst [vmem:[%s4257_s6 + $0xd0] sm:$0xff] %v2202_v25  ;;  %v2679_v63 = vadd.f32 %v1798_v40, %v1539_v53  ;;  %v1800_v50 = vpop.f32.mrb[29].mxu0  ;;  %v2141_v53 = vsel %vm1241_vm0, %v2102_v26, %v2104_v39  ;;  %v2286_v26 = vld [vmem:[%s4257_s6 + $0x58] sm:$0xff] (%p3236_p10)  ;;  %2295 = vst [vmem:[%s4456_s0 + $0xe8] sm:$0xff] (%p3236_p10), %v2294_v41 }
 0x23b   : > { %2235 = vst [vmem:[%s4257_s6 + $0xd8] sm:$0xff] %v2203_v18  ;;  %v2680_v43 = vadd.f32 %v1800_v50, %v1541_v15  ;;  %v1802_v6 = vpop.f32.mrb[30].mxu0  ;;  %v4643_v15 = vld [vmem:[#allocation15_spill] sm:$0xff]  ;;  %2287 = vst [vmem:[%s4456_s0 + $0xa8] sm:$0xff] (%p3236_p10), %v2286_v26  ;;  %v2310_v54 = vld [vmem:[%s4257_s6 + $0xb8] sm:$0xff] (%p3236_p10) }
 0x23c   : > { %v1963_v45 = vadd.f32 %v2679_v63, %v4642_v55  ;;  %v2681_v27 = vadd.f32 %v1802_v6, %v1543_v46  ;;  %v1804_v5 = vpop.f32.mrb[31].mxu0  ;;  %2297 = vst [vmem:[%s4456_s0 + $0x100] sm:$0xff] (%p3236_p10), %v2296_v9  ;;  %2299 = vst [vmem:[%s4456_s0 + $0x108] sm:$0xff] (%p3236_p10), %v2298_v31 }
 0x23d   : > { %v1964_v34 = vadd.f32 %v2680_v43, %v4642_v55  ;;  %v2682_v33 = vadd.f32 %v1804_v5, %v1545_v17  ;;  %2246 = sbr.rel (!%p3236_p10) target bundleno = 588 (0x24c), region = 144  ;;  %v2264_v17 = vld [vmem:[%s4257_s6] sm:$0xff] (%p3236_p10)  ;;  %2301 = vst [vmem:[%s4456_s0 + $0x120] sm:$0xff] (%p3236_p10), %v2300_v14  ;;  %2303 = vst [vmem:[%s4456_s0 + $0x128] sm:$0xff] (%p3236_p10), %v2302_v2 }
 0x23e   : > { %v2204_v30 = vadd.f32 %v2140_v44, %v1963_v45  ;;  %v1965_v8 = vadd.f32 %v2681_v27, %v4643_v15  ;;  %2265 = vst [vmem:[%s4456_s0] sm:$0xff] (%p3236_p10), %v2264_v17  ;;  %2305 = vst [vmem:[%s4456_s0 + $0x140] sm:$0xff] (%p3236_p10), %v2304_v52 }
 0x23f   : > { %v2205_v16 = vadd.f32 %v2141_v53, %v1964_v34  ;;  %v1966_v46 = vadd.f32 %v2682_v33, %v4643_v15  ;;  %2307 = vst [vmem:[%s4456_s0 + $0x148] sm:$0xff] (%p3236_p10), %v2306_v22  ;;  %2309 = vst [vmem:[%s4456_s0 + $0x160] sm:$0xff] (%p3236_p10), %v2308_v60  ;;  %v2312_v62 = vld [vmem:[%s4257_s6 + $0xc0] sm:$0xff] (%p3236_p10) }
 0x240   : > { %2236 = vst [vmem:[%s4257_s6 + $0xe0] sm:$0xff] %v2204_v30  ;;  %v2206_v13 = vadd.f32 %v2142_v49, %v1965_v8  ;;  %2311 = vst [vmem:[%s4456_s0 + $0x168] sm:$0xff] (%p3236_p10), %v2310_v54  ;;  %v2314_v38 = vld [vmem:[%s4257_s6 + $0xc8] sm:$0xff] (%p3236_p10) }
 0x241   : > { %2237 = vst [vmem:[%s4257_s6 + $0xe8] sm:$0xff] %v2205_v16  ;;  %v2207_v36 = vadd.f32 %v2143_v48, %v1966_v46  ;;  %v2316_v3 = vld [vmem:[%s4257_s6 + $0xd0] sm:$0xff] (%p3236_p10)  ;;  %2313 = vst [vmem:[%s4456_s0 + $0x180] sm:$0xff] (%p3236_p10), %v2312_v62 }
 0x242   : > { %2238 = vst [vmem:[%s4257_s6 + $0xf0] sm:$0xff] %v2206_v13  ;;  %2315 = vst [vmem:[%s4456_s0 + $0x188] sm:$0xff] (%p3236_p10), %v2314_v38  ;;  %v2318_v12 = vld [vmem:[%s4257_s6 + $0xd8] sm:$0xff] (%p3236_p10) }
 0x243   : > { %2239 = vst [vmem:[%s4257_s6 + $0xf8] sm:$0xff] %v2207_v36  ;;  %2317 = vst [vmem:[%s4456_s0 + $0x1a0] sm:$0xff] (%p3236_p10), %v2316_v3 }
 0x244   : > { %2319 = vst [vmem:[%s4456_s0 + $0x1a8] sm:$0xff] %v2318_v12 }
 0x247   : > { %v2320_v56 = vld [vmem:[%s4257_s6 + $0xe0] sm:$0xff] }
 0x248   : > { %v2322_v29 = vld [vmem:[%s4257_s6 + $0xe8] sm:$0xff]  ;;  %2321 = vst [vmem:[%s4456_s0 + $0x1c0] sm:$0xff] %v2320_v56 }
 0x249   : > { %2323 = vst [vmem:[%s4456_s0 + $0x1c8] sm:$0xff] %v2322_v29  ;;  %v2324_v37 = vld [vmem:[%s4257_s6 + $0xf0] sm:$0xff] }
 0x24a   : > { %v2326_v7 = vld [vmem:[%s4257_s6 + $0xf8] sm:$0xff]  ;;  %2325 = vst [vmem:[%s4456_s0 + $0x1e0] sm:$0xff] %v2324_v37 }
 0x24b   : > { %2327 = vst [vmem:[%s4456_s0 + $0x1e8] sm:$0xff] %v2326_v7 }
 0x24c PF: > { %s14_s23 = sadd.s32 1, %s3097_s23   ;;  %s4644_s17 = sld [smem:[#allocation5_spill]] }
 0x24d   : > { %p11_p3 = scmp.ge.s32.totalorder %s14_s23, 6   ;;  %s4645_s18 = sld [smem:[#allocation9_spill]] }
 0x24e   : > { %s4646_s19 = sld [smem:[#allocation6_spill]]  ;;  %s4647_s21 = sld [smem:[#allocation7_spill]] }
 0x24f   : > { %s4648_s29 = sld [smem:[#allocation8_spill]]  ;;  %s4649_s15 = smov %s3069_s16 }
 0x250   : > { %s4650_s16 = smov %s3225_s14  ;;  %s4651_s20 = smov %s3093_s22 }
 0x251   :  { %13 = sbr.rel (!%p11_p3) target bundleno = 7 (0x7), region = 270 }
 0x255   : > { %s4652_s22 = smov %s4648_s29 }

// kernel: _lambda_.3
= control target key start
LH: loop header
LB: loop body
LE: loop exit
PB: predicated region body
PF: predicated region fallthrough
CT: control target
= control target key end

     0   :  { %s4540_s0 = inlined_call_operand.vmem [shape: f32[2,128,640], index: 0, kind: input, shape index: {}, may-alias: {0,1}]   ;;  %s4541_s1 = inlined_call_operand.vmem [shape: f32[2,128,640], index: 1, kind: input, shape index: {}, may-alias: {0,1}]   ;;  %s4542_s2 = inlined_call_operand.vmem [shape: bf16[3,128,128], index: 2, kind: input, shape index: {}]   ;;  %s4543_s3 = inlined_call_operand.vmem [shape: f32[128,1], index: 3, kind: input, shape index: {}]   ;;  %s4544_s4 = inlined_call_operand.vmem [shape: f32[2,128,512], index: 4, kind: output, shape index: {}]  }
   0x1   :  { %4573 = sst [smem:[#allocation26_spill]] %s4540_s0 }
   0x2   :  { %s3143_s15 = smov 0   ;;  %s3145_s16 = smov 0  }
   0x3   :  { %s3147_s17 = smov 0   ;;  %s3149_s18 = smov 0  }
   0x4   :  { %s3151_s19 = smov 0   ;;  %s3153_s20 = smov 0  }
   0x5   :  { %s3155_s21 = smov 0   ;;  %s3157_s22 = smov 0  }
   0x6   :  { %s3159_s23 = smov 0  }
   0x7 LB: > { %4574 = sst [smem:[#allocation5_spill]] %s3077_s18  ;;  %s2509_s24 = sadd.s32 4294967295, %s3097_s23   ;;  %s3097_s23 = sphi %s3159_s23, %s14_s23   ;;  %s3093_s22 = sphi %s3157_s22, %s4652_s22   ;;  %s3089_s21 = sphi %s3155_s21, %s4647_s21   ;;  %s3085_s20 = sphi %s3153_s20, %s4651_s20   ;;  %s3081_s19 = sphi %s3151_s19, %s4646_s19   ;;  %s3077_s18 = sphi %s3149_s18, %s4645_s18   ;;  %s3073_s17 = sphi %s3147_s17, %s4644_s17   ;;  %s3069_s16 = sphi %s3145_s16, %s4650_s16   ;;  %s3065_s15 = sphi %s3143_s15, %s4649_s15  }
   0x8   : > { %4575 = sst [smem:[#allocation6_spill]] %s3089_s21  ;;  %s23_s25 = sadd.s32 1, %s3089_s21 }
   0x9   : > { %p24_p0 = scmp.ge.s32.totalorder %s23_s25, 2  ;;  %s26_s26 = sadd.s32 1, %s3093_s22 }
   0xa   : > { %s35_s27 = sadd.s32 1, %s3077_s18  ;;  %p42_p1 = scmp.ne.s32.totalorder %s3077_s18, %s3073_s17 }
   0xb   : > { %s4654_s25 = smov (%p24_p0, %s23_s25), 0  ;;  %s4656_s26 = smov (!%p24_p0, %s26_s26), %s3093_s22 }
   0xc   : > { %4576 = sst [smem:[#allocation7_spill]] %s4654_s25  ;;  %s31_s28 = ssub.s32 %s3089_s21, %s4654_s25 }
   0xd   : > { %p43_p2 = scmp.eq.s32.totalorder %s3097_s23, 0  ;;  %p28_p3 = scmp.ge.s32.totalorder %s4656_s26, 2 }
   0xe   : > { %s3201_s29 = sshll.u32 %s3089_s21, 1  ;;  %s2629_s6 = sshll.u32 %s4654_s25, 1 }
   0xf   : > { %p3208_p4 = por %p43_p2, %p42_p1  ;;  %s2628_s5 = sadd.s32 2, %s3201_s29 }
  0x10   : > { %s4658_s26 = smov (%p28_p3, %s4656_s26), 0  ;;  %s67_s7 = sadd.s32 1, %s3069_s16 }
  0x11   : > { %4578 = sst [smem:[#allocation8_spill]] %s4658_s26  ;;  %s30_s8 = ssub.s32 %s3093_s22, %s4658_s26 }
  0x12   : > { %s2630_s9 = sadd.s32 2, %s2629_s6  ;;  %s32_s10 = sor.u32 %s31_s28, %s30_s8 }
  0x13   : > { %s63_s11 = ssub.s32 %s2628_s5, %s2630_s9  ;;  %p33_p5 = scmp.eq.s32.totalorder %s32_s10, 0 }
  0x14   : > { %s64_s12 = sor.u32 %s63_s11, %s30_s8  ;;  %p74_p7 = scmp.ne.s32.totalorder %s3069_s16, %s3065_s15 }
  0x15   : > { %p65_p6 = scmp.eq.s32.totalorder %s64_s12, 0  ;;  %p148_p9 = scmp.eq.s32.totalorder %s2509_s24, 3 }
  0x16   : > { %s3222_s13 = scalar_select %p33_p5, %s3077_s18, %s35_s27  }
  0x17   : > { %s3225_s14 = scalar_select %p65_p6, %s3069_s16, %s67_s7  }
  0x18   : > { %4579 = sst [smem:[#allocation9_spill]] %s3222_s13  ;;  %p3229_p8 = por %p74_p7, %p43_p2 }
  0x19   : > { %p3236_p10 = por %p148_p9, %p42_p1  ;;  %p2514_p11 = scmp.ge.s32.totalorder %s3097_s23, 4 }
  0x1b   : > { %176 = sbr.rel (%p2514_p11) target bundleno = 69 (0x45), region = 24 }
  0x22   : > { %179 = sbr.rel (!%p3208_p4) target bundleno = 54 (0x36), region = 28  ;;  %s181_s27 = sand.u32 (%p3208_p4), 1, %s3077_s18  }
  0x23   : > { %s3244_s28 = sshll.u32 (%p3208_p4), %s181_s27, 8  ;;  %s2715_s5 = smul.u32 (%p3208_p4), 80, %s3093_s22 }
  0x24   : > { %s4582_s0 = sld [smem:[#allocation26_spill]] (%p3208_p4)  ;;  %s183_s10 = scalar_lea.vmem (%p3208_p4), [#allocation2], %s3244_s28  }
  0x25   : > { %s191_s24 = sadd.s32 (%p3208_p4), %s2715_s5, %s3201_s29  ;;  %s4583_s30 = smov (%p3208_p4), %s183_s10 }
  0x26   : > { %s2519_s6 = sshll.u32 (%p3208_p4), %s191_s24, 3  ;;  %s3261_s12 = smov (%p3208_p4), 0  }
  0x27   : > { %s3263_s27 = smov (%p3208_p4), 0  }
  0x2a   : > { %s3251_s9 = scalar_lea.vmem %s4582_s0, %s2519_s6  }
  0x2b   : > { %s4584_s11 = smov %s3251_s9 }
  0x2c LB: >> { %v419_v0 = vld [vmem:[%s3105_s11] sm:$0xff]  ;;  %v421_v1 = vld [vmem:[%s3105_s11 + $0x28] sm:$0xff]  ;;  %v423_v2 = vld [vmem:[%s3105_s11 + $0x50] sm:$0xff]  ;;  %s451_s5 = sadd.s32 1, %s3109_s12  ;;  %s413_s27 = sadd.s32 1, %s3113_s27   ;;  %s3113_s27 = sphi %s3263_s27, %s413_s27   ;;  %s3109_s12 = sphi %s3261_s12, %s4585_s12   ;;  %s3105_s11 = sphi %s4584_s11, %s456_s11   ;;  %s3101_s30 = sphi %s4583_s30, %s457_s30  }
  0x2d   : >> { %420 = vst [vmem:[%s3101_s30] sm:$0xff] %v419_v0  ;;  %422 = vst [vmem:[%s3101_s30 + $0x10] sm:$0xff] %v421_v1  ;;  %v425_v3 = vld [vmem:[%s3105_s11 + $0x78] sm:$0xff]  ;;  %v427_v4 = vld [vmem:[%s3105_s11 + $0xa0] sm:$0xff]  ;;  %p452_p12 = scmp.ge.s32.totalorder %s451_s5, 2  ;;  %p412_p13 = scmp.ge.s32.totalorder %s413_s27, 2 }
  0x2e   : >> { %424 = vst [vmem:[%s3101_s30 + $0x20] sm:$0xff] %v423_v2  ;;  %v429_v5 = vld [vmem:[%s3105_s11 + $0xc8] sm:$0xff]  ;;  %426 = vst [vmem:[%s3101_s30 + $0x30] sm:$0xff] %v425_v3  ;;  %v431_v6 = vld [vmem:[%s3105_s11 + $0xf0] sm:$0xff] }
  0x2f   : >> { %428 = vst [vmem:[%s3101_s30 + $0x40] sm:$0xff] %v427_v4  ;;  %430 = vst [vmem:[%s3101_s30 + $0x50] sm:$0xff] %v429_v5  ;;  %v433_v7 = vld [vmem:[%s3105_s11 + $0x118] sm:$0xff]  ;;  %v435_v8 = vld [vmem:[%s3105_s11 + $0x140] sm:$0xff]  ;;  %s4660_s5 = smov (%p452_p12, %s451_s5), 0  ;;  %415 = sbr.rel (!%p412_p13) target bundleno = 44 (0x2c), region = 237 }
  0x30   : >> { %432 = vst [vmem:[%s3101_s30 + $0x60] sm:$0xff] %v431_v6  ;;  %434 = vst [vmem:[%s3101_s30 + $0x70] sm:$0xff] %v433_v7  ;;  %v437_v9 = vld [vmem:[%s3105_s11 + $0x168] sm:$0xff]  ;;  %v439_v10 = vld [vmem:[%s3105_s11 + $0x190] sm:$0xff]  ;;  %s2530_s24 = sshll.u32 %s4660_s5, 3  ;;  %s4585_s12 = smov %s4660_s5 }
  0x31   : >> { %436 = vst [vmem:[%s3101_s30 + $0x80] sm:$0xff] %v435_v8  ;;  %v441_v11 = vld [vmem:[%s3105_s11 + $0x1b8] sm:$0xff]  ;;  %438 = vst [vmem:[%s3101_s30 + $0x90] sm:$0xff] %v437_v9  ;;  %v443_v12 = vld [vmem:[%s3105_s11 + $0x1e0] sm:$0xff] }
  0x32   : >> { %440 = vst [vmem:[%s3101_s30 + $0xa0] sm:$0xff] %v439_v10  ;;  %442 = vst [vmem:[%s3101_s30 + $0xb0] sm:$0xff] %v441_v11  ;;  %v445_v13 = vld [vmem:[%s3105_s11 + $0x208] sm:$0xff]  ;;  %v447_v14 = vld [vmem:[%s3105_s11 + $0x230] sm:$0xff] }
  0x33   : >> { %444 = vst [vmem:[%s3101_s30 + $0xc0] sm:$0xff] %v443_v12  ;;  %446 = vst [vmem:[%s3101_s30 + $0xd0] sm:$0xff] %v445_v13  ;;  %v449_v15 = vld [vmem:[%s3105_s11 + $0x258] sm:$0xff]  ;;  %s456_s11 = scalar_lea.vmem %s3251_s9, %s2530_s24  }
  0x34   : >> { %448 = vst [vmem:[%s3101_s30 + $0xe0] sm:$0xff] %v447_v14  ;;  %450 = vst [vmem:[%s3101_s30 + $0xf0] sm:$0xff] %v449_v15  ;;  %s457_s30 = scalar_lea.vmem %s183_s10, %s2530_s24 [#allocation2]  }
  0x36 PF: > { %717 = sbr.rel (!%p3229_p8) target bundleno = 69 (0x45), region = 94  ;;  %s719_s6 = sand.u32 (%p3229_p8), 1, %s3069_s16  }
  0x37   : > { %s2375_s7 = smul.u32 (%p3229_p8), 80, %s3093_s22  ;;  %s2542_s8 = sshll.u32 (%p3229_p8), %s719_s6, 7 }
  0x38   : > { %s721_s21 = scalar_lea.vmem (%p3229_p8), [#allocation3], %s2542_s8 }
  0x39   : > { %s2376_s24 = sadd.s32 (%p3229_p8), %s3201_s29, %s2375_s7 }
  0x3a   : > { %s2544_s0 = sshll.u32 (%p3229_p8), %s2376_s24, 3 }
  0x3b   : > { %s3327_s18 = scalar_lea.vmem (%p3229_p8), %s4541_s1, %s2544_s0 }
  0x3c   : > { %v2545_v16 = vld [vmem:[%s3327_s18 + $0x10] sm:$0xff] (%p3229_p8)  ;;  %v2546_v17 = vld [vmem:[%s3327_s18 + $0x38] sm:$0xff] (%p3229_p8)  ;;  %v2547_v18 = vld [vmem:[%s3327_s18 + $0x60] sm:$0xff] (%p3229_p8) }
  0x3d   : > { %786 = vst [vmem:[%s721_s21] sm:$0xff] %v2545_v16  ;;  %788 = vst [vmem:[%s721_s21 + $0x8] sm:$0xff] %v2546_v17  ;;  %v2548_v19 = vld [vmem:[%s3327_s18 + $0x88] sm:$0xff]  ;;  %v2549_v20 = vld [vmem:[%s3327_s18 + $0xb0] sm:$0xff] }
  0x3e   : > { %790 = vst [vmem:[%s721_s21 + $0x10] sm:$0xff] %v2547_v18  ;;  %v2550_v21 = vld [vmem:[%s3327_s18 + $0xd8] sm:$0xff]  ;;  %792 = vst [vmem:[%s721_s21 + $0x18] sm:$0xff] %v2548_v19  ;;  %v2551_v22 = vld [vmem:[%s3327_s18 + $0x100] sm:$0xff] }
  0x3f   : > { %794 = vst [vmem:[%s721_s21 + $0x20] sm:$0xff] %v2549_v20  ;;  %796 = vst [vmem:[%s721_s21 + $0x28] sm:$0xff] %v2550_v21  ;;  %v2552_v23 = vld [vmem:[%s3327_s18 + $0x128] sm:$0xff]  ;;  %v2553_v24 = vld [vmem:[%s3327_s18 + $0x150] sm:$0xff] }
  0x40   : > { %798 = vst [vmem:[%s721_s21 + $0x30] sm:$0xff] %v2551_v22  ;;  %800 = vst [vmem:[%s721_s21 + $0x38] sm:$0xff] %v2552_v23  ;;  %v2554_v25 = vld [vmem:[%s3327_s18 + $0x178] sm:$0xff]  ;;  %v2555_v26 = vld [vmem:[%s3327_s18 + $0x1a0] sm:$0xff] }
  0x41   : > { %802 = vst [vmem:[%s721_s21 + $0x40] sm:$0xff] %v2553_v24  ;;  %v2556_v27 = vld [vmem:[%s3327_s18 + $0x1c8] sm:$0xff]  ;;  %804 = vst [vmem:[%s721_s21 + $0x48] sm:$0xff] %v2554_v25  ;;  %v2557_v28 = vld [vmem:[%s3327_s18 + $0x1f0] sm:$0xff] }
  0x42   : > { %806 = vst [vmem:[%s721_s21 + $0x50] sm:$0xff] %v2555_v26  ;;  %808 = vst [vmem:[%s721_s21 + $0x58] sm:$0xff] %v2556_v27  ;;  %v2558_v29 = vld [vmem:[%s3327_s18 + $0x218] sm:$0xff]  ;;  %v2559_v30 = vld [vmem:[%s3327_s18 + $0x240] sm:$0xff] }
  0x43   : > { %810 = vst [vmem:[%s721_s21 + $0x60] sm:$0xff] %v2557_v28  ;;  %812 = vst [vmem:[%s721_s21 + $0x68] sm:$0xff] %v2558_v29  ;;  %v2560_v31 = vld [vmem:[%s3327_s18 + $0x268] sm:$0xff] }
  0x44   : > { %814 = vst [vmem:[%s721_s21 + $0x70] sm:$0xff] %v2559_v30  ;;  %816 = vst [vmem:[%s721_s21 + $0x78] sm:$0xff] %v2560_v31 }
  0x45 PF: > { %p2561_p0 = scmp.ge.s32.totalorder %s3097_s23, 1  ;;  %p821_p1 = scmp.lt.s32.totalorder %s3097_s23, 5 }
  0x47   : > { %p822_p2 = pnand %p2561_p0, %p821_p1 }
  0x49   : > { %825 = sbr.rel (%p822_p2) target bundleno = 588 (0x24c), region = 132 }
  0x50   : > { %s828_s0 = sand.u32 1, %s3073_s17   ;;  %s835_s29 = sand.u32 1, %s3065_s15  }
  0x51   : > { %s3348_s25 = sshll.u32 %s828_s0, 8  ;;  %s2563_s13 = sshll.u32 %s835_s29, 7 }
  0x52   : > { %s3352_s28 = scalar_lea.vmem [#allocation2], %s3348_s25  ;;  %s3372_s15 = scalar_lea.vmem [#allocation3], %s2563_s13 }
  0x53   : > { %v3355_v32 = vld [vmem:[%s3352_s28 + $0x8] sm:$0xff]  ;;  %v3358_v33 = vld [vmem:[%s3352_s28 + $0x18] sm:$0xff]  ;;  %v3361_v34 = vld [vmem:[%s3352_s28] sm:$0xff]  ;;  %s3115_s17 = smov 125   ;;  %s3117_s10 = smov 122  }
  0x54   : > { %vm921_vm0 = vcmp.ge.f32.partialorder %v3355_v32, 0.0  ;;  %vm924_vm1 = vcmp.ge.f32.partialorder %v3358_v33, 0.0  ;;  %v969_v35 = vmul.f32 0.1, %v3355_v32  ;;  %v972_v36 = vmul.f32 0.1, %v3358_v33 }
  0x55   : > { %v3368_v37 = vld [vmem:[%s3352_s28 + $0x10] sm:$0xff]  ;;  %vm920_vm2 = vcmp.ge.f32.partialorder %v3361_v34, 0.0  ;;  %v968_v38 = vmul.f32 0.1, %v3361_v34  ;;  %v3375_v39 = vld [vmem:[%s3372_s15] sm:$0xff]  ;;  %v3378_v40 = vld [vmem:[%s3372_s15 + $0x8] sm:$0xff] }
  0x56   : > { %v1017_v41 = vsel %vm921_vm0, %v3355_v32, %v969_v35  ;;  %v1020_v42 = vsel %vm924_vm1, %v3358_v33, %v972_v36  ;;  %vm923_vm3 = vcmp.ge.f32.partialorder %v3368_v37, 0.0  ;;  %v971_v43 = vmul.f32 0.1, %v3368_v37  ;;  %v3385_v44 = vld [vmem:[%s3352_s28 + $0x28] sm:$0xff]  ;;  %v3388_v45 = vld [vmem:[%s3352_s28 + $0x38] sm:$0xff]  ;;  %v3396_v48 = vld [vmem:[%s3372_s15 + $0x10] sm:$0xff] }
  0x57   : > { %v3390_v46 = vpack.c.bf16 %v1020_v42, %v1017_v41  ;;  %v1016_v47 = vsel %vm920_vm2, %v3361_v34, %v968_v38  ;;  %vm922_vm4 = vcmp.ge.f32.partialorder %v3375_v39, 0.0  ;;  %vm925_vm5 = vcmp.ge.f32.partialorder %v3378_v40, 0.0  ;;  %v3399_v49 = vld [vmem:[%s3372_s15 + $0x18] sm:$0xff]  ;;  %v3406_v53 = vld [vmem:[%s3352_s28 + $0x20] sm:$0xff]  ;;  %v3416_v57 = vld [vmem:[%s3352_s28 + $0x30] sm:$0xff]  ;;  %s4257_s6 = scalar_lea.vmem [#allocation4], %s3348_s25 }
  0x58   : > { %v1019_v50 = vsel %vm923_vm3, %v3368_v37, %v971_v43  ;;  %v970_v51 = vmul.f32 0.1, %v3375_v39  ;;  %v973_v52 = vmul.f32 0.1, %v3378_v40  ;;  %vm927_vm6 = vcmp.ge.f32.partialorder %v3385_v44, 0.0  ;;  %v3428_v60 = vld [vmem:[%s3352_s28 + $0x48] sm:$0xff] }
  0x59   : > { %1195 = vrot.lane.b32.xlu0 %v3390_v46, %s3115_s17  ;;  %v3410_v54 = vpack.c.bf16 %v1019_v50, %v1016_v47  ;;  %vm930_vm7 = vcmp.ge.f32.partialorder %v3388_v45, 0.0  ;;  %v975_v55 = vmul.f32 0.1, %v3385_v44  ;;  %v978_v56 = vmul.f32 0.1, %v3388_v45  ;;  %1435 = vmatprep.subr.bf16.mxu0 %v3390_v46  ;;  %v3440_v1 = vld [vmem:[%s3352_s28 + $0x58] sm:$0xff] }
  0x5a   : > { %v1018_v58 = vsel %vm922_vm4, %v3375_v39, %v970_v51  ;;  %v1021_v59 = vsel %vm925_vm5, %v3378_v40, %v973_v52  ;;  %vm928_vm8 = vcmp.ge.f32.partialorder %v3396_v48, 0.0  ;;  %vm931_vm9 = vcmp.ge.f32.partialorder %v3399_v49, 0.0  ;;  %v3449_v4 = vld [vmem:[%s3372_s15 + $0x20] sm:$0xff]  ;;  %v3460_v8 = vld [vmem:[%s3372_s15 + $0x28] sm:$0xff]  ;;  %v3484_v16 = vld [vmem:[%s3352_s28 + $0x50] sm:$0xff]  ;;  %s2622_s25 = sshll.u32 (%p3236_p10), %s3081_s19, 1 }
  0x5b   : > { %1193 = vrot.lane.b32.xlu1 %v3410_v54, %s3115_s17  ;;  %v3432_v61 = vpack.c.bf16 %v1021_v59, %v1018_v58  ;;  %v1023_v62 = vsel %vm927_vm6, %v3385_v44, %v975_v55  ;;  %v1026_v63 = vsel %vm930_vm7, %v3388_v45, %v978_v56  ;;  %v976_v0 = vmul.f32 0.1, %v3396_v48  ;;  %1436 = vmatpush1.bf16.msra.mxu0 %v3410_v54  ;;  %v3469_v12 = vld [vmem:[%s3352_s28 + $0x40] sm:$0xff]  ;;  %v3487_v17 = vld [vmem:[%s3352_s28 + $0x68] sm:$0xff]  ;;  %v3497_v21 = vld [vmem:[%s3352_s28 + $0x78] sm:$0xff]  ;;  %s2623_s7 = sshll.u32 (%p3236_p10), %s3085_s20, 6 }
  0x5c   : > { %v3443_v2 = vpack.c.bf16 %v1026_v63, %v1023_v62  ;;  %v979_v3 = vmul.f32 0.1, %v3399_v49  ;;  %vm926_vm10 = vcmp.ge.f32.partialorder %v3406_v53, 0.0  ;;  %vm929_vm11 = vcmp.ge.f32.partialorder %v3416_v57, 0.0  ;;  %v3500_v22 = vld [vmem:[%s3372_s15 + $0x30] sm:$0xff]  ;;  %v3510_v26 = vld [vmem:[%s3372_s15 + $0x38] sm:$0xff]  ;;  %s2249_s26 = sadd.s32 (%p3236_p10), %s2623_s7, %s2622_s25 }
  0x5d   : > { %1197 = vrot.lane.b32.xlu0 %v3432_v61, %s3115_s17  ;;  %v1024_v5 = vsel %vm928_vm8, %v3396_v48, %v976_v0  ;;  %v974_v6 = vmul.f32 0.1, %v3406_v53  ;;  %v977_v7 = vmul.f32 0.1, %v3416_v57  ;;  %vm933_vm12 = vcmp.ge.f32.partialorder %v3428_v60, 0.0  ;;  %v3528_v35 = vld [vmem:[%s3352_s28 + $0x60] sm:$0xff] }
  0x5e   : > { %v1027_v9 = vsel %vm931_vm9, %v3399_v49, %v979_v3  ;;  %vm936_vm13 = vcmp.ge.f32.partialorder %v3440_v1, 0.0  ;;  %v981_v10 = vmul.f32 0.1, %v3428_v60  ;;  %v984_v11 = vmul.f32 0.1, %v3440_v1  ;;  %1437 = vmatprep.subr.bf16.mxu0 %v3443_v2  ;;  %v3537_v43 = vld [vmem:[%s3352_s28 + $0x70] sm:$0xff] }
  0x5f   : > { %1201 = vrot.lane.b32.xlu1 %v3443_v2, %s3115_s17  ;;  %v3474_v13 = vpack.c.bf16 %v1027_v9, %v1024_v5  ;;  %v1022_v14 = vsel %vm926_vm10, %v3406_v53, %v974_v6  ;;  %v1025_v15 = vsel %vm929_vm11, %v3416_v57, %v977_v7  ;;  %vm934_vm14 = vcmp.ge.f32.partialorder %v3449_v4, 0.0  ;;  %v3549_v51 = vld [vmem:[%s3352_s28 + $0x88] sm:$0xff]  ;;  %v3552_v52 = vld [vmem:[%s3352_s28 + $0x98] sm:$0xff]  ;;  %v3561_v59 = vld [vmem:[%s3372_s15 + $0x40] sm:$0xff]  ;;  %s2624_s8 = sshll.u32 (%p3236_p10), %s2249_s26, 3 }
  0x60   : > { %v3489_v18 = vpack.c.bf16 %v1025_v15, %v1022_v14  ;;  %v1029_v19 = vsel %vm933_vm12, %v3428_v60, %v981_v10  ;;  %v1032_v20 = vsel %vm936_vm13, %v3440_v1, %v984_v11  ;;  %vm937_vm15 = vcmp.ge.f32.partialorder %v3460_v8, 0.0  ;;  %4586 = vst [vmem:[#allocation10_spill] sm:$0xff] %v3552_v52  ;;  %4587 = vst [vmem:[#allocation11_spill] sm:$0xff] %v3561_v59  ;;  %v3571_v3 = vld [vmem:[%s3372_s15 + $0x48] sm:$0xff]  ;;  %v3583_v7 = vld [vmem:[%s3352_s28 + $0x80] sm:$0xff]  ;;  %s4456_s0 = scalar_lea.vmem (%p3236_p10), %s4544_s4, %s2624_s8 }
  0x61   : > { %1203 = vrot.lane.b32.xlu0 %v3474_v13, %s3115_s17  ;;  %v3504_v23 = vpack.c.bf16 %v1032_v20, %v1029_v19  ;;  %v982_v24 = vmul.f32 0.1, %v3449_v4  ;;  %v985_v25 = vmul.f32 0.1, %v3460_v8  ;;  %vm932_vm0 = vcmp.ge.f32.partialorder %v3469_v12, 0.0  ;;  %4588 = vst [vmem:[#allocation12_spill] sm:$0xff] %v3571_v3 }
  0x62   : > { %vm935_vm1 = vcmp.ge.f32.partialorder %v3484_v16, 0.0  ;;  %v980_v27 = vmul.f32 0.1, %v3469_v12  ;;  %v983_v28 = vmul.f32 0.1, %v3484_v16  ;;  %vm939_vm2 = vcmp.ge.f32.partialorder %v3487_v17, 0.0  ;;  %1438 = vmatpush1.bf16.msra.mxu0 %v3489_v18 }
  0x63   : > { %1199 = vrot.lane.b32.xlu1 %v3489_v18, %s3115_s17  ;;  %v1030_v29 = vsel %vm934_vm14, %v3449_v4, %v982_v24  ;;  %v1033_v30 = vsel %vm937_vm15, %v3460_v8, %v985_v25  ;;  %vm942_vm3 = vcmp.ge.f32.partialorder %v3497_v21, 0.0  ;;  %v987_v31 = vmul.f32 0.1, %v3487_v17  ;;  %1439 = vmatprep.subr.bf16.mxu0 %v3504_v23  ;;  %v3595_v15 = vld [vmem:[%s3352_s28 + $0x90] sm:$0xff]  ;;  %v3598_v19 = vld [vmem:[%s3352_s28 + $0xa8] sm:$0xff]  ;;  %v3601_v20 = vld [vmem:[%s3352_s28 + $0xb8] sm:$0xff] }
  0x64   : > { %v3531_v36 = vpack.c.bf16 %v1033_v30, %v1030_v29  ;;  %v1028_v38 = vsel %vm932_vm0, %v3469_v12, %v980_v27  ;;  %v1031_v41 = vsel %vm935_vm1, %v3484_v16, %v983_v28  ;;  %v990_v42 = vmul.f32 0.1, %v3497_v21  ;;  %4589 = vst [vmem:[#allocation13_spill] sm:$0xff] %v3598_v19  ;;  %4590 = vst [vmem:[#allocation14_spill] sm:$0xff] %v3601_v20  ;;  %v3610_v27 = vld [vmem:[%s3372_s15 + $0x50] sm:$0xff] }
  0x65   : > { %1207 = vrot.lane.b32.xlu0 %v3504_v23, %s3115_s17  ;;  %v3541_v47 = vpack.c.bf16 %v1031_v41, %v1028_v38  ;;  %v1035_v50 = vsel %vm939_vm2, %v3487_v17, %v987_v31  ;;  %vm940_vm4 = vcmp.ge.f32.partialorder %v3500_v22, 0.0  ;;  %vm943_vm5 = vcmp.ge.f32.partialorder %v3510_v26, 0.0  ;;  %4591 = vst [vmem:[#allocation15_spill] sm:$0xff] %v3610_v27  ;;  %v3621_v31 = vld [vmem:[%s3372_s15 + $0x58] sm:$0xff] }
  0x66   : > { %v1038_v55 = vsel %vm942_vm3, %v3497_v21, %v990_v42  ;;  %v988_v56 = vmul.f32 0.1, %v3500_v22  ;;  %v991_v58 = vmul.f32 0.1, %v3510_v26  ;;  %vm938_vm6 = vcmp.ge.f32.partialorder %v3528_v35, 0.0  ;;  %4592 = vst [vmem:[#allocation16_spill] sm:$0xff] %v3621_v31 }
  0x67   : > { %1209 = vrot.lane.b32.xlu1 %v3531_v36, %s3115_s17  ;;  %v3565_v62 = vpack.c.bf16 %v1038_v55, %v1035_v50  ;;  %vm941_vm7 = vcmp.ge.f32.partialorder %v3537_v43, 0.0  ;;  %v986_v63 = vmul.f32 0.1, %v3528_v35  ;;  %v989_v0 = vmul.f32 0.1, %v3537_v43  ;;  %1440 = vmatpush1.bf16.msra.mxu0 %v3541_v47  ;;  %v3630_v50 = vld [vmem:[%s3352_s28 + $0xa0] sm:$0xff] }
  0x68   : > { %v1036_v5 = vsel %vm940_vm4, %v3500_v22, %v988_v56  ;;  %v1039_v6 = vsel %vm943_vm5, %v3510_v26, %v991_v58  ;;  %vm945_vm8 = vcmp.ge.f32.partialorder %v3549_v51, 0.0  ;;  %vm948_vm9 = vcmp.ge.f32.partialorder %v3552_v52, 0.0  ;;  %4593 = vst [vmem:[#allocation17_spill] sm:$0xff] %v3630_v50 }
  0x69   : > { %1205 = vrot.lane.b32.xlu0 %v3541_v47, %s3115_s17  ;;  %v3587_v9 = vpack.c.bf16 %v1039_v6, %v1036_v5  ;;  %v1034_v10 = vsel %vm938_vm6, %v3528_v35, %v986_v63  ;;  %v1037_v11 = vsel %vm941_vm7, %v3537_v43, %v989_v0  ;;  %v993_v14 = vmul.f32 0.1, %v3549_v51  ;;  %1441 = vmatprep.subr.bf16.mxu0 %v3565_v62  ;;  %v3645_v63 = vld [vmem:[%s3352_s28 + $0xb0] sm:$0xff] }
  0x6a   : > { %v3604_v24 = vpack.c.bf16 %v1037_v11, %v1034_v10  ;;  %v996_v25 = vmul.f32 0.1, %v3552_v52  ;;  %vm946_vm10 = vcmp.ge.f32.partialorder %v3561_v59, 0.0  ;;  %vm949_vm11 = vcmp.ge.f32.partialorder %v3571_v3, 0.0  ;;  %4594 = vst [vmem:[#allocation18_spill] sm:$0xff] %v3645_v63  ;;  %v3653_v10 = vld [vmem:[%s3352_s28 + $0xc8] sm:$0xff] }
  0x6b   : > { %1213 = vrot.lane.b32.xlu1 %v3565_v62, %s3115_s17  ;;  %v1041_v28 = vsel %vm945_vm8, %v3549_v51, %v993_v14  ;;  %v994_v29 = vmul.f32 0.1, %v3561_v59  ;;  %v997_v30 = vmul.f32 0.1, %v3571_v3  ;;  %vm944_vm12 = vcmp.ge.f32.partialorder %v3583_v7, 0.0  ;;  %4595 = vst [vmem:[#allocation19_spill] sm:$0xff] %v3653_v10 }
  0x6c   : > { %v1044_v38 = vsel %vm948_vm9, %v3552_v52, %v996_v25  ;;  %vm947_vm13 = vcmp.ge.f32.partialorder %v3595_v15, 0.0  ;;  %v992_v41 = vmul.f32 0.1, %v3583_v7  ;;  %v995_v42 = vmul.f32 0.1, %v3595_v15  ;;  %1442 = vmatpush1.bf16.msra.mxu0 %v3604_v24  ;;  %v3656_v11 = vld [vmem:[%s3352_s28 + $0xd8] sm:$0xff] }
  0x6d   : > { %1215 = vrot.lane.b32.xlu0 %v3587_v9, %s3115_s17  ;;  %v3635_v55 = vpack.c.bf16 %v1044_v38, %v1041_v28  ;;  %v1042_v56 = vsel %vm946_vm10, %v3561_v59, %v994_v29  ;;  %v1045_v58 = vsel %vm949_vm11, %v3571_v3, %v997_v30  ;;  %vm951_vm14 = vcmp.ge.f32.partialorder %v3598_v19, 0.0  ;;  %4596 = vst [vmem:[#allocation20_spill] sm:$0xff] %v3656_v11  ;;  %v3666_v29 = vld [vmem:[%s3372_s15 + $0x60] sm:$0xff] }
  0x6e   : > { %v3647_v0 = vpack.c.bf16 %v1045_v58, %v1042_v56  ;;  %v1040_v5 = vsel %vm944_vm12, %v3583_v7, %v992_v41  ;;  %v1043_v6 = vsel %vm947_vm13, %v3595_v15, %v995_v42  ;;  %vm954_vm15 = vcmp.ge.f32.partialorder %v3601_v20, 0.0  ;;  %4597 = vst [vmem:[#allocation21_spill] sm:$0xff] %v3666_v29  ;;  %v3674_v41 = vld [vmem:[%s3372_s15 + $0x68] sm:$0xff] }
  0x6f   : > { %1211 = vrot.lane.b32.xlu1 %v3604_v24, %s3115_s17  ;;  %v3660_v14 = vpack.c.bf16 %v1043_v6, %v1040_v5  ;;  %v999_v25 = vmul.f32 0.1, %v3598_v19  ;;  %v1002_v28 = vmul.f32 0.1, %v3601_v20  ;;  %vm952_vm0 = vcmp.ge.f32.partialorder %v3610_v27, 0.0  ;;  %1443 = vmatprep.subr.bf16.mxu0 %v3635_v55  ;;  %4598 = vst [vmem:[#allocation22_spill] sm:$0xff] %v3674_v41 }
  0x70   : > { %vm955_vm1 = vcmp.ge.f32.partialorder %v3621_v31, 0.0  ;;  %v1000_v30 = vmul.f32 0.1, %v3610_v27  ;;  %v1003_v38 = vmul.f32 0.1, %v3621_v31  ;;  %vm950_vm2 = vcmp.ge.f32.partialorder %v3630_v50, 0.0 }
  0x71   : > { %1219 = vrot.lane.b32.xlu0 %v3635_v55, %s3115_s17  ;;  %v1047_v42 = vsel %vm951_vm14, %v3598_v19, %v999_v25  ;;  %v1050_v56 = vsel %vm954_vm15, %v3601_v20, %v1002_v28  ;;  %vm953_vm3 = vcmp.ge.f32.partialorder %v3645_v63, 0.0  ;;  %v998_v58 = vmul.f32 0.1, %v3630_v50  ;;  %v3687_v5 = vld [vmem:[%s3352_s28 + $0xc0] sm:$0xff]  ;;  %v3690_v6 = vld [vmem:[%s3352_s28 + $0xd0] sm:$0xff]  ;;  %1444 = vmatpush1.bf16.msra.mxu0 %v3660_v14 }
  0x72   : > { %4599 = vst [vmem:[#allocation23_spill] sm:$0xff] %v3687_v5  ;;  %v3693_v52 = vpack.c.bf16 %v1050_v56, %v1047_v42  ;;  %v1048_v25 = vsel %vm952_vm0, %v3610_v27, %v1000_v30  ;;  %v1051_v19 = vsel %vm955_vm1, %v3621_v31, %v1003_v38  ;;  %v1001_v28 = vmul.f32 0.1, %v3645_v63  ;;  %v3710_v30 = vld [vmem:[%s3352_s28 + $0xe8] sm:$0xff]  ;;  %v3728_v31 = vld [vmem:[%s3372_s15 + $0x70] sm:$0xff]  ;;  %v3731_v27 = vld [vmem:[%s3372_s15 + $0x78] sm:$0xff] }
  0x73   : > { %1221 = vrot.lane.b32.xlu1 %v3647_v0, %s3115_s17  ;;  %v3702_v20 = vpack.c.bf16 %v1051_v19, %v1048_v25  ;;  %v1046_v3 = vsel %vm950_vm2, %v3630_v50, %v998_v58  ;;  %vm957_vm4 = vcmp.ge.f32.partialorder %v3653_v10, 0.0  ;;  %vm960_vm5 = vcmp.ge.f32.partialorder %v3656_v11, 0.0  ;;  %4600 = vst [vmem:[#allocation24_spill] sm:$0xff] %v3710_v30  ;;  %v3717_v19 = vld [vmem:[%s3352_s28 + $0xf8] sm:$0xff] }
  0x74   : > { %v1049_v38 = vsel %vm953_vm3, %v3645_v63, %v1001_v28  ;;  %v1005_v42 = vmul.f32 0.1, %v3653_v10  ;;  %v1008_v56 = vmul.f32 0.1, %v3656_v11  ;;  %vm958_vm6 = vcmp.ge.f32.partialorder %v3666_v29, 0.0  ;;  %4601 = vst [vmem:[#allocation25_spill] sm:$0xff] %v3717_v19  ;;  %1445 = vmatprep.subr.bf16.mxu0 %v3693_v52 }
  0x75   : > { %1217 = vrot.lane.b32.xlu0 %v3660_v14, %s3115_s17  ;;  %v3722_v58 = vpack.c.bf16 %v1049_v38, %v1046_v3  ;;  %vm961_vm7 = vcmp.ge.f32.partialorder %v3674_v41, 0.0  ;;  %v1006_v25 = vmul.f32 0.1, %v3666_v29  ;;  %v1009_v28 = vmul.f32 0.1, %v3674_v41 }
  0x76   : > { %v1053_v63 = vsel %vm957_vm4, %v3653_v10, %v1005_v42  ;;  %v1056_v50 = vsel %vm960_vm5, %v3656_v11, %v1008_v56  ;;  %vm956_vm8 = vcmp.ge.f32.partialorder %v3687_v5, 0.0  ;;  %vm959_vm9 = vcmp.ge.f32.partialorder %v3690_v6, 0.0  ;;  %v3762_v11 = vld [vmem:[%s3352_s28 + $0xe0] sm:$0xff] }
  0x77   : > { %1225 = vrot.lane.b32.xlu1 %v3693_v52, %s3115_s17  ;;  %v3743_v3 = vpack.c.bf16 %v1056_v50, %v1053_v63  ;;  %v1054_v38 = vsel %vm958_vm6, %v3666_v29, %v1006_v25  ;;  %v1057_v42 = vsel %vm961_vm7, %v3674_v41, %v1009_v28  ;;  %v1004_v10 = vmul.f32 0.1, %v3687_v5  ;;  %1446 = vmatpush1.bf16.msra.mxu0 %v3722_v58  ;;  %v3765_v41 = vld [vmem:[%s3352_s28 + $0xf0] sm:$0xff] }
  0x78   : > { %v1007_v56 = vmul.f32 0.1, %v3690_v6  ;;  %vm963_vm10 = vcmp.ge.f32.partialorder %v3710_v30, 0.0  ;;  %vm966_vm11 = vcmp.ge.f32.partialorder %v3717_v19, 0.0  ;;  %v3756_v50 = vpack.c.bf16 %v1057_v42, %v1054_v38 }
  0x79   : > { %1227 = vrot.lane.b32.xlu0 %v3702_v20, %s3115_s17  ;;  %v1052_v63 = vsel %vm956_vm8, %v3687_v5, %v1004_v10  ;;  %v1011_v25 = vmul.f32 0.1, %v3710_v30  ;;  %v1014_v28 = vmul.f32 0.1, %v3717_v19  ;;  %1447 = vmatprep.subr.bf16.mxu0 %v3743_v3  ;;  %vm964_vm12 = vcmp.ge.f32.partialorder %v3728_v31, 0.0 }
  0x7a   : > { %v1055_v29 = vsel %vm959_vm9, %v3690_v6, %v1007_v56  ;;  %v1012_v38 = vmul.f32 0.1, %v3728_v31  ;;  %v1015_v10 = vmul.f32 0.1, %v3731_v27  ;;  %vm967_vm13 = vcmp.ge.f32.partialorder %v3731_v27, 0.0 }
  0x7b   : > { %1223 = vrot.lane.b32.xlu1 %v3722_v58, %s3115_s17  ;;  %v3776_v42 = vpack.c.bf16 %v1055_v29, %v1052_v63  ;;  %v1059_v5 = vsel %vm963_vm10, %v3710_v30, %v1011_v25  ;;  %v1062_v59 = vsel %vm966_vm11, %v3717_v19, %v1014_v28  ;;  %vm962_vm14 = vcmp.ge.f32.partialorder %v3762_v11, 0.0 }
  0x7c   : > { %v3785_v56 = vpack.c.bf16 %v1062_v59, %v1059_v5  ;;  %vm965_vm15 = vcmp.ge.f32.partialorder %v3765_v41, 0.0  ;;  %v1010_v29 = vmul.f32 0.1, %v3762_v11  ;;  %v1013_v63 = vmul.f32 0.1, %v3765_v41 }
  0x7d   : > { %1231 = vrot.lane.b32.xlu0 %v3743_v3, %s3115_s17  ;;  %1448 = vmatpush1.bf16.msra.mxu0 %v3776_v42  ;;  %v1060_v25 = vsel %vm964_vm12, %v3728_v31, %v1012_v38  ;;  %v1063_v28 = vsel %vm967_vm13, %v3731_v27, %v1015_v10  ;;  %v3116_v59 = vmov 0   ;;  %v2924_v10 = vld [vmem:[%s4542_s2] sm:$0xff]   ;;  %vm1241_vm0 = vcmask 1022976  }
  0x7e   : > { %1449 = vmatprep.subr.bf16.mxu0 %v3785_v56  ;;  %1306 = vmatprep.mubr.bf16.mxu1 %v3116_v59  ;;  %v1058_v5 = vsel %vm962_vm14, %v3762_v11, %v1010_v29  ;;  %v1061_v19 = vsel %vm965_vm15, %v3765_v41, %v1013_v63  ;;  %v1103_v38 = vpack.c.bf16 %v1063_v28, %v1060_v25  ;;  %v1843_v29 = vld [vmem:[%s4543_s3 + $0x20] sm:$0xff]  ;;  %v1846_v63 = vld [vmem:[%s4543_s3 + $0x38] sm:$0xff]  ;;  %v1845_v25 = vld [vmem:[%s4543_s3 + $0x30] sm:$0xff]  ;;  %vm1661_vm1 = vcmask 998400  }
  0x7f   : > { %1233 = vrot.lane.b32.xlu1 %v3756_v50, %s3115_s17  ;;  %1467 = vmatprep.mubr.bf16.mxu0 %v3116_v59  ;;  %v3803_v30 = vpack.c.bf16 %v1061_v19, %v1058_v5  ;;  %v2928_v19 = vld [vmem:[%s4542_s2 + $0x8] sm:$0xff]   ;;  %v1847_v5 = vld [vmem:[%s4543_s3 + $0x40] sm:$0xff] }
  0x80   : > { %2922 = vset.pattern.permute.xlu1 %v3116_v59  ;;  %2921 = vset.pattern.permute.xlu0 %v3116_v59  ;;  %v1848_v28 = vld [vmem:[%s4543_s3 + $0x48] sm:$0xff] }
  0x81   : > { %1229 = vrot.lane.b32.xlu0 %v3776_v42, %s3115_s17  ;;  %1450 = vmatpush1.bf16.msra.mxu0 %v3803_v30 }
  0x83   : > { %1237 = vrot.lane.b32.xlu1 %v3785_v56, %s3115_s17 }
  0x84   : > { %1468 = vmatmul.mubr.bf16.vlgmr.msra.gmra.mrb[0].mxu0 %v2924_v10 }
  0x85   : > { %1239 = vrot.lane.b32.xlu0 %v1103_v38, %s3115_s17  ;;  %1477 = vmatprep.mubr.bf16.mxu0 %v3116_v59 }
  0x87   : > { %1235 = vrot.lane.b32.xlu1 %v3803_v30, %s3115_s17 }
  0x89   : > { %1615 = vrot.lane.b32.xlu0 %v3390_v46, %s3117_s10 }
  0x8b   : > { %1617 = vrot.lane.b32.xlu1 %v3432_v61, %s3117_s10  ;;  %v2930_v61 = vld [vmem:[%s4542_s2 + $0x10] sm:$0xff]  }
  0x8c   : > { %1478 = vmatmul.mubr.bf16.gmra.mrb[4].mxu0 %v2928_v19  ;;  %v1849_v19 = vld [vmem:[%s4543_s3 + $0x50] sm:$0xff] }
  0x8d   : > { %1613 = vrot.lane.b32.xlu0 %v3410_v54, %s3117_s10  ;;  %1487 = vmatprep.mubr.bf16.mxu0 %v3116_v59 }
  0x8f   : > { %1621 = vrot.lane.b32.xlu1 %v3443_v2, %s3117_s10 }
  0x91   : > { %1623 = vrot.lane.b32.xlu0 %v3474_v13, %s3117_s10  ;;  %v2932_v13 = vld [vmem:[%s4542_s2 + $0x18] sm:$0xff]  }
  0x93   : > { %1619 = vrot.lane.b32.xlu1 %v3489_v18, %s3117_s10 }
  0x94   : > { %1488 = vmatmul.mubr.bf16.gmra.mrb[8].mxu0 %v2930_v61 }
  0x95   : > { %1627 = vrot.lane.b32.xlu0 %v3504_v23, %s3117_s10  ;;  %1497 = vmatprep.mubr.bf16.mxu0 %v3116_v59 }
  0x97   : > { %1629 = vrot.lane.b32.xlu1 %v3531_v36, %s3117_s10  ;;  %v1839_v36 = vld [vmem:[%s4543_s3] sm:$0xff] }
  0x99   : > { %1625 = vrot.lane.b32.xlu0 %v3541_v47, %s3117_s10 }
  0x9b   : > { %1633 = vrot.lane.b32.xlu1 %v3565_v62, %s3117_s10 }
  0x9c   : > { %1498 = vmatmul.mubr.bf16.gmra.mrb[12].mxu0 %v2932_v13  ;;  %v1852_v13 = vld [vmem:[%s4543_s3 + $0x68] sm:$0xff] }
  0x9d   : > { %1635 = vrot.lane.b32.xlu0 %v3587_v9, %s3117_s10  ;;  %1726 = vmatprep.mubr.bf16.mxu0 %v3116_v59  ;;  %v1840_v9 = vld [vmem:[%s4543_s3 + $0x8] sm:$0xff] }
  0x9f   : > { %1631 = vrot.lane.b32.xlu1 %v3604_v24, %s3117_s10 }
  0xa1   : > { %1639 = vrot.lane.b32.xlu0 %v3635_v55, %s3117_s10 }
  0xa3   : > { %1641 = vrot.lane.b32.xlu1 %v3647_v0, %s3117_s10  ;;  %v1841_v0 = vld [vmem:[%s4543_s3 + $0x10] sm:$0xff] }
  0xa5   : > { %1637 = vrot.lane.b32.xlu0 %v3660_v14, %s3117_s10 }
  0xa7   : > { %1645 = vrot.lane.b32.xlu1 %v3693_v52, %s3117_s10 }
  0xa9   : > { %1647 = vrot.lane.b32.xlu0 %v3702_v20, %s3117_s10  ;;  %v1842_v20 = vld [vmem:[%s4543_s3 + $0x18] sm:$0xff] }
  0xab   : > { %1643 = vrot.lane.b32.xlu1 %v3722_v58, %s3117_s10 }
  0xad   : > { %1651 = vrot.lane.b32.xlu0 %v3743_v3, %s3117_s10 }
  0xaf   : > { %1653 = vrot.lane.b32.xlu1 %v3756_v50, %s3117_s10  ;;  %v1844_v50 = vld [vmem:[%s4543_s3 + $0x28] sm:$0xff] }
  0xb1   : > { %1649 = vrot.lane.b32.xlu0 %v3776_v42, %s3117_s10 }
  0xb3   : > { %1657 = vrot.lane.b32.xlu1 %v3785_v56, %s3117_s10 }
  0xb5   : > { %1659 = vrot.lane.b32.xlu0 %v1103_v38, %s3117_s10  ;;  %v1850_v38 = vld [vmem:[%s4543_s3 + $0x58] sm:$0xff] }
  0xb7   : > { %1655 = vrot.lane.b32.xlu1 %v3803_v30, %s3117_s10 }
  0xb9   : > { %1857 = vperm.xlu0 %2921, %v1839_v36  }
  0xbb   : > { %1862 = vperm.xlu1 %2922, %v1840_v9  }
  0xbd   : > { %1872 = vperm.xlu0 %2921, %v1842_v20   ;;  %v1851_v20 = vld [vmem:[%s4543_s3 + $0x60] sm:$0xff] }
  0xbf   : > { %1867 = vperm.xlu1 %2922, %v1841_v0  }
  0xc1   : > { %1882 = vperm.xlu0 %2921, %v1844_v50  }
  0xc3   : > { %1877 = vperm.xlu1 %2922, %v1843_v29   ;;  %v1854_v29 = vld [vmem:[%s4543_s3 + $0x78] sm:$0xff] }
  0xc5   : > { %1892 = vperm.xlu0 %2921, %v1846_v63  }
  0xc7   : > { %1887 = vperm.xlu1 %2922, %v1845_v25  }
  0xc9   : > { %1902 = vperm.xlu0 %2921, %v1848_v28   ;;  %v1853_v28 = vld [vmem:[%s4543_s3 + $0x70] sm:$0xff] }
  0xcb   : > { %v1196_v10 = vpop.permute.xlu0 %1195  ;;  %1897 = vperm.xlu1 %2922, %v1847_v5  }
  0xcd   : > { %v1194_v61 = vpop.permute.xlu1 %1193  ;;  %1912 = vperm.xlu0 %2921, %v1850_v38  }
  0xce   : > { %v1242_v50 = vsel %vm1241_vm0, %v1194_v61, %v1196_v10 }
  0xcf   : > { %v1198_v36 = vpop.permute.xlu0 %1197  ;;  %1907 = vperm.xlu1 %2922, %v1849_v19  }
  0xd0   : > { %v1243_v9 = vsel %vm1241_vm0, %v1196_v10, %v1198_v36 }
  0xd1   : > { %v1202_v0 = vpop.permute.xlu1 %1201  ;;  %1274 = vmatprep.subr.bf16.mxu1 %v1243_v9  ;;  %1922 = vperm.xlu0 %2921, %v1852_v13  }
  0xd2   : > { %1275 = vmatpush1.bf16.msra.mxu1 %v1242_v50 }
  0xd3   : > { %v1204_v63 = vpop.permute.xlu0 %1203  ;;  %1917 = vperm.xlu1 %2922, %v1851_v20  }
  0xd4   : > { %v1245_v25 = vsel %vm1241_vm0, %v1202_v0, %v1204_v63 }
  0xd5   : > { %v1200_v5 = vpop.permute.xlu1 %1199  ;;  %1276 = vmatprep.subr.bf16.mxu1 %v1245_v25  ;;  %1932 = vperm.xlu0 %2921, %v1854_v29  }
  0xd6   : > { %v1244_v38 = vsel %vm1241_vm0, %v1200_v5, %v1202_v0 }
  0xd7   : > { %1277 = vmatpush1.bf16.msra.mxu1 %v1244_v38  ;;  %v1208_v10 = vpop.permute.xlu0 %1207  ;;  %1927 = vperm.xlu1 %2922, %v1853_v28  }
  0xd9   : > { %v1210_v19 = vpop.permute.xlu1 %1209  ;;  %2017 = vrot.lane.b32.xlu0 %v3355_v32, %s3115_s17 }
  0xda   : > { %v1247_v61 = vsel %vm1241_vm0, %v1208_v10, %v1210_v19  ;;  %v2923_v19 = vld [vmem:[%s4542_s2 + $0x40] sm:$0xff]  }
  0xdb   : > { %1278 = vmatprep.subr.bf16.mxu1 %v1247_v61  ;;  %v1206_v13 = vpop.permute.xlu0 %1205  ;;  %2015 = vrot.lane.b32.xlu1 %v3361_v34, %s3115_s17 }
  0xdc   : > { %v1246_v36 = vsel %vm1241_vm0, %v1206_v13, %v1208_v10 }
  0xdd   : > { %v1214_v9 = vpop.permute.xlu1 %1213  ;;  %1279 = vmatpush1.bf16.msra.mxu1 %v1246_v36  ;;  %2021 = vrot.lane.b32.xlu0 %v3368_v37, %s3115_s17 }
  0xdf   : > { %v1216_v20 = vpop.permute.xlu0 %1215  ;;  %2019 = vrot.lane.b32.xlu1 %v3375_v39, %s3115_s17 }
  0xe0   : > { %v1249_v32 = vsel %vm1241_vm0, %v1214_v9, %v1216_v20 }
  0xe1   : > { %v1212_v0 = vpop.permute.xlu1 %1211  ;;  %1280 = vmatprep.subr.bf16.mxu1 %v1249_v32  ;;  %2025 = vrot.lane.b32.xlu0 %v3378_v40, %s3115_s17  ;;  %v4605_v32 = vld [vmem:[#allocation13_spill] sm:$0xff] }
  0xe2   : > { %v1248_v34 = vsel %vm1241_vm0, %v1212_v0, %v1214_v9 }
  0xe3   : > { %1281 = vmatpush1.bf16.msra.mxu1 %v1248_v34  ;;  %v1220_v50 = vpop.permute.xlu0 %1219  ;;  %2023 = vrot.lane.b32.xlu1 %v3358_v33, %s3115_s17 }
  0xe5   : > { %v1222_v29 = vpop.permute.xlu1 %1221  ;;  %2029 = vrot.lane.b32.xlu0 %v3385_v44, %s3115_s17 }
  0xe6   : > { %v1251_v37 = vsel %vm1241_vm0, %v1220_v50, %v1222_v29  ;;  %v4607_v29 = vld [vmem:[#allocation18_spill] sm:$0xff] }
  0xe7   : > { %1282 = vmatprep.subr.bf16.mxu1 %v1251_v37  ;;  %v1218_v39 = vpop.permute.xlu0 %1217  ;;  %2027 = vrot.lane.b32.xlu1 %v3406_v53, %s3115_s17 }
  0xe8   : > { %v1250_v40 = vsel %vm1241_vm0, %v1218_v39, %v1220_v50 }
  0xe9   : > { %v1226_v63 = vpop.permute.xlu1 %1225  ;;  %1283 = vmatpush1.bf16.msra.mxu1 %v1250_v40  ;;  %2033 = vrot.lane.b32.xlu0 %v3416_v57, %s3115_s17 }
  0xeb   : > { %v1228_v25 = vpop.permute.xlu0 %1227  ;;  %2031 = vrot.lane.b32.xlu1 %v3396_v48, %s3115_s17 }
  0xec   : > { %v1253_v33 = vsel %vm1241_vm0, %v1226_v63, %v1228_v25 }
  0xed   : > { %v1224_v44 = vpop.permute.xlu1 %1223  ;;  %1284 = vmatprep.subr.bf16.mxu1 %v1253_v33  ;;  %2037 = vrot.lane.b32.xlu0 %v3399_v49, %s3115_s17  ;;  %v4610_v33 = vld [vmem:[#allocation14_spill] sm:$0xff] }
  0xee   : > { %v1252_v53 = vsel %vm1241_vm0, %v1224_v44, %v1226_v63 }
  0xef   : > { %1285 = vmatpush1.bf16.msra.mxu1 %v1252_v53  ;;  %v1232_v28 = vpop.permute.xlu0 %1231  ;;  %2035 = vrot.lane.b32.xlu1 %v3388_v45, %s3115_s17  ;;  %v2931_v53 = vld [vmem:[%s4542_s2 + $0x68] sm:$0xff]  }
  0xf1   : > { %v1234_v5 = vpop.permute.xlu1 %1233  ;;  %2041 = vrot.lane.b32.xlu0 %v3428_v60, %s3115_s17 }
  0xf2   : > { %v1255_v48 = vsel %vm1241_vm0, %v1232_v28, %v1234_v5 }
  0xf3   : > { %1286 = vmatprep.subr.bf16.mxu1 %v1255_v48  ;;  %v1230_v57 = vpop.permute.xlu0 %1229  ;;  %2039 = vrot.lane.b32.xlu1 %v3469_v12, %s3115_s17 }
  0xf4   : > { %v1254_v49 = vsel %vm1241_vm0, %v1230_v57, %v1232_v28  ;;  %v4611_v28 = vld [vmem:[#allocation19_spill] sm:$0xff] }
  0xf5   : > { %v1238_v38 = vpop.permute.xlu1 %1237  ;;  %1287 = vmatpush1.bf16.msra.mxu1 %v1254_v49  ;;  %2045 = vrot.lane.b32.xlu0 %v3484_v16, %s3115_s17  ;;  %v4612_v57 = vld [vmem:[#allocation23_spill] sm:$0xff] }
  0xf7   : > { %v1240_v10 = vpop.permute.xlu0 %1239  ;;  %2043 = vrot.lane.b32.xlu1 %v3449_v4, %s3115_s17 }
  0xf8   : > { %v1257_v45 = vsel %vm1241_vm0, %v1238_v38, %v1240_v10 }
  0xf9   : > { %v1236_v60 = vpop.permute.xlu1 %1235  ;;  %1288 = vmatprep.subr.bf16.mxu1 %v1257_v45  ;;  %2049 = vrot.lane.b32.xlu0 %v3460_v8, %s3115_s17  ;;  %v4613_v45 = vld [vmem:[#allocation21_spill] sm:$0xff] }
  0xfa   : > { %v1256_v12 = vsel %vm1241_vm0, %v1236_v60, %v1238_v38 }
  0xfb   : > { %1289 = vmatpush1.bf16.msra.mxu1 %v1256_v12  ;;  %v1616_v61 = vpop.permute.xlu0 %1615  ;;  %2047 = vrot.lane.b32.xlu1 %v3440_v1, %s3115_s17 }
  0xfc   : > { %2635 = vmatprep.subr.bf16.mxu1 %v3390_v46  ;;  %v2925_v46 = vld [vmem:[%s4542_s2 + $0x48] sm:$0xff]  }
  0xfd   : > { %v1618_v4 = vpop.permute.xlu1 %1617  ;;  %2053 = vrot.lane.b32.xlu0 %v3487_v17, %s3115_s17 }
  0xfe   : > { %1307 = vmatmul.mubr.bf16.vlgmr.msra.gmra.mrb[0].mxu1 %v2923_v19  ;;  %v1663_v8 = vsel %vm1661_vm1, %v1616_v61, %v1618_v4  ;;  %v2933_v19 = vld [vmem:[%s4542_s2 + $0x70] sm:$0xff]  }
  0xff   : > { %1694 = vmatprep.subr.bf16.mxu0 %v1663_v8  ;;  %v1614_v16 = vpop.permute.xlu0 %1613  ;;  %1316 = vmatprep.mubr.bf16.mxu1 %v3116_v59  ;;  %v4615_v4 = vld [vmem:[#allocation20_spill] sm:$0xff] }
 0x100   : > { %v1662_v13 = vsel %vm1661_vm1, %v1614_v16, %v1616_v61  ;;  %2643 = vmatpush1.bf16.msra.mxu1 %v3410_v54  ;;  %2051 = vrot.lane.b32.xlu1 %v3528_v35, %s3115_s17  ;;  %v4614_v61 = vld [vmem:[#allocation22_spill] sm:$0xff]  ;;  %v4616_v8 = vld [vmem:[#allocation24_spill] sm:$0xff]  ;;  %v2935_v16 = vld [vmem:[%s4542_s2 + $0x78] sm:$0xff]  }
 0x101   : > { %v1622_v1 = vpop.permute.xlu1 %1621  ;;  %1695 = vmatpush1.bf16.msra.mxu0 %v1662_v13  ;;  %2636 = vmatprep.subr.bf16.mxu1 %v3443_v2  ;;  %v2936_v13 = vld [vmem:[%s4542_s2 + $0x88] sm:$0xff]  }
 0x102   : > { %2057 = vrot.lane.b32.xlu0 %v3537_v43, %s3115_s17 }
 0x103   : > { %v1624_v17 = vpop.permute.xlu0 %1623 }
 0x104   : > { %v1665_v36 = vsel %vm1661_vm1, %v1622_v1, %v1624_v17  ;;  %2644 = vmatpush1.bf16.msra.mxu1 %v3489_v18  ;;  %2055 = vrot.lane.b32.xlu1 %v3500_v22, %s3115_s17  ;;  %v2942_v17 = vld [vmem:[%s4542_s2 + $0xa0] sm:$0xff]  }
 0x105   : > { %v1620_v54 = vpop.permute.xlu1 %1619  ;;  %1696 = vmatprep.subr.bf16.mxu0 %v1665_v36  ;;  %2637 = vmatprep.subr.bf16.mxu1 %v3504_v23  ;;  %v2926_v23 = vld [vmem:[%s4542_s2 + $0x50] sm:$0xff]   ;;  %v2943_v36 = vld [vmem:[%s4542_s2 + $0x38] sm:$0xff]  }
 0x106   : > { %v1664_v2 = vsel %vm1661_vm1, %v1620_v54, %v1622_v1  ;;  %1317 = vmatmul.mubr.bf16.gmra.mrb[4].mxu1 %v2925_v46  ;;  %2061 = vrot.lane.b32.xlu0 %v3510_v26, %s3115_s17  ;;  %v2937_v1 = vld [vmem:[%s4542_s2 + $0x20] sm:$0xff]   ;;  %v2941_v46 = vld [vmem:[%s4542_s2 + $0x30] sm:$0xff]   ;;  %v2944_v54 = vld [vmem:[%s4542_s2 + $0xa8] sm:$0xff]  }
 0x107   : > { %1697 = vmatpush1.bf16.msra.mxu0 %v1664_v2  ;;  %v1628_v35 = vpop.permute.xlu0 %1627  ;;  %1326 = vmatprep.mubr.bf16.mxu1 %v3116_v59  ;;  %v2945_v2 = vld [vmem:[%s4542_s2 + $0xb0] sm:$0xff]  }
 0x108   : > { %2645 = vmatpush1.bf16.msra.mxu1 %v3541_v47  ;;  %2059 = vrot.lane.b32.xlu1 %v3497_v21, %s3115_s17 }
 0x109   : > { %v1630_v18 = vpop.permute.xlu1 %1629  ;;  %2638 = vmatprep.subr.bf16.mxu1 %v3565_v62  ;;  %v4602_v62 = vld [vmem:[#allocation11_spill] sm:$0xff] }
 0x10a   : > { %v1667_v22 = vsel %vm1661_vm1, %v1628_v35, %v1630_v18  ;;  %2065 = vrot.lane.b32.xlu0 %v3549_v51, %s3115_s17 }
 0x10b   : > { %1698 = vmatprep.subr.bf16.mxu0 %v1667_v22  ;;  %v1626_v26 = vpop.permute.xlu0 %1625 }
 0x10c   : > { %v1666_v43 = vsel %vm1661_vm1, %v1626_v26, %v1628_v35  ;;  %2646 = vmatpush1.bf16.msra.mxu1 %v3604_v24  ;;  %2063 = vrot.lane.b32.xlu1 %v3583_v7, %s3115_s17  ;;  %v2946_v35 = vld [vmem:[%s4542_s2 + $0xb8] sm:$0xff]  }
 0x10d   : > { %v1634_v21 = vpop.permute.xlu1 %1633  ;;  %1699 = vmatpush1.bf16.msra.mxu0 %v1666_v43  ;;  %2639 = vmatprep.subr.bf16.mxu1 %v3635_v55  ;;  %v4603_v55 = vld [vmem:[#allocation12_spill] sm:$0xff] }
 0x10e   : > { %1327 = vmatmul.mubr.bf16.gmra.mrb[8].mxu1 %v2926_v23  ;;  %2069 = vrot.lane.b32.xlu0 %v3595_v15, %s3115_s17  ;;  %v2927_v15 = vld [vmem:[%s4542_s2 + $0x58] sm:$0xff]  }
 0x10f   : > { %v1636_v47 = vpop.permute.xlu0 %1635  ;;  %1336 = vmatprep.mubr.bf16.mxu1 %v3116_v59 }
 0x110   : > { %v1669_v51 = vsel %vm1661_vm1, %v1634_v21, %v1636_v47  ;;  %2647 = vmatpush1.bf16.msra.mxu1 %v3660_v14  ;;  %2067 = vrot.lane.b32.xlu1 %v4602_v62, %s3115_s17  ;;  %v4604_v14 = vld [vmem:[#allocation10_spill] sm:$0xff] }
 0x111   : > { %v1632_v24 = vpop.permute.xlu1 %1631  ;;  %1700 = vmatprep.subr.bf16.mxu0 %v1669_v51  ;;  %2640 = vmatprep.subr.bf16.mxu1 %v3693_v52 }
 0x112   : > { %v1668_v7 = vsel %vm1661_vm1, %v1632_v24, %v1634_v21  ;;  %2073 = vrot.lane.b32.xlu0 %v4603_v55, %s3115_s17 }
 0x113   : > { %1701 = vmatpush1.bf16.msra.mxu0 %v1668_v7  ;;  %v1640_v9 = vpop.permute.xlu0 %1639 }
 0x114   : > { %2648 = vmatpush1.bf16.msra.mxu1 %v3722_v58  ;;  %2071 = vrot.lane.b32.xlu1 %v4604_v14, %s3115_s17  ;;  %v4606_v58 = vld [vmem:[#allocation17_spill] sm:$0xff] }
 0x115   : > { %v1642_v20 = vpop.permute.xlu1 %1641  ;;  %2641 = vmatprep.subr.bf16.mxu1 %v3743_v3  ;;  %v2929_v3 = vld [vmem:[%s4542_s2 + $0x60] sm:$0xff]  }
 0x116   : > { %1337 = vmatmul.mubr.bf16.gmra.mrb[12].mxu1 %v2927_v15  ;;  %v1671_v52 = vsel %vm1661_vm1, %v1640_v9, %v1642_v20  ;;  %2077 = vrot.lane.b32.xlu0 %v4605_v32, %s3115_s17 }
 0x117   : > { %1702 = vmatprep.subr.bf16.mxu0 %v1671_v52  ;;  %v1638_v0 = vpop.permute.xlu0 %1637  ;;  %1346 = vmatprep.mubr.bf16.mxu1 %v3116_v59 }
 0x118   : > { %v1670_v34 = vsel %vm1661_vm1, %v1638_v0, %v1640_v9  ;;  %2649 = vmatpush1.bf16.msra.mxu1 %v3776_v42  ;;  %2075 = vrot.lane.b32.xlu1 %v4606_v58, %s3115_s17  ;;  %v4608_v42 = vld [vmem:[#allocation15_spill] sm:$0xff] }
 0x119   : > { %v1646_v50 = vpop.permute.xlu1 %1645  ;;  %1703 = vmatpush1.bf16.msra.mxu0 %v1670_v34  ;;  %2642 = vmatprep.subr.bf16.mxu1 %v3785_v56  ;;  %v4609_v56 = vld [vmem:[#allocation16_spill] sm:$0xff] }
 0x11a   : > { %2081 = vrot.lane.b32.xlu0 %v4607_v29, %s3115_s17 }
 0x11b   : > { %v1648_v37 = vpop.permute.xlu0 %1647 }
 0x11c   : > { %v1673_v39 = vsel %vm1661_vm1, %v1646_v50, %v1648_v37  ;;  %2650 = vmatpush1.bf16.msra.mxu1 %v3803_v30  ;;  %2079 = vrot.lane.b32.xlu1 %v4608_v42, %s3115_s17 }
 0x11d   : > { %v1644_v40 = vpop.permute.xlu1 %1643  ;;  %1704 = vmatprep.subr.bf16.mxu0 %v1673_v39 }
 0x11e   : > { %v1672_v63 = vsel %vm1661_vm1, %v1644_v40, %v1646_v50  ;;  %1347 = vmatmul.mubr.bf16.gmra.mrb[16].mxu1 %v2929_v3  ;;  %2085 = vrot.lane.b32.xlu0 %v4609_v56, %s3115_s17 }
 0x11f   : > { %1705 = vmatpush1.bf16.msra.mxu0 %v1672_v63  ;;  %v1652_v25 = vpop.permute.xlu0 %1651  ;;  %1356 = vmatprep.mubr.bf16.mxu1 %v3116_v59 }
 0x120   : > { %2083 = vrot.lane.b32.xlu1 %v4610_v33, %s3115_s17 }
 0x121   : > { %v1654_v44 = vpop.permute.xlu1 %1653 }
 0x122   : > { %v1675_v30 = vsel %vm1661_vm1, %v1652_v25, %v1654_v44  ;;  %2089 = vrot.lane.b32.xlu0 %v4611_v28, %s3115_s17 }
 0x123   : > { %1706 = vmatprep.subr.bf16.mxu0 %v1675_v30  ;;  %v1650_v5 = vpop.permute.xlu0 %1649 }
 0x124   : > { %v1674_v48 = vsel %vm1661_vm1, %v1650_v5, %v1652_v25  ;;  %2087 = vrot.lane.b32.xlu1 %v4612_v57, %s3115_s17 }
 0x125   : > { %v1658_v49 = vpop.permute.xlu1 %1657  ;;  %1707 = vmatpush1.bf16.msra.mxu0 %v1674_v48 }
 0x126   : > { %1357 = vmatmul.mubr.bf16.gmra.mrb[20].mxu1 %v2931_v53  ;;  %2093 = vrot.lane.b32.xlu0 %v3690_v6, %s3115_s17  ;;  %v2934_v6 = vld [vmem:[%s4542_s2 + $0x80] sm:$0xff]  }
 0x127   : > { %v1660_v38 = vpop.permute.xlu0 %1659  ;;  %1366 = vmatprep.mubr.bf16.mxu1 %v3116_v59 }
 0x128   : > { %v1677_v10 = vsel %vm1661_vm1, %v1658_v49, %v1660_v38  ;;  %2091 = vrot.lane.b32.xlu1 %v4613_v45, %s3115_s17 }
 0x129   : > { %v1656_v60 = vpop.permute.xlu1 %1655  ;;  %1708 = vmatprep.subr.bf16.mxu0 %v1677_v10 }
 0x12a   : > { %v1676_v12 = vsel %vm1661_vm1, %v1656_v60, %v1658_v49  ;;  %2097 = vrot.lane.b32.xlu0 %v4614_v61, %s3115_s17 }
 0x12b   : > { %1709 = vmatpush1.bf16.msra.mxu0 %v1676_v12 }
 0x12c   : > { %2095 = vrot.lane.b32.xlu1 %v4615_v4, %s3115_s17 }
 0x12e   : > { %1367 = vmatmul.mubr.bf16.gmra.mrb[24].mxu1 %v2933_v19  ;;  %1727 = vmatmul.mubr.bf16.vlgmr.msra.gmra.mrb[0].mxu0 %v2934_v6 }
 0x12f   : > { %1376 = vmatprep.mubr.bf16.mxu1 %v3116_v59  ;;  %1736 = vmatprep.mubr.bf16.mxu0 %v3116_v59 }
 0x130   : > { %2099 = vrot.lane.b32.xlu1 %v3762_v11, %s3115_s17  ;;  %2101 = vrot.lane.b32.xlu0 %v4616_v8, %s3115_s17  ;;  %v4617_v11 = vld [vmem:[#allocation25_spill] sm:$0xff] }
 0x134   : > { %2103 = vrot.lane.b32.xlu1 %v3728_v31, %s3115_s17  ;;  %2105 = vrot.lane.b32.xlu0 %v3765_v41, %s3115_s17  ;;  %v2938_v31 = vld [vmem:[%s4542_s2 + $0x90] sm:$0xff]   ;;  %v2939_v41 = vld [vmem:[%s4542_s2 + $0x28] sm:$0xff]  }
 0x136   : > { %1377 = vmatmul.mubr.bf16.gmra.mrb[28].mxu1 %v2935_v16  ;;  %1737 = vmatmul.mubr.bf16.gmra.mrb[4].mxu0 %v2936_v13 }
 0x137   : > { %1507 = vmatprep.mubr.bf16.mxu1 %v3116_v59  ;;  %1746 = vmatprep.mubr.bf16.mxu0 %v3116_v59 }
 0x138   : > { %2107 = vrot.lane.b32.xlu1 %v4617_v11, %s3115_s17  ;;  %2109 = vrot.lane.b32.xlu0 %v3731_v27, %s3115_s17  ;;  %v2940_v27 = vld [vmem:[%s4542_s2 + $0x98] sm:$0xff]   ;;  %v4150_v22 = vpop.permute.xlu0 %1857 }
 0x13a   : > { %v4148_v18 = vpop.permute.xlu1 %1862 }
 0x13c   : > { %v4154_v26 = vpop.permute.xlu0 %1872 }
 0x13e   : > { %1508 = vmatmul.mubr.bf16.vlgmr.msra.gmra.mrb[16].mxu1 %v2937_v1  ;;  %1747 = vmatmul.mubr.bf16.gmra.mrb[8].mxu0 %v2938_v31  ;;  %v4152_v23 = vpop.permute.xlu1 %1867 }
 0x13f   : > { %1517 = vmatprep.mubr.bf16.mxu1 %v3116_v59  ;;  %1756 = vmatprep.mubr.bf16.mxu0 %v3116_v59 }
 0x140   : > { %v4158_v21 = vpop.permute.xlu0 %1882 }
 0x142   : > { %v4156_v43 = vpop.permute.xlu1 %1877 }
 0x146   : > { %1518 = vmatmul.mubr.bf16.gmra.mrb[20].mxu1 %v2939_v41  ;;  %1757 = vmatmul.mubr.bf16.gmra.mrb[12].mxu0 %v2940_v27  ;;  %v4160_v47 = vpop.permute.xlu1 %1887 }
 0x147   : > { %1527 = vmatprep.mubr.bf16.mxu1 %v3116_v59  ;;  %1766 = vmatprep.mubr.bf16.mxu0 %v3116_v59 }
 0x14a   : > { %v4164_v51 = vpop.permute.xlu1 %1897 }
 0x14e   : > { %1528 = vmatmul.mubr.bf16.gmra.mrb[24].mxu1 %v2941_v46  ;;  %1767 = vmatmul.mubr.bf16.gmra.mrb[16].mxu0 %v2942_v17  ;;  %v4168_v24 = vpop.permute.xlu1 %1907 }
 0x14f   : > { %1537 = vmatprep.mubr.bf16.mxu1 %v3116_v59  ;;  %1776 = vmatprep.mubr.bf16.mxu0 %v3116_v59  ;;  %4619 = vst [vmem:[#allocation12_spill] sm:$0xff] %v4168_v24 }
 0x152   : > { %v4172_v15 = vpop.permute.xlu1 %1917 }
 0x153   : > { %4621 = vst [vmem:[#allocation13_spill] sm:$0xff] %v4172_v15 }
 0x156   : > { %1538 = vmatmul.mubr.bf16.gmra.mrb[28].mxu1 %v2943_v36  ;;  %1777 = vmatmul.mubr.bf16.gmra.mrb[20].mxu0 %v2944_v54  ;;  %v4176_v9 = vpop.permute.xlu1 %1927 }
 0x157   : > { %1786 = vmatprep.mubr.bf16.mxu0 %v3116_v59  ;;  %4623 = vst [vmem:[#allocation18_spill] sm:$0xff] %v4176_v9 }
 0x15a   : > { %v2016_v20 = vpop.permute.xlu1 %2015 }
 0x15e   : > { %1787 = vmatmul.mubr.bf16.gmra.mrb[24].mxu0 %v2945_v2  ;;  %v2020_v32 = vpop.permute.xlu1 %2019 }
 0x15f   : > { %1796 = vmatprep.mubr.bf16.mxu0 %v3116_v59  ;;  %v4162_v59 = vpop.permute.xlu0 %1892 }
 0x162   : > { %v2024_v34 = vpop.permute.xlu1 %2023 }
 0x163   : > { %v4166_v62 = vpop.permute.xlu0 %1902 }
 0x164   : > { %4618 = vst [vmem:[#allocation11_spill] sm:$0xff] %v4166_v62 }
 0x166   : > { %1797 = vmatmul.mubr.bf16.gmra.mrb[28].mxu0 %v2946_v35  ;;  %v4180_v50 = vpop.permute.xlu1 %2027 }
 0x167   : > { %v4170_v7 = vpop.permute.xlu0 %1912 }
 0x168   : > { %4620 = vst [vmem:[#allocation10_spill] sm:$0xff] %v4170_v7 }
 0x16a   : > { %v4184_v29 = vpop.permute.xlu1 %2031 }
 0x16b   : > { %v4174_v55 = vpop.permute.xlu0 %1922 }
 0x16c   : > { %4622 = vst [vmem:[#allocation17_spill] sm:$0xff] %v4174_v55 }
 0x16e   : > { %v4188_v39 = vpop.permute.xlu1 %2035 }
 0x16f   : > { %v4178_v14 = vpop.permute.xlu0 %1932 }
 0x170   : > { %4624 = vst [vmem:[#allocation15_spill] sm:$0xff] %v4178_v14 }
 0x172   : > { %v4192_v40 = vpop.permute.xlu1 %2039 }
 0x173   : > { %v2018_v52 = vpop.permute.xlu0 %2017 }
 0x176   : > { %v4196_v44 = vpop.permute.xlu1 %2043 }
 0x177   : > { %v2022_v0 = vpop.permute.xlu0 %2021 }
 0x17a   : > { %v4200_v5 = vpop.permute.xlu1 %2047 }
 0x17b   : > { %v2026_v58 = vpop.permute.xlu0 %2025 }
 0x17e   : > { %v4204_v10 = vpop.permute.xlu1 %2051 }
 0x17f   : > { %v4182_v3 = vpop.permute.xlu0 %2029 }
 0x182   : > { %v4216_v61 = vpop.permute.xlu1 %2055 }
 0x183   : > { %v4186_v37 = vpop.permute.xlu0 %2033 }
 0x186   : > { %v4226_v11 = vpop.permute.xlu1 %2059 }
 0x187   : > { %v4190_v42 = vpop.permute.xlu0 %2037 }
 0x18a   : > { %v4232_v41 = vpop.permute.xlu1 %2063 }
 0x18b   : > { %v4194_v63 = vpop.permute.xlu0 %2041  ;;  %4625 = vst [vmem:[#allocation16_spill] sm:$0xff] %v4232_v41 }
 0x18e   : > { %v4236_v46 = vpop.permute.xlu1 %2067 }
 0x18f   : > { %v4198_v53 = vpop.permute.xlu0 %2045  ;;  %4626 = vst [vmem:[#allocation14_spill] sm:$0xff] %v4236_v46 }
 0x192   : > { %v4240_v36 = vpop.permute.xlu1 %2071 }
 0x193   : > { %v4202_v57 = vpop.permute.xlu0 %2049  ;;  %4628 = vst [vmem:[#allocation23_spill] sm:$0xff] %v4240_v36 }
 0x196   : > { %v4244_v15 = vpop.permute.xlu1 %2075 }
 0x197   : > { %v4206_v45 = vpop.permute.xlu0 %2053  ;;  %4630 = vst [vmem:[#allocation22_spill] sm:$0xff] %v4244_v15 }
 0x19b   : > { %v4218_v4 = vpop.permute.xlu0 %2057 }
 0x19f   : > { %v4230_v31 = vpop.permute.xlu0 %2061 }
 0x1a3   : > { %v4234_v27 = vpop.permute.xlu0 %2065 }
 0x1a7   : > { %v4238_v17 = vpop.permute.xlu0 %2069 }
 0x1a8   : > { %4627 = vst [vmem:[#allocation19_spill] sm:$0xff] %v4238_v17  ;;  %v2112_v17 = vsel %vm1241_vm0, %v2016_v20, %v2018_v52 }
 0x1ab   : > { %v4242_v54 = vpop.permute.xlu0 %2073 }
 0x1ac   : > { %4629 = vst [vmem:[#allocation21_spill] sm:$0xff] %v4242_v54  ;;  %v2113_v54 = vsel %vm1241_vm0, %v2018_v52, %v2020_v32 }
 0x1af   : > { %v4247_v41 = vpop.permute.xlu0 %2077 }
 0x1b3   : > { %v4264_v52 = vpop.permute.xlu0 %2081 }
 0x1d1   : > { %v1308_v56 = vpop.f32.mrb[0].mxu1 }
 0x1d2   : > { %v1310_v25 = vpop.f32.mrb[1].mxu1 }
 0x1d3   : > { %v1312_v33 = vpop.f32.mrb[2].mxu1 }
 0x1d4   : > { %v1314_v30 = vpop.f32.mrb[3].mxu1 }
 0x1d9   : > { %v1318_v28 = vpop.f32.mrb[4].mxu1 }
 0x1da   : > { %v1320_v48 = vpop.f32.mrb[5].mxu1 }
 0x1db   : > { %v1322_v49 = vpop.f32.mrb[6].mxu1 }
 0x1dc   : > { %v1324_v38 = vpop.f32.mrb[7].mxu1 }
 0x1e1   : > { %v4208_v60 = vpop.f32.mrb[8].mxu1 }
 0x1e2   : > { %v4210_v12 = vpop.f32.mrb[9].mxu1 }
 0x1e3   : > { %v4212_v19 = vpop.f32.mrb[10].mxu1 }
 0x1e4   : > { %v4214_v6 = vpop.f32.mrb[11].mxu1 }
 0x1e9   : > { %v4220_v8 = vpop.f32.mrb[12].mxu1 }
 0x1ea   : > { %v4222_v16 = vpop.f32.mrb[13].mxu1 }
 0x1eb   : > { %v4224_v13 = vpop.f32.mrb[14].mxu1 }
 0x1ec   : > { %v4228_v1 = vpop.f32.mrb[15].mxu1 }
 0x201   : > { %v1728_v2 = vpop.f32.mrb[0].mxu0 }
 0x202   : > { %v2651_v35 = vadd.f32 %v1728_v2, %v1308_v56  ;;  %v1730_v14 = vpop.f32.mrb[1].mxu0 }
 0x203   : > { %v2652_v9 = vadd.f32 %v1730_v14, %v1310_v25  ;;  %v1732_v55 = vpop.f32.mrb[2].mxu0  ;;  %v2114_v25 = vsel %vm1241_vm0, %v2022_v0, %v2024_v34 }
 0x204   : > { %v1935_v7 = vadd.f32 %v2651_v35, %v4150_v22  ;;  %v2653_v24 = vadd.f32 %v1732_v55, %v1312_v33  ;;  %v1734_v62 = vpop.f32.mrb[3].mxu0  ;;  %v2115_v55 = vsel %vm1241_vm0, %v2024_v34, %v2026_v58 }
 0x205   : > { %v1936_v36 = vadd.f32 %v2652_v9, %v4150_v22  ;;  %v2654_v46 = vadd.f32 %v1734_v62, %v1314_v30  ;;  %v4261_v9 = vpop.permute.xlu1 %2079 }
 0x206   : > { %v2176_v56 = vadd.f32 %v2112_v17, %v1935_v7  ;;  %v1937_v14 = vadd.f32 %v2653_v24, %v4148_v18 }
 0x207   : > { %v2177_v2 = vadd.f32 %v2113_v54, %v1936_v36  ;;  %v1938_v15 = vadd.f32 %v2654_v46, %v4148_v18 }
 0x208   : > { %2208 = vst [vmem:[%s4257_s6] sm:$0xff] %v2176_v56  ;;  %v2178_v22 = vadd.f32 %v2114_v25, %v1937_v14 }
 0x209   : > { %2209 = vst [vmem:[%s4257_s6 + $0x8] sm:$0xff] %v2177_v2  ;;  %v2179_v62 = vadd.f32 %v2115_v55, %v1938_v15  ;;  %v1738_v7 = vpop.f32.mrb[4].mxu0  ;;  %v2116_v15 = vsel %vm1241_vm0, %v4180_v50, %v4182_v3 }
 0x20a   : > { %2210 = vst [vmem:[%s4257_s6 + $0x10] sm:$0xff] %v2178_v22  ;;  %v2655_v24 = vadd.f32 %v1738_v7, %v1318_v28  ;;  %v1740_v20 = vpop.f32.mrb[5].mxu0  ;;  %v2117_v28 = vsel %vm1241_vm0, %v4182_v3, %v4184_v29  ;;  %v4286_v3 = vpop.permute.xlu0 %2085  ;;  %v2121_v7 = vsel %vm1241_vm0, %v4194_v63, %v4196_v44 }
 0x20b   : > { %2211 = vst [vmem:[%s4257_s6 + $0x18] sm:$0xff] %v2179_v62  ;;  %v2656_v18 = vadd.f32 %v1740_v20, %v1320_v48  ;;  %v1742_v32 = vpop.f32.mrb[6].mxu0  ;;  %v2122_v20 = vsel %vm1241_vm0, %v4198_v53, %v4200_v5 }
 0x20c   : > { %v1939_v0 = vadd.f32 %v2655_v24, %v4152_v23  ;;  %v2657_v34 = vadd.f32 %v1742_v32, %v1322_v49  ;;  %v1744_v58 = vpop.f32.mrb[7].mxu0  ;;  %v2118_v49 = vsel %vm1241_vm0, %v4186_v37, %v4188_v39 }
 0x20d   : > { %v1940_v33 = vadd.f32 %v2656_v18, %v4152_v23  ;;  %v2658_v30 = vadd.f32 %v1744_v58, %v1324_v38  ;;  %v2119_v23 = vsel %vm1241_vm0, %v4188_v39, %v4190_v42  ;;  %v4284_v38 = vpop.permute.xlu1 %2083 }
 0x20e   : > { %v2180_v46 = vadd.f32 %v2116_v15, %v1939_v0  ;;  %v1941_v48 = vadd.f32 %v2657_v34, %v4154_v26 }
 0x20f   : > { %v2181_v17 = vadd.f32 %v2117_v28, %v1940_v33  ;;  %v1942_v36 = vadd.f32 %v2658_v30, %v4154_v26 }
 0x210   : > { %2212 = vst [vmem:[%s4257_s6 + $0x20] sm:$0xff] %v2180_v46  ;;  %v2182_v50 = vadd.f32 %v2118_v49, %v1941_v48  ;;  %v2125_v49 = vsel %vm1241_vm0, %v4206_v45, %v4216_v61 }
 0x211   : > { %2213 = vst [vmem:[%s4257_s6 + $0x28] sm:$0xff] %v2181_v17  ;;  %v2183_v29 = vadd.f32 %v2119_v23, %v1942_v36  ;;  %v4289_v54 = vpop.f32.mrb[16].mxu1  ;;  %v1748_v35 = vpop.f32.mrb[8].mxu0  ;;  %v2126_v36 = vsel %vm1241_vm0, %v4218_v4, %v4226_v11 }
 0x212   : > { %2214 = vst [vmem:[%s4257_s6 + $0x30] sm:$0xff] %v2182_v50  ;;  %v2659_v37 = vadd.f32 %v1748_v35, %v4208_v60  ;;  %v4293_v56 = vpop.f32.mrb[17].mxu1  ;;  %v1750_v26 = vpop.f32.mrb[9].mxu0  ;;  %v2120_v60 = vsel %vm1241_vm0, %v4192_v40, %v4194_v63 }
 0x213   : > { %2215 = vst [vmem:[%s4257_s6 + $0x38] sm:$0xff] %v2183_v29  ;;  %v2660_v39 = vadd.f32 %v1750_v26, %v4210_v12  ;;  %v4297_v42 = vpop.f32.mrb[18].mxu1  ;;  %v1752_v14 = vpop.f32.mrb[10].mxu0 }
 0x214   : > { %v1943_v25 = vadd.f32 %v2659_v37, %v4156_v43  ;;  %v2661_v2 = vadd.f32 %v1752_v14, %v4212_v19  ;;  %v4301_v55 = vpop.f32.mrb[19].mxu1  ;;  %v1754_v22 = vpop.f32.mrb[11].mxu0 }
 0x215   : > { %v1944_v62 = vadd.f32 %v2660_v39, %v4156_v43  ;;  %v2662_v12 = vadd.f32 %v1754_v22, %v4214_v6  ;;  %v2123_v43 = vsel %vm1241_vm0, %v4200_v5, %v4202_v57  ;;  %v4320_v32 = vpop.permute.xlu1 %2087  ;;  %v4322_v63 = vpop.permute.xlu0 %2089  ;;  %v4631_v22 = vld [vmem:[#allocation16_spill] sm:$0xff] }
 0x216   : > { %v2184_v24 = vadd.f32 %v2120_v60, %v1943_v25  ;;  %v1945_v19 = vadd.f32 %v2661_v2, %v4158_v21  ;;  %v2128_v60 = vsel %vm1241_vm0, %v4631_v22, %v4234_v27  ;;  %v4640_v22 = vld [vmem:[#allocation13_spill] sm:$0xff] }
 0x217   : > { %v2185_v18 = vadd.f32 %v2121_v7, %v1944_v62  ;;  %v1946_v40 = vadd.f32 %v2662_v12, %v4158_v21  ;;  %v4632_v12 = vld [vmem:[#allocation14_spill] sm:$0xff] }
 0x218   : > { %2216 = vst [vmem:[%s4257_s6 + $0x40] sm:$0xff] %v2184_v24  ;;  %v2186_v6 = vadd.f32 %v2122_v20, %v1945_v19  ;;  %v4633_v24 = vld [vmem:[#allocation11_spill] sm:$0xff] }
 0x219   : > { %2217 = vst [vmem:[%s4257_s6 + $0x48] sm:$0xff] %v2185_v18  ;;  %v2187_v44 = vadd.f32 %v2123_v43, %v1946_v40  ;;  %v4325_v0 = vpop.f32.mrb[20].mxu1  ;;  %v1758_v34 = vpop.f32.mrb[12].mxu0  ;;  %v4635_v20 = vld [vmem:[#allocation19_spill] sm:$0xff] }
 0x21a   : > { %2218 = vst [vmem:[%s4257_s6 + $0x50] sm:$0xff] %v2186_v6  ;;  %v2663_v53 = vadd.f32 %v1758_v34, %v4220_v8  ;;  %v4329_v58 = vpop.f32.mrb[21].mxu1  ;;  %v1760_v21 = vpop.f32.mrb[13].mxu0  ;;  %v2124_v8 = vsel %vm1241_vm0, %v4204_v10, %v4206_v45  ;;  %v4636_v6 = vld [vmem:[#allocation21_spill] sm:$0xff] }
 0x21b   : > { %2219 = vst [vmem:[%s4257_s6 + $0x58] sm:$0xff] %v2187_v44  ;;  %v2664_v5 = vadd.f32 %v1760_v21, %v4222_v16  ;;  %v4333_v57 = vpop.f32.mrb[22].mxu1  ;;  %v1762_v15 = vpop.f32.mrb[14].mxu0 }
 0x21c   : > { %v1947_v33 = vadd.f32 %v2663_v53, %v4160_v47  ;;  %v2665_v30 = vadd.f32 %v1762_v15, %v4224_v13  ;;  %v4337_v28 = vpop.f32.mrb[23].mxu1  ;;  %v1764_v46 = vpop.f32.mrb[15].mxu0 }
 0x21d   : > { %v1948_v48 = vadd.f32 %v2664_v5, %v4160_v47  ;;  %v2666_v16 = vadd.f32 %v1764_v46, %v4228_v1  ;;  %v2127_v47 = vsel %vm1241_vm0, %v4226_v11, %v4230_v31  ;;  %v4356_v50 = vpop.permute.xlu1 %2091  ;;  %v4358_v45 = vpop.permute.xlu0 %2093 }
 0x21e   : > { %v2188_v17 = vadd.f32 %v2124_v8, %v1947_v33  ;;  %v1949_v13 = vadd.f32 %v2665_v30, %v4162_v59 }
 0x21f   : > { %v2189_v23 = vadd.f32 %v2125_v49, %v1948_v48  ;;  %v1950_v10 = vadd.f32 %v2666_v16, %v4162_v59  ;;  %v4637_v48 = vld [vmem:[#allocation12_spill] sm:$0xff] }
 0x220   : > { %2220 = vst [vmem:[%s4257_s6 + $0x60] sm:$0xff] %v2188_v17  ;;  %v2190_v1 = vadd.f32 %v2126_v36, %v1949_v13  ;;  %v4638_v36 = vld [vmem:[#allocation22_spill] sm:$0xff] }
 0x221   : > { %2221 = vst [vmem:[%s4257_s6 + $0x68] sm:$0xff] %v2189_v23  ;;  %v2191_v61 = vadd.f32 %v2127_v47, %v1950_v10  ;;  %v1529_v29 = vpop.f32.mrb[24].mxu1  ;;  %v1768_v35 = vpop.f32.mrb[16].mxu0  ;;  %v2132_v23 = vsel %vm1241_vm0, %v4638_v36, %v4247_v41 }
 0x222   : > { %2222 = vst [vmem:[%s4257_s6 + $0x70] sm:$0xff] %v2190_v1  ;;  %v2667_v4 = vadd.f32 %v1768_v35, %v4289_v54  ;;  %v1531_v37 = vpop.f32.mrb[25].mxu1  ;;  %v1770_v26 = vpop.f32.mrb[17].mxu0  ;;  %v4639_v1 = vld [vmem:[#allocation10_spill] sm:$0xff] }
 0x223   : > { %2223 = vst [vmem:[%s4257_s6 + $0x78] sm:$0xff] %v2191_v61  ;;  %v2668_v59 = vadd.f32 %v1770_v26, %v4293_v56  ;;  %v1533_v39 = vpop.f32.mrb[26].mxu1  ;;  %v1772_v11 = vpop.f32.mrb[18].mxu0  ;;  %v2129_v56 = vsel %vm1241_vm0, %v4234_v27, %v4632_v12  ;;  %v2134_v61 = vsel %vm1241_vm0, %v4264_v52, %v4284_v38 }
 0x224   : > { %v1951_v31 = vadd.f32 %v2667_v4, %v4164_v51  ;;  %v2669_v14 = vadd.f32 %v1772_v11, %v4297_v42  ;;  %v1535_v25 = vpop.f32.mrb[27].mxu1  ;;  %v1774_v2 = vpop.f32.mrb[19].mxu0  ;;  %v4634_v42 = vld [vmem:[#allocation23_spill] sm:$0xff] }
 0x225   : > { %v1952_v54 = vadd.f32 %v2668_v59, %v4164_v51  ;;  %v2670_v62 = vadd.f32 %v1774_v2, %v4301_v55  ;;  %v2130_v18 = vsel %vm1241_vm0, %v4635_v20, %v4634_v42  ;;  %v2131_v51 = vsel %vm1241_vm0, %v4634_v42, %v4636_v6  ;;  %v2096_v44 = vpop.permute.xlu1 %2095  ;;  %v2098_v34 = vpop.permute.xlu0 %2097 }
 0x226   : > { %v2192_v7 = vadd.f32 %v2128_v60, %v1951_v31  ;;  %v1953_v19 = vadd.f32 %v2669_v14, %v4633_v24  ;;  %v2139_v20 = vsel %vm1241_vm0, %v2096_v44, %v2098_v34 }
 0x227   : > { %v2193_v40 = vadd.f32 %v2129_v56, %v1952_v54  ;;  %v1954_v43 = vadd.f32 %v2670_v62, %v4633_v24 }
 0x228   : > { %2224 = vst [vmem:[%s4257_s6 + $0x80] sm:$0xff] %v2192_v7  ;;  %v2194_v55 = vadd.f32 %v2130_v18, %v1953_v19  ;;  %v4641_v7 = vld [vmem:[#allocation17_spill] sm:$0xff]  ;;  %v2138_v19 = vsel %vm1241_vm0, %v4358_v45, %v2096_v44 }
 0x229   : > { %2225 = vst [vmem:[%s4257_s6 + $0x88] sm:$0xff] %v2193_v40  ;;  %v2195_v27 = vadd.f32 %v2131_v51, %v1954_v43  ;;  %v1539_v53 = vpop.f32.mrb[28].mxu1  ;;  %v1778_v21 = vpop.f32.mrb[20].mxu0 }
 0x22a   : > { %2226 = vst [vmem:[%s4257_s6 + $0x90] sm:$0xff] %v2194_v55  ;;  %v2671_v5 = vadd.f32 %v1778_v21, %v4325_v0  ;;  %v1541_v15 = vpop.f32.mrb[29].mxu1  ;;  %v1780_v33 = vpop.f32.mrb[21].mxu0  ;;  %v4642_v55 = vld [vmem:[#allocation18_spill] sm:$0xff] }
 0x22b   : > { %2227 = vst [vmem:[%s4257_s6 + $0x98] sm:$0xff] %v2195_v27  ;;  %v2672_v30 = vadd.f32 %v1780_v33, %v4329_v58  ;;  %v1543_v46 = vpop.f32.mrb[30].mxu1  ;;  %v1782_v8 = vpop.f32.mrb[22].mxu0  ;;  %v2133_v58 = vsel %vm1241_vm0, %v4247_v41, %v4261_v9 }
 0x22c   : > { %v1955_v16 = vadd.f32 %v2671_v5, %v4637_v48  ;;  %v2673_v49 = vadd.f32 %v1782_v8, %v4333_v57  ;;  %v1545_v17 = vpop.f32.mrb[31].mxu1  ;;  %v1784_v13 = vpop.f32.mrb[23].mxu0 }
 0x22d   : > { %v1956_v0 = vadd.f32 %v2672_v30, %v4637_v48  ;;  %v2674_v10 = vadd.f32 %v1784_v13, %v4337_v28  ;;  %v2102_v26 = vpop.permute.xlu0 %2101  ;;  %v2135_v28 = vsel %vm1241_vm0, %v4284_v38, %v4286_v3  ;;  %v2100_v11 = vpop.permute.xlu1 %2099  ;;  %v2136_v38 = vsel %vm1241_vm0, %v4320_v32, %v4322_v63 }
 0x22e   : > { %v2196_v47 = vadd.f32 %v2132_v23, %v1955_v16  ;;  %v1957_v57 = vadd.f32 %v2673_v49, %v4639_v1  ;;  %v2140_v44 = vsel %vm1241_vm0, %v2100_v11, %v2102_v26  ;;  %v2266_v23 = vld [vmem:[%s4257_s6 + $0x8] sm:$0xff] (%p3236_p10)  ;;  %v2292_v11 = vld [vmem:[%s4257_s6 + $0x70] sm:$0xff] (%p3236_p10) }
 0x22f   : > { %v2197_v35 = vadd.f32 %v2133_v58, %v1956_v0  ;;  %v1958_v4 = vadd.f32 %v2674_v10, %v4639_v1  ;;  %v2268_v0 = vld [vmem:[%s4257_s6 + $0x10] sm:$0xff] (%p3236_p10)  ;;  %v2270_v10 = vld [vmem:[%s4257_s6 + $0x18] sm:$0xff] (%p3236_p10)  ;;  %v2272_v58 = vld [vmem:[%s4257_s6 + $0x20] sm:$0xff] (%p3236_p10)  ;;  %2267 = vst [vmem:[%s4456_s0 + $0x8] sm:$0xff] (%p3236_p10), %v2266_v23 }
 0x230   : > { %2228 = vst [vmem:[%s4257_s6 + $0xa0] sm:$0xff] %v2196_v47  ;;  %v2198_v59 = vadd.f32 %v2134_v61, %v1957_v57  ;;  %v2274_v47 = vld [vmem:[%s4257_s6 + $0x28] sm:$0xff] (%p3236_p10)  ;;  %v2276_v1 = vld [vmem:[%s4257_s6 + $0x30] sm:$0xff] (%p3236_p10)  ;;  %v2278_v57 = vld [vmem:[%s4257_s6 + $0x38] sm:$0xff] (%p3236_p10) }
 0x231   : > { %2229 = vst [vmem:[%s4257_s6 + $0xa8] sm:$0xff] %v2197_v35  ;;  %v2199_v41 = vadd.f32 %v2135_v28, %v1958_v4  ;;  %v1788_v9 = vpop.f32.mrb[24].mxu0  ;;  %v2106_v56 = vpop.permute.xlu0 %2105  ;;  %v2280_v61 = vld [vmem:[%s4257_s6 + $0x40] sm:$0xff] (%p3236_p10)  ;;  %v2282_v35 = vld [vmem:[%s4257_s6 + $0x48] sm:$0xff] (%p3236_p10)  ;;  %v2284_v4 = vld [vmem:[%s4257_s6 + $0x50] sm:$0xff] (%p3236_p10) }
 0x232   : > { %2230 = vst [vmem:[%s4257_s6 + $0xb0] sm:$0xff] %v2198_v59  ;;  %v2675_v31 = vadd.f32 %v1788_v9, %v1529_v29  ;;  %v1790_v14 = vpop.f32.mrb[25].mxu0  ;;  %v2137_v29 = vsel %vm1241_vm0, %v4322_v63, %v4356_v50  ;;  %2269 = vst [vmem:[%s4456_s0 + $0x20] sm:$0xff] (%p3236_p10), %v2268_v0  ;;  %v2288_v28 = vld [vmem:[%s4257_s6 + $0x60] sm:$0xff] (%p3236_p10)  ;;  %v2290_v59 = vld [vmem:[%s4257_s6 + $0x68] sm:$0xff] (%p3236_p10) }
 0x233   : > { %2231 = vst [vmem:[%s4257_s6 + $0xb8] sm:$0xff] %v2199_v41  ;;  %v2676_v2 = vadd.f32 %v1790_v14, %v1531_v37  ;;  %v1792_v52 = vpop.f32.mrb[26].mxu0  ;;  %2271 = vst [vmem:[%s4456_s0 + $0x28] sm:$0xff] (%p3236_p10), %v2270_v10  ;;  %v2294_v41 = vld [vmem:[%s4257_s6 + $0x78] sm:$0xff] (%p3236_p10)  ;;  %v2296_v9 = vld [vmem:[%s4257_s6 + $0x80] sm:$0xff] (%p3236_p10) }
 0x234   : > { %v1959_v60 = vadd.f32 %v2675_v31, %v4640_v22  ;;  %v2677_v54 = vadd.f32 %v1792_v52, %v1533_v39  ;;  %v1794_v62 = vpop.f32.mrb[27].mxu0  ;;  %v2104_v39 = vpop.permute.xlu1 %2103  ;;  %2273 = vst [vmem:[%s4456_s0 + $0x40] sm:$0xff] (%p3236_p10), %v2272_v58  ;;  %2275 = vst [vmem:[%s4456_s0 + $0x48] sm:$0xff] (%p3236_p10), %v2274_v47  ;;  %v2298_v31 = vld [vmem:[%s4257_s6 + $0x88] sm:$0xff] (%p3236_p10)  ;;  %v2300_v14 = vld [vmem:[%s4257_s6 + $0x90] sm:$0xff] (%p3236_p10) }
 0x235   : > { %v1960_v3 = vadd.f32 %v2676_v2, %v4640_v22  ;;  %v2678_v12 = vadd.f32 %v1794_v62, %v1535_v25  ;;  %v2110_v51 = vpop.permute.xlu0 %2109  ;;  %2277 = vst [vmem:[%s4456_s0 + $0x60] sm:$0xff] (%p3236_p10), %v2276_v1  ;;  %2279 = vst [vmem:[%s4456_s0 + $0x68] sm:$0xff] (%p3236_p10), %v2278_v57  ;;  %v2302_v2 = vld [vmem:[%s4257_s6 + $0x98] sm:$0xff] (%p3236_p10) }
 0x236   : > { %v2200_v37 = vadd.f32 %v2136_v38, %v1959_v60  ;;  %v1961_v24 = vadd.f32 %v2677_v54, %v4641_v7  ;;  %2281 = vst [vmem:[%s4456_s0 + $0x80] sm:$0xff] (%p3236_p10), %v2280_v61  ;;  %2283 = vst [vmem:[%s4456_s0 + $0x88] sm:$0xff] (%p3236_p10), %v2282_v35 }
 0x237   : > { %v2201_v42 = vadd.f32 %v2137_v29, %v1960_v3  ;;  %v1962_v32 = vadd.f32 %v2678_v12, %v4641_v7  ;;  %2285 = vst [vmem:[%s4456_s0 + $0xa0] sm:$0xff] (%p3236_p10), %v2284_v4  ;;  %2289 = vst [vmem:[%s4456_s0 + $0xc0] sm:$0xff] (%p3236_p10), %v2288_v28  ;;  %v2304_v52 = vld [vmem:[%s4257_s6 + $0xa0] sm:$0xff] (%p3236_p10) }
 0x238   : > { %2232 = vst [vmem:[%s4257_s6 + $0xc0] sm:$0xff] %v2200_v37  ;;  %v2202_v25 = vadd.f32 %v2138_v19, %v1961_v24  ;;  %v2108_v21 = vpop.permute.xlu1 %2107  ;;  %2291 = vst [vmem:[%s4456_s0 + $0xc8] sm:$0xff] (%p3236_p10), %v2290_v59  ;;  %v2306_v22 = vld [vmem:[%s4257_s6 + $0xa8] sm:$0xff] (%p3236_p10) }
 0x239   : > { %2233 = vst [vmem:[%s4257_s6 + $0xc8] sm:$0xff] %v2201_v42  ;;  %v2203_v18 = vadd.f32 %v2139_v20, %v1962_v32  ;;  %v1798_v40 = vpop.f32.mrb[28].mxu0  ;;  %v2143_v48 = vsel %vm1241_vm0, %v2108_v21, %v2110_v51  ;;  %v2142_v49 = vsel %vm1241_vm0, %v2106_v56, %v2108_v21  ;;  %2293 = vst [vmem:[%s4456_s0 + $0xe0] sm:$0xff] (%p3236_p10), %v2292_v11  ;;  %v2308_v60 = vld [vmem:[%s4257_s6 + $0xb0] sm:$0xff] (%p3236_p10) }
 0x23a   : > { %2234 = vst [vmem:[%s4257_s6 + $0xd0] sm:$0xff] %v2202_v25  ;;  %v2679_v63 = vadd.f32 %v1798_v40, %v1539_v53  ;;  %v1800_v50 = vpop.f32.mrb[29].mxu0  ;;  %v2141_v53 = vsel %vm1241_vm0, %v2102_v26, %v2104_v39  ;;  %v2286_v26 = vld [vmem:[%s4257_s6 + $0x58] sm:$0xff] (%p3236_p10)  ;;  %2295 = vst [vmem:[%s4456_s0 + $0xe8] sm:$0xff] (%p3236_p10), %v2294_v41 }
 0x23b   : > { %2235 = vst [vmem:[%s4257_s6 + $0xd8] sm:$0xff] %v2203_v18  ;;  %v2680_v43 = vadd.f32 %v1800_v50, %v1541_v15  ;;  %v1802_v6 = vpop.f32.mrb[30].mxu0  ;;  %v4643_v15 = vld [vmem:[#allocation15_spill] sm:$0xff]  ;;  %2287 = vst [vmem:[%s4456_s0 + $0xa8] sm:$0xff] (%p3236_p10), %v2286_v26  ;;  %v2310_v54 = vld [vmem:[%s4257_s6 + $0xb8] sm:$0xff] (%p3236_p10) }
 0x23c   : > { %v1963_v45 = vadd.f32 %v2679_v63, %v4642_v55  ;;  %v2681_v27 = vadd.f32 %v1802_v6, %v1543_v46  ;;  %v1804_v5 = vpop.f32.mrb[31].mxu0  ;;  %2297 = vst [vmem:[%s4456_s0 + $0x100] sm:$0xff] (%p3236_p10), %v2296_v9  ;;  %2299 = vst [vmem:[%s4456_s0 + $0x108] sm:$0xff] (%p3236_p10), %v2298_v31 }
 0x23d   : > { %v1964_v34 = vadd.f32 %v2680_v43, %v4642_v55  ;;  %v2682_v33 = vadd.f32 %v1804_v5, %v1545_v17  ;;  %2246 = sbr.rel (!%p3236_p10) target bundleno = 588 (0x24c), region = 144  ;;  %v2264_v17 = vld [vmem:[%s4257_s6] sm:$0xff] (%p3236_p10)  ;;  %2301 = vst [vmem:[%s4456_s0 + $0x120] sm:$0xff] (%p3236_p10), %v2300_v14  ;;  %2303 = vst [vmem:[%s4456_s0 + $0x128] sm:$0xff] (%p3236_p10), %v2302_v2 }
 0x23e   : > { %v2204_v30 = vadd.f32 %v2140_v44, %v1963_v45  ;;  %v1965_v8 = vadd.f32 %v2681_v27, %v4643_v15  ;;  %2265 = vst [vmem:[%s4456_s0] sm:$0xff] (%p3236_p10), %v2264_v17  ;;  %2305 = vst [vmem:[%s4456_s0 + $0x140] sm:$0xff] (%p3236_p10), %v2304_v52 }
 0x23f   : > { %v2205_v16 = vadd.f32 %v2141_v53, %v1964_v34  ;;  %v1966_v46 = vadd.f32 %v2682_v33, %v4643_v15  ;;  %2307 = vst [vmem:[%s4456_s0 + $0x148] sm:$0xff] (%p3236_p10), %v2306_v22  ;;  %2309 = vst [vmem:[%s4456_s0 + $0x160] sm:$0xff] (%p3236_p10), %v2308_v60  ;;  %v2312_v62 = vld [vmem:[%s4257_s6 + $0xc0] sm:$0xff] (%p3236_p10) }
 0x240   : > { %2236 = vst [vmem:[%s4257_s6 + $0xe0] sm:$0xff] %v2204_v30  ;;  %v2206_v13 = vadd.f32 %v2142_v49, %v1965_v8  ;;  %2311 = vst [vmem:[%s4456_s0 + $0x168] sm:$0xff] (%p3236_p10), %v2310_v54  ;;  %v2314_v38 = vld [vmem:[%s4257_s6 + $0xc8] sm:$0xff] (%p3236_p10) }
 0x241   : > { %2237 = vst [vmem:[%s4257_s6 + $0xe8] sm:$0xff] %v2205_v16  ;;  %v2207_v36 = vadd.f32 %v2143_v48, %v1966_v46  ;;  %v2316_v3 = vld [vmem:[%s4257_s6 + $0xd0] sm:$0xff] (%p3236_p10)  ;;  %2313 = vst [vmem:[%s4456_s0 + $0x180] sm:$0xff] (%p3236_p10), %v2312_v62 }
 0x242   : > { %2238 = vst [vmem:[%s4257_s6 + $0xf0] sm:$0xff] %v2206_v13  ;;  %2315 = vst [vmem:[%s4456_s0 + $0x188] sm:$0xff] (%p3236_p10), %v2314_v38  ;;  %v2318_v12 = vld [vmem:[%s4257_s6 + $0xd8] sm:$0xff] (%p3236_p10) }
 0x243   : > { %2239 = vst [vmem:[%s4257_s6 + $0xf8] sm:$0xff] %v2207_v36  ;;  %2317 = vst [vmem:[%s4456_s0 + $0x1a0] sm:$0xff] (%p3236_p10), %v2316_v3 }
 0x244   : > { %2319 = vst [vmem:[%s4456_s0 + $0x1a8] sm:$0xff] %v2318_v12 }
 0x247   : > { %v2320_v56 = vld [vmem:[%s4257_s6 + $0xe0] sm:$0xff] }
 0x248   : > { %v2322_v29 = vld [vmem:[%s4257_s6 + $0xe8] sm:$0xff]  ;;  %2321 = vst [vmem:[%s4456_s0 + $0x1c0] sm:$0xff] %v2320_v56 }
 0x249   : > { %2323 = vst [vmem:[%s4456_s0 + $0x1c8] sm:$0xff] %v2322_v29  ;;  %v2324_v37 = vld [vmem:[%s4257_s6 + $0xf0] sm:$0xff] }
 0x24a   : > { %v2326_v7 = vld [vmem:[%s4257_s6 + $0xf8] sm:$0xff]  ;;  %2325 = vst [vmem:[%s4456_s0 + $0x1e0] sm:$0xff] %v2324_v37 }
 0x24b   : > { %2327 = vst [vmem:[%s4456_s0 + $0x1e8] sm:$0xff] %v2326_v7 }
 0x24c PF: > { %s14_s23 = sadd.s32 1, %s3097_s23   ;;  %s4644_s17 = sld [smem:[#allocation5_spill]] }
 0x24d   : > { %p11_p3 = scmp.ge.s32.totalorder %s14_s23, 6   ;;  %s4645_s18 = sld [smem:[#allocation9_spill]] }
 0x24e   : > { %s4646_s19 = sld [smem:[#allocation6_spill]]  ;;  %s4647_s21 = sld [smem:[#allocation7_spill]] }
 0x24f   : > { %s4648_s29 = sld [smem:[#allocation8_spill]]  ;;  %s4649_s15 = smov %s3069_s16 }
 0x250   : > { %s4650_s16 = smov %s3225_s14  ;;  %s4651_s20 = smov %s3093_s22 }
 0x251   :  { %13 = sbr.rel (!%p11_p3) target bundleno = 7 (0x7), region = 270 }
 0x255   : > { %s4652_s22 = smov %s4648_s29 }

</bundles_post_ra>
